<compile_context>
chip_gen: v7x
topology: tpu7x:2x2x1
jax: 0.10.0
libtpu: 0.0.40
codegen_flags: <defaults>
</compile_context>

<pallas_src>
import numpy as np
import jax
import jax.numpy as jnp
from jax.experimental import pallas as pl
from jax.experimental.pallas import tpu as pltpu

HIGH = jax.lax.Precision.HIGHEST
PENALTY_FACTOR = 100000.0


# ----------------------------------------------------------------------------
# Pallas kernel
# ----------------------------------------------------------------------------
def make_rollout_kernel(TB, K, Hh, horizon, consts, *,
                        only_final_cost, fixed_end, forbidden):
    threeK = 3 * K
    fe, lc, lh, rc, rh, rope_len, step_w = consts   # python float constants

    def kernel(acts_ref, arep_ref, cs_ref, prep_ref, tgt_ref,
               w1p_ref, w1bs_ref, b1_ref, w2p_ref, b2p_ref, out_ref):
        relu = lambda x: jnp.maximum(x, 0.0)

        # hoisted loads: weights stay resident across the unrolled rollout
        w1p = w1p_ref[...]                    # (3K, H)
        w2p = w2p_ref[...]                    # (H, 3K)
        b1 = b1_ref[...]                      # (1, H)
        b2p = b2p_ref[...]                    # (1, 3K)
        w1bx = w1bs_ref[0:1, :]
        w1by = w1bs_ref[1:2, :]
        w1bz = w1bs_ref[2:3, :]
        tgtx = tgt_ref[0:1, :]
        tgty = tgt_ref[1:2, :]
        tgtz = tgt_ref[2:3, :]

        # action-dependent hidden-bias terms: hoisted off the recurrent chain
        hbias = []
        for j in range(horizon):
            a = acts_ref[j]                   # (TB, 3) pre-scaled action
            hbias.append(b1 - (a[:, 0:1] * w1bx + a[:, 1:2] * w1by
                               + a[:, 2:3] * w1bz))

        s = jnp.broadcast_to(cs_ref[...], (TB, threeK))       # rope keypoints
        prep = jnp.broadcast_to(prep_ref[...], (TB, threeK))  # pusher, lane-replicated

        costv = jnp.zeros((TB, K), jnp.float32)
        fpenv = jnp.zeros((TB, K), jnp.float32)
        fbpenv = jnp.zeros((TB, K), jnp.float32)
        ppen = jnp.zeros((TB, 1), jnp.float32)
        dx = dy = dz = jnp.zeros((TB, K), jnp.float32)

        for j in range(horizon):              # static full unroll
            arep = arep_ref[j]                # (TB, 3K) comp-major repeated action

            # ---- recurrent chain: exactly two MXU matmuls per step ----
            h = relu(jnp.dot(s, w1p, precision=HIGH,
                             preferred_element_type=jnp.float32) + hbias[j])
            u = s + jnp.dot(h, w2p, precision=HIGH,
                            preferred_element_type=jnp.float32) + b2p

            absr = u + prep                   # absolute keypoint positions
            s = u - arep                      # next rope state (curr_state -= a)
            prep = prep + arep                # pusher moves after abs_state taken

            # ---- off-chain cost / penalty work (overlaps next step's matmuls) ----
            absx = absr[:, 0:K]
            absy = absr[:, K:2 * K]
            absz = absr[:, 2 * K:3 * K]

            dx0 = tgtx - absx
            dy0 = tgty - absy
            dz0 = tgtz - absz
            add = dx0 * 0.3
            dx = dx0 + add
            dy = dy0 + add
            dz = dz0 + add
            costv = costv + (jnp.abs(dx) + jnp.abs(dy) + jnp.abs(dz)) * step_w[j]

            if fixed_end:
                rdx = absx - fe[0]
                rdy = absy - fe[1]
                rdz = absz - fe[2]
                rdis = rdx * rdx + rdy * rdy + rdz * rdz
                fpenv = fpenv + relu(rdis - rope_len)

            if forbidden:
                lpx = relu(lh[0] - jnp.abs(absx - lc[0]))
                lpy = relu(lh[1] - jnp.abs(absy - lc[1]))
                lpz = relu(lh[2] - jnp.abs(absz - lc[2]))
                lp = jnp.minimum(jnp.minimum(lpx, lpy), lpz)
                rpx = relu(rh[0] - jnp.abs(absx - rc[0]))
                rpy = relu(rh[1] - jnp.abs(absy - rc[1]))
                rpz = relu(rh[2] - jnp.abs(absz - rc[2]))
                rp = jnp.minimum(jnp.minimum(rpx, rpy), rpz)
                dpn = relu(0.5 - absz)
                fbpenv = fbpenv + lp + rp + dpn

            py = prep[:, K:K + 1]             # all y-lanes hold the same pusher-y
            pz = prep[:, 2 * K:2 * K + 1]     # all z-lanes hold the same pusher-z
            ppen = ppen + relu(1.1 - pz) + relu(-2.45 - py)

        # deferred cross-lane reductions (3 total instead of 3 per step)
        cost = jnp.sum(costv, axis=-1, keepdims=True)
        if only_final_cost:
            cost = jnp.sum(dx * dx + dy * dy + dz * dz, axis=-1, keepdims=True)
        penalty = (jnp.sum(fbpenv, axis=-1, keepdims=True)
                   + jnp.sum(fpenv, axis=-1, keepdims=True)
                   + ppen) * PENALTY_FACTOR
        out_ref[...] = cost + penalty

    return kernel


# ----------------------------------------------------------------------------
# Config preprocessing (glue, plain numpy)
# ----------------------------------------------------------------------------
def _derive_consts(cfg):
    if cfg.get("forbidden_area") is not None:
        fa = np.asarray(cfg["forbidden_area"], np.float32)
        lb, lt, rb, rt = fa
        left_center = (lb + lt) / 2
        left_half_edge = np.abs(lt - lb) / 2
        right_center = (rb + rt) / 2
        right_half_edge = np.abs(rt - rb) / 2
    else:
        left_center = np.zeros(3, np.float32)
        left_half_edge = np.zeros(3, np.float32)
        right_center = np.zeros(3, np.float32)
        right_half_edge = np.zeros(3, np.float32)
    rope_len_sq = np.float32(cfg["rope_length"] ** 2)   # rope_length_norm == 2
    step_w = (np.arange(1, cfg["horizon"] + 1) / cfg["horizon"]).astype(np.float32)
    return left_center, left_half_edge, right_center, right_half_edge, rope_len_sq, step_w


def _pick_batch_block(B):
    # largest batch block (multiple of 8) dividing B that still yields >=2 grid
    # steps, so v7x can shard the batch over both TensorCores.
    for tb in (128, 64, 32, 16, 8):
        if B % tb == 0 and B // tb >= 2:
            return tb
    return B


# ----------------------------------------------------------------------------
# Wrapper: parameter re-packing + pallas_call
# ----------------------------------------------------------------------------
def pallas_forward(act_seq, params, cfg):
    K, Hh, horizon = cfg["num_kp"], cfg["hidden"], cfg["horizon"]
    threeK = 3 * K
    lc, lh, rc, rh, rope_len_sq, step_w = _derive_consts(cfg)
    fe = cfg["rope_fixed_end"]
    fe = np.zeros(3, np.float32) if fe is None else np.asarray(fe, np.float32)

    # actions: scale, reorder to (horizon, B, 3) and lane-replicate (comp-major)
    action_norm = jnp.asarray(cfg["action_norm"], jnp.float32)
    act = jnp.asarray(act_seq, jnp.float32).reshape(-1, horizon, 3) * action_norm
    B = act.shape[0]
    acts = jnp.transpose(act, (1, 0, 2))                  # (horizon, B, 3)
    arep = jnp.repeat(acts, K, axis=-1)                   # (horizon, B, 3K)

    # algebraic re-pack of the MLP (attr = cat([s, s-a]) never materializes),
    # component-major to match the packed (B, 3K) state layout
    W1r = params["W1"].reshape(K, 2, 3, Hh)               # row = 6k + 3*part + c
    W1p = jnp.transpose(W1r[:, 0] + W1r[:, 1], (1, 0, 2)).reshape(threeK, Hh)
    W1bsum = jnp.sum(W1r[:, 1], axis=0)                   # (3, Hh)
    b1v = params["b1"].reshape(1, Hh)
    W2p = params["W2"].reshape(Hh, K, 3).transpose(0, 2, 1).reshape(Hh, threeK)
    b2p = params["b2"].reshape(K, 3).T.reshape(1, threeK)
    cs0 = params["curr_state"][0].T.reshape(1, threeK)    # (1, 3K) comp-major
    prep0 = jnp.repeat(params["refer_pos"].reshape(1, 3), K, axis=-1)  # (1, 3K)
    tgt = params["target_state"].T                        # (3, K)

    consts = (tuple(float(v) for v in fe),
              tuple(float(v) for v in lc), tuple(float(v) for v in lh),
              tuple(float(v) for v in rc), tuple(float(v) for v in rh),
              float(rope_len_sq), [float(w) for w in step_w])

    TB = _pick_batch_block(B)
    nb = B // TB

    kernel = make_rollout_kernel(
        TB, K, Hh, horizon, consts,
        only_final_cost=bool(cfg["only_final_cost"]),
        fixed_end=cfg["rope_fixed_end"] is not None,
        forbidden=cfg["forbidden_area"] is not None,
    )

    return pl.pallas_call(
        kernel,
        out_shape=jax.ShapeDtypeStruct((B, 1), jnp.float32),
        grid=(nb,),
        in_specs=[
            pl.BlockSpec((horizon, TB, 3), lambda i: (0, i, 0)),       # acts
            pl.BlockSpec((horizon, TB, threeK), lambda i: (0, i, 0)),  # arep
            pl.BlockSpec((1, threeK), lambda i: (0, 0)),               # cs0
            pl.BlockSpec((1, threeK), lambda i: (0, 0)),               # prep0
            pl.BlockSpec((3, K), lambda i: (0, 0)),                    # tgt
            pl.BlockSpec((threeK, Hh), lambda i: (0, 0)),              # W1p
            pl.BlockSpec((3, Hh), lambda i: (0, 0)),                   # W1bsum
            pl.BlockSpec((1, Hh), lambda i: (0, 0)),                   # b1
            pl.BlockSpec((Hh, threeK), lambda i: (0, 0)),              # W2p
            pl.BlockSpec((1, threeK), lambda i: (0, 0)),               # b2p
        ],
        out_specs=pl.BlockSpec((TB, 1), lambda i: (i, 0)),
        compiler_params=pltpu.CompilerParams(dimension_semantics=("parallel",)),
    )(acts, arep, cs0, prep0, tgt, W1p, W1bsum, b1v, W2p, b2p)


# ----------------------------------------------------------------------------
# Pure-JAX reference (faithful translation of the PyTorch forward)
# ----------------------------------------------------------------------------
def reference_forward(act_seq, params, cfg):
    K, horizon = cfg["num_kp"], cfg["horizon"]
    lc, lh, rc, rh, rope_len_sq, step_w = _derive_consts(cfg)
    relu = lambda x: jnp.maximum(x, 0.0)

    action_norm = jnp.asarray(cfg["action_norm"], jnp.float32)
    act = jnp.asarray(act_seq, jnp.float32).reshape(-1, horizon, 3) * action_norm
    B = act.shape[0]

    curr_state = jnp.broadcast_to(params["curr_state"], (B, K, 3))
    pusher = jnp.broadcast_to(params["refer_pos"], (B, 1, 3))
    target = params["target_state"]
    W1, b1, W2, b2 = params["W1"], params["b1"], params["W2"], params["b2"]
    fe = jnp.asarray(cfg["rope_fixed_end"], jnp.float32)

    cost = jnp.zeros((B, 1), jnp.float32)
    fpen = jnp.zeros((B, 1), jnp.float32)
    fbpen = jnp.zeros((B, 1), jnp.float32)
    ppen = jnp.zeros((B, 1), jnp.float32)
    diff = None
    for j in range(horizon):
        a = act[:, j:j + 1, :]
        attr = jnp.concatenate([curr_state, curr_state - a], axis=-1).reshape(B, -1)
        h = relu(jnp.dot(attr, W1, precision=HIGH) + b1)
        out = (jnp.dot(h, W2, precision=HIGH) + b2).reshape(B, K, 3)
        curr_state = curr_state + out
        abs_state = curr_state + pusher
        diff = target - abs_state
        diff = diff + diff[:, :, 0:1] * 0.3
        step_cost = jnp.abs(diff).sum(-1).sum(-1, keepdims=True) * step_w[j]
        red = abs_state - fe
        rdis = (red * red).sum(-1)
        fpen = fpen + relu(rdis - rope_len_sq).sum(-1, keepdims=True)
        ld = jnp.abs(abs_state - jnp.asarray(lc))
        lp = relu(jnp.asarray(lh) - ld).min(-1)
        rd = jnp.abs(abs_state - jnp.asarray(rc))
        rpm = relu(jnp.asarray(rh) - rd).min(-1)
        dpn = relu(0.5 - abs_state[:, :, 2])
        fbpen = fbpen + (lp + rpm + dpn).sum(-1, keepdims=True)
        cost = cost + step_cost
        pusher = pusher + a
        ppen = ppen + relu(1.1 - pusher[:, :, 2]) + relu(-2.45 - pusher[:, :, 1])
        curr_state = curr_state - a
    penalty = (fbpen + fpen + ppen) * PENALTY_FACTOR
    if cfg["only_final_cost"]:
        cost = (diff * diff).sum(1).sum(-1, keepdims=True)
    return cost + penalty


# ----------------------------------------------------------------------------
if __name__ == "__main__":
    B, K, Hh, horizon = 16, 10, 64, 8
    state_dim, action_dim = K * 3, 3

    cfg = dict(
        state_dim=state_dim, action_dim=action_dim, n_history=1, horizon=horizon,
        only_final_cost=False, num_kp=K, hidden=Hh,
        action_norm=np.array([0.05, 0.05, 0.05], np.float32),
        rope_fixed_end=np.array([0.5, 0.5, 0.5], np.float32),
        rope_length=0.8,
        forbidden_area=np.array([[-1.0, -1.0, 0.0],
                                 [-0.4, -0.4, 1.2],
                                 [0.4, -1.0, 0.0],
                                 [1.0, -0.4, 1.2]], np.float32),
    )

    # TODO(synk): load real Rope_MLP checkpoint weights instead of the synthesized ones.
    key = jax.random.PRNGKey(0)
    ks = jax.random.split(key, 8)
    params = dict(
        W1=0.08 * jax.random.normal(ks[0], (2 * state_dim, Hh), jnp.float32),
        b1=0.01 * jax.random.normal(ks[1], (Hh,), jnp.float32),
        W2=0.08 * jax.random.normal(ks[2], (Hh, state_dim), jnp.float32),
        b2=0.01 * jax.random.normal(ks[3], (state_dim,), jnp.float32),
        curr_state=jax.random.uniform(ks[4], (1, K, 3), jnp.float32),
        refer_pos=jax.random.uniform(ks[5], (1, 1, 3), jnp.float32),
        target_state=1.5 * jax.random.uniform(ks[6], (K, 3), jnp.float32),
    )
    act_seq = jax.random.normal(ks[7], (B, horizon * action_dim), jnp.float32)

    out = pallas_forward(act_seq, params, cfg)
    out = jax.block_until_ready(out)

    ref = reference_forward(act_seq, params, cfg)
    np.testing.assert_allclose(np.asarray(out), np.asarray(ref), rtol=5e-3, atol=1e-2)

    print("KERNEL_OK")
</pallas_src>

<mosaic_0001>
module attributes {stable_mosaic.version = 11 : i64} {
  func.func @kernel(%arg0: i32, %arg1: memref<8x8x3xf32, #tpu.memory_space<vmem>>, %arg2: memref<8x8x30xf32, #tpu.memory_space<vmem>>, %arg3: memref<1x30xf32, #tpu.memory_space<vmem>>, %arg4: memref<1x30xf32, #tpu.memory_space<vmem>>, %arg5: memref<3x10xf32, #tpu.memory_space<vmem>>, %arg6: memref<30x64xf32, #tpu.memory_space<vmem>>, %arg7: memref<3x64xf32, #tpu.memory_space<vmem>>, %arg8: memref<1x64xf32, #tpu.memory_space<vmem>>, %arg9: memref<64x30xf32, #tpu.memory_space<vmem>>, %arg10: memref<1x30xf32, #tpu.memory_space<vmem>>, %arg11: memref<8x1xf32, #tpu.memory_space<vmem>>) attributes {dimension_semantics = [#tpu.dimension_semantics<parallel>], iteration_bounds = array<i64: 2>, scalar_prefetch = 0 : i64, scratch_operands = 0 : i64, tpu.core_type = #tpu.core_type<tc>, window_params = [{transform_indices = @transform_0, window_bounds = array<i64: 8, 8, 3>}, {transform_indices = @transform_1, window_bounds = array<i64: 8, 8, 30>}, {pipeline_mode = #tpu.pipeline_mode<synchronous>, transform_indices = @transform_2, window_bounds = array<i64: 1, 30>}, {pipeline_mode = #tpu.pipeline_mode<synchronous>, transform_indices = @transform_3, window_bounds = array<i64: 1, 30>}, {pipeline_mode = #tpu.pipeline_mode<synchronous>, transform_indices = @transform_4, window_bounds = array<i64: 3, 10>}, {pipeline_mode = #tpu.pipeline_mode<synchronous>, transform_indices = @transform_5, window_bounds = array<i64: 30, 64>}, {pipeline_mode = #tpu.pipeline_mode<synchronous>, transform_indices = @transform_6, window_bounds = array<i64: 3, 64>}, {pipeline_mode = #tpu.pipeline_mode<synchronous>, transform_indices = @transform_7, window_bounds = array<i64: 1, 64>}, {pipeline_mode = #tpu.pipeline_mode<synchronous>, transform_indices = @transform_8, window_bounds = array<i64: 64, 30>}, {pipeline_mode = #tpu.pipeline_mode<synchronous>, transform_indices = @transform_9, window_bounds = array<i64: 1, 30>}, {transform_indices = @transform_10, window_bounds = array<i64: 8, 1>}]} {
    %c0 = arith.constant 0 : index
    %c0_0 = arith.constant 0 : index
    %0 = vector.load %arg6[%c0, %c0_0] : memref<30x64xf32, #tpu.memory_space<vmem>>, vector<30x64xf32>
    %c0_1 = arith.constant 0 : index
    %c0_2 = arith.constant 0 : index
    %1 = vector.load %arg9[%c0_1, %c0_2] : memref<64x30xf32, #tpu.memory_space<vmem>>, vector<64x30xf32>
    %c0_3 = arith.constant 0 : index
    %c0_4 = arith.constant 0 : index
    %2 = vector.load %arg8[%c0_3, %c0_4] : memref<1x64xf32, #tpu.memory_space<vmem>>, vector<1x64xf32>
    %c0_5 = arith.constant 0 : index
    %c0_6 = arith.constant 0 : index
    %3 = vector.load %arg10[%c0_5, %c0_6] : memref<1x30xf32, #tpu.memory_space<vmem>>, vector<1x30xf32>
    %c0_7 = arith.constant 0 : index
    %c0_8 = arith.constant 0 : index
    %4 = vector.load %arg7[%c0_7, %c0_8] : memref<3x64xf32, #tpu.memory_space<vmem>>, vector<1x64xf32>
    %c1 = arith.constant 1 : index
    %c0_9 = arith.constant 0 : index
    %5 = vector.load %arg7[%c1, %c0_9] : memref<3x64xf32, #tpu.memory_space<vmem>>, vector<1x64xf32>
    %c2 = arith.constant 2 : index
    %c0_10 = arith.constant 0 : index
    %6 = vector.load %arg7[%c2, %c0_10] : memref<3x64xf32, #tpu.memory_space<vmem>>, vector<1x64xf32>
    %c0_11 = arith.constant 0 : index
    %c0_12 = arith.constant 0 : index
    %7 = vector.load %arg5[%c0_11, %c0_12] : memref<3x10xf32, #tpu.memory_space<vmem>>, vector<1x10xf32>
    %c1_13 = arith.constant 1 : index
    %c0_14 = arith.constant 0 : index
    %8 = vector.load %arg5[%c1_13, %c0_14] : memref<3x10xf32, #tpu.memory_space<vmem>>, vector<1x10xf32>
    %c2_15 = arith.constant 2 : index
    %c0_16 = arith.constant 0 : index
    %9 = vector.load %arg5[%c2_15, %c0_16] : memref<3x10xf32, #tpu.memory_space<vmem>>, vector<1x10xf32>
    %c0_17 = arith.constant 0 : index
    %c0_18 = arith.constant 0 : index
    %c0_19 = arith.constant 0 : index
    %10 = vector.load %arg1[%c0_17, %c0_18, %c0_19] : memref<8x8x3xf32, #tpu.memory_space<vmem>>, vector<1x8x3xf32>
    %11 = vector.shape_cast %10 : vector<1x8x3xf32> to vector<8x3xf32>
    %12 = vector.extract_strided_slice %11 {offsets = [0, 0], sizes = [8, 1], strides = [1, 1]} : vector<8x3xf32> to vector<8x1xf32>
    %13 = vector.broadcast %12 : vector<8x1xf32> to vector<8x64xf32>
    %14 = vector.broadcast %4 : vector<1x64xf32> to vector<8x64xf32>
    %15 = arith.mulf %13, %14 : vector<8x64xf32>
    %16 = vector.extract_strided_slice %11 {offsets = [0, 1], sizes = [8, 1], strides = [1, 1]} : vector<8x3xf32> to vector<8x1xf32>
    %17 = vector.broadcast %16 : vector<8x1xf32> to vector<8x64xf32>
    %18 = vector.broadcast %5 : vector<1x64xf32> to vector<8x64xf32>
    %19 = arith.mulf %17, %18 : vector<8x64xf32>
    %20 = arith.addf %15, %19 : vector<8x64xf32>
    %21 = vector.extract_strided_slice %11 {offsets = [0, 2], sizes = [8, 1], strides = [1, 1]} : vector<8x3xf32> to vector<8x1xf32>
    %22 = vector.broadcast %21 : vector<8x1xf32> to vector<8x64xf32>
    %23 = vector.broadcast %6 : vector<1x64xf32> to vector<8x64xf32>
    %24 = arith.mulf %22, %23 : vector<8x64xf32>
    %25 = arith.addf %20, %24 : vector<8x64xf32>
    %26 = vector.broadcast %2 : vector<1x64xf32> to vector<8x64xf32>
    %27 = arith.subf %26, %25 : vector<8x64xf32>
    %c1_20 = arith.constant 1 : index
    %c0_21 = arith.constant 0 : index
    %c0_22 = arith.constant 0 : index
    %28 = vector.load %arg1[%c1_20, %c0_21, %c0_22] : memref<8x8x3xf32, #tpu.memory_space<vmem>>, vector<1x8x3xf32>
    %29 = vector.shape_cast %28 : vector<1x8x3xf32> to vector<8x3xf32>
    %30 = vector.extract_strided_slice %29 {offsets = [0, 0], sizes = [8, 1], strides = [1, 1]} : vector<8x3xf32> to vector<8x1xf32>
    %31 = vector.broadcast %30 : vector<8x1xf32> to vector<8x64xf32>
    %32 = vector.broadcast %4 : vector<1x64xf32> to vector<8x64xf32>
    %33 = arith.mulf %31, %32 : vector<8x64xf32>
    %34 = vector.extract_strided_slice %29 {offsets = [0, 1], sizes = [8, 1], strides = [1, 1]} : vector<8x3xf32> to vector<8x1xf32>
    %35 = vector.broadcast %34 : vector<8x1xf32> to vector<8x64xf32>
    %36 = vector.broadcast %5 : vector<1x64xf32> to vector<8x64xf32>
    %37 = arith.mulf %35, %36 : vector<8x64xf32>
    %38 = arith.addf %33, %37 : vector<8x64xf32>
    %39 = vector.extract_strided_slice %29 {offsets = [0, 2], sizes = [8, 1], strides = [1, 1]} : vector<8x3xf32> to vector<8x1xf32>
    %40 = vector.broadcast %39 : vector<8x1xf32> to vector<8x64xf32>
    %41 = vector.broadcast %6 : vector<1x64xf32> to vector<8x64xf32>
    %42 = arith.mulf %40, %41 : vector<8x64xf32>
    %43 = arith.addf %38, %42 : vector<8x64xf32>
    %44 = vector.broadcast %2 : vector<1x64xf32> to vector<8x64xf32>
    %45 = arith.subf %44, %43 : vector<8x64xf32>
    %c2_23 = arith.constant 2 : index
    %c0_24 = arith.constant 0 : index
    %c0_25 = arith.constant 0 : index
    %46 = vector.load %arg1[%c2_23, %c0_24, %c0_25] : memref<8x8x3xf32, #tpu.memory_space<vmem>>, vector<1x8x3xf32>
    %47 = vector.shape_cast %46 : vector<1x8x3xf32> to vector<8x3xf32>
    %48 = vector.extract_strided_slice %47 {offsets = [0, 0], sizes = [8, 1], strides = [1, 1]} : vector<8x3xf32> to vector<8x1xf32>
    %49 = vector.broadcast %48 : vector<8x1xf32> to vector<8x64xf32>
    %50 = vector.broadcast %4 : vector<1x64xf32> to vector<8x64xf32>
    %51 = arith.mulf %49, %50 : vector<8x64xf32>
    %52 = vector.extract_strided_slice %47 {offsets = [0, 1], sizes = [8, 1], strides = [1, 1]} : vector<8x3xf32> to vector<8x1xf32>
    %53 = vector.broadcast %52 : vector<8x1xf32> to vector<8x64xf32>
    %54 = vector.broadcast %5 : vector<1x64xf32> to vector<8x64xf32>
    %55 = arith.mulf %53, %54 : vector<8x64xf32>
    %56 = arith.addf %51, %55 : vector<8x64xf32>
    %57 = vector.extract_strided_slice %47 {offsets = [0, 2], sizes = [8, 1], strides = [1, 1]} : vector<8x3xf32> to vector<8x1xf32>
    %58 = vector.broadcast %57 : vector<8x1xf32> to vector<8x64xf32>
    %59 = vector.broadcast %6 : vector<1x64xf32> to vector<8x64xf32>
    %60 = arith.mulf %58, %59 : vector<8x64xf32>
    %61 = arith.addf %56, %60 : vector<8x64xf32>
    %62 = vector.broadcast %2 : vector<1x64xf32> to vector<8x64xf32>
    %63 = arith.subf %62, %61 : vector<8x64xf32>
    %c3 = arith.constant 3 : index
    %c0_26 = arith.constant 0 : index
    %c0_27 = arith.constant 0 : index
    %64 = vector.load %arg1[%c3, %c0_26, %c0_27] : memref<8x8x3xf32, #tpu.memory_space<vmem>>, vector<1x8x3xf32>
    %65 = vector.shape_cast %64 : vector<1x8x3xf32> to vector<8x3xf32>
    %66 = vector.extract_strided_slice %65 {offsets = [0, 0], sizes = [8, 1], strides = [1, 1]} : vector<8x3xf32> to vector<8x1xf32>
    %67 = vector.broadcast %66 : vector<8x1xf32> to vector<8x64xf32>
    %68 = vector.broadcast %4 : vector<1x64xf32> to vector<8x64xf32>
    %69 = arith.mulf %67, %68 : vector<8x64xf32>
    %70 = vector.extract_strided_slice %65 {offsets = [0, 1], sizes = [8, 1], strides = [1, 1]} : vector<8x3xf32> to vector<8x1xf32>
    %71 = vector.broadcast %70 : vector<8x1xf32> to vector<8x64xf32>
    %72 = vector.broadcast %5 : vector<1x64xf32> to vector<8x64xf32>
    %73 = arith.mulf %71, %72 : vector<8x64xf32>
    %74 = arith.addf %69, %73 : vector<8x64xf32>
    %75 = vector.extract_strided_slice %65 {offsets = [0, 2], sizes = [8, 1], strides = [1, 1]} : vector<8x3xf32> to vector<8x1xf32>
    %76 = vector.broadcast %75 : vector<8x1xf32> to vector<8x64xf32>
    %77 = vector.broadcast %6 : vector<1x64xf32> to vector<8x64xf32>
    %78 = arith.mulf %76, %77 : vector<8x64xf32>
    %79 = arith.addf %74, %78 : vector<8x64xf32>
    %80 = vector.broadcast %2 : vector<1x64xf32> to vector<8x64xf32>
    %81 = arith.subf %80, %79 : vector<8x64xf32>
    %c4 = arith.constant 4 : index
    %c0_28 = arith.constant 0 : index
    %c0_29 = arith.constant 0 : index
    %82 = vector.load %arg1[%c4, %c0_28, %c0_29] : memref<8x8x3xf32, #tpu.memory_space<vmem>>, vector<1x8x3xf32>
    %83 = vector.shape_cast %82 : vector<1x8x3xf32> to vector<8x3xf32>
    %84 = vector.extract_strided_slice %83 {offsets = [0, 0], sizes = [8, 1], strides = [1, 1]} : vector<8x3xf32> to vector<8x1xf32>
    %85 = vector.broadcast %84 : vector<8x1xf32> to vector<8x64xf32>
    %86 = vector.broadcast %4 : vector<1x64xf32> to vector<8x64xf32>
    %87 = arith.mulf %85, %86 : vector<8x64xf32>
    %88 = vector.extract_strided_slice %83 {offsets = [0, 1], sizes = [8, 1], strides = [1, 1]} : vector<8x3xf32> to vector<8x1xf32>
    %89 = vector.broadcast %88 : vector<8x1xf32> to vector<8x64xf32>
    %90 = vector.broadcast %5 : vector<1x64xf32> to vector<8x64xf32>
    %91 = arith.mulf %89, %90 : vector<8x64xf32>
    %92 = arith.addf %87, %91 : vector<8x64xf32>
    %93 = vector.extract_strided_slice %83 {offsets = [0, 2], sizes = [8, 1], strides = [1, 1]} : vector<8x3xf32> to vector<8x1xf32>
    %94 = vector.broadcast %93 : vector<8x1xf32> to vector<8x64xf32>
    %95 = vector.broadcast %6 : vector<1x64xf32> to vector<8x64xf32>
    %96 = arith.mulf %94, %95 : vector<8x64xf32>
    %97 = arith.addf %92, %96 : vector<8x64xf32>
    %98 = vector.broadcast %2 : vector<1x64xf32> to vector<8x64xf32>
    %99 = arith.subf %98, %97 : vector<8x64xf32>
    %c5 = arith.constant 5 : index
    %c0_30 = arith.constant 0 : index
    %c0_31 = arith.constant 0 : index
    %100 = vector.load %arg1[%c5, %c0_30, %c0_31] : memref<8x8x3xf32, #tpu.memory_space<vmem>>, vector<1x8x3xf32>
    %101 = vector.shape_cast %100 : vector<1x8x3xf32> to vector<8x3xf32>
    %102 = vector.extract_strided_slice %101 {offsets = [0, 0], sizes = [8, 1], strides = [1, 1]} : vector<8x3xf32> to vector<8x1xf32>
    %103 = vector.broadcast %102 : vector<8x1xf32> to vector<8x64xf32>
    %104 = vector.broadcast %4 : vector<1x64xf32> to vector<8x64xf32>
    %105 = arith.mulf %103, %104 : vector<8x64xf32>
    %106 = vector.extract_strided_slice %101 {offsets = [0, 1], sizes = [8, 1], strides = [1, 1]} : vector<8x3xf32> to vector<8x1xf32>
    %107 = vector.broadcast %106 : vector<8x1xf32> to vector<8x64xf32>
    %108 = vector.broadcast %5 : vector<1x64xf32> to vector<8x64xf32>
    %109 = arith.mulf %107, %108 : vector<8x64xf32>
    %110 = arith.addf %105, %109 : vector<8x64xf32>
    %111 = vector.extract_strided_slice %101 {offsets = [0, 2], sizes = [8, 1], strides = [1, 1]} : vector<8x3xf32> to vector<8x1xf32>
    %112 = vector.broadcast %111 : vector<8x1xf32> to vector<8x64xf32>
    %113 = vector.broadcast %6 : vector<1x64xf32> to vector<8x64xf32>
    %114 = arith.mulf %112, %113 : vector<8x64xf32>
    %115 = arith.addf %110, %114 : vector<8x64xf32>
    %116 = vector.broadcast %2 : vector<1x64xf32> to vector<8x64xf32>
    %117 = arith.subf %116, %115 : vector<8x64xf32>
    %c6 = arith.constant 6 : index
    %c0_32 = arith.constant 0 : index
    %c0_33 = arith.constant 0 : index
    %118 = vector.load %arg1[%c6, %c0_32, %c0_33] : memref<8x8x3xf32, #tpu.memory_space<vmem>>, vector<1x8x3xf32>
    %119 = vector.shape_cast %118 : vector<1x8x3xf32> to vector<8x3xf32>
    %120 = vector.extract_strided_slice %119 {offsets = [0, 0], sizes = [8, 1], strides = [1, 1]} : vector<8x3xf32> to vector<8x1xf32>
    %121 = vector.broadcast %120 : vector<8x1xf32> to vector<8x64xf32>
    %122 = vector.broadcast %4 : vector<1x64xf32> to vector<8x64xf32>
    %123 = arith.mulf %121, %122 : vector<8x64xf32>
    %124 = vector.extract_strided_slice %119 {offsets = [0, 1], sizes = [8, 1], strides = [1, 1]} : vector<8x3xf32> to vector<8x1xf32>
    %125 = vector.broadcast %124 : vector<8x1xf32> to vector<8x64xf32>
    %126 = vector.broadcast %5 : vector<1x64xf32> to vector<8x64xf32>
    %127 = arith.mulf %125, %126 : vector<8x64xf32>
    %128 = arith.addf %123, %127 : vector<8x64xf32>
    %129 = vector.extract_strided_slice %119 {offsets = [0, 2], sizes = [8, 1], strides = [1, 1]} : vector<8x3xf32> to vector<8x1xf32>
    %130 = vector.broadcast %129 : vector<8x1xf32> to vector<8x64xf32>
    %131 = vector.broadcast %6 : vector<1x64xf32> to vector<8x64xf32>
    %132 = arith.mulf %130, %131 : vector<8x64xf32>
    %133 = arith.addf %128, %132 : vector<8x64xf32>
    %134 = vector.broadcast %2 : vector<1x64xf32> to vector<8x64xf32>
    %135 = arith.subf %134, %133 : vector<8x64xf32>
    %c7 = arith.constant 7 : index
    %c0_34 = arith.constant 0 : index
    %c0_35 = arith.constant 0 : index
    %136 = vector.load %arg1[%c7, %c0_34, %c0_35] : memref<8x8x3xf32, #tpu.memory_space<vmem>>, vector<1x8x3xf32>
    %137 = vector.shape_cast %136 : vector<1x8x3xf32> to vector<8x3xf32>
    %138 = vector.extract_strided_slice %137 {offsets = [0, 0], sizes = [8, 1], strides = [1, 1]} : vector<8x3xf32> to vector<8x1xf32>
    %139 = vector.broadcast %138 : vector<8x1xf32> to vector<8x64xf32>
    %140 = vector.broadcast %4 : vector<1x64xf32> to vector<8x64xf32>
    %141 = arith.mulf %139, %140 : vector<8x64xf32>
    %142 = vector.extract_strided_slice %137 {offsets = [0, 1], sizes = [8, 1], strides = [1, 1]} : vector<8x3xf32> to vector<8x1xf32>
    %143 = vector.broadcast %142 : vector<8x1xf32> to vector<8x64xf32>
    %144 = vector.broadcast %5 : vector<1x64xf32> to vector<8x64xf32>
    %145 = arith.mulf %143, %144 : vector<8x64xf32>
    %146 = arith.addf %141, %145 : vector<8x64xf32>
    %147 = vector.extract_strided_slice %137 {offsets = [0, 2], sizes = [8, 1], strides = [1, 1]} : vector<8x3xf32> to vector<8x1xf32>
    %148 = vector.broadcast %147 : vector<8x1xf32> to vector<8x64xf32>
    %149 = vector.broadcast %6 : vector<1x64xf32> to vector<8x64xf32>
    %150 = arith.mulf %148, %149 : vector<8x64xf32>
    %151 = arith.addf %146, %150 : vector<8x64xf32>
    %152 = vector.broadcast %2 : vector<1x64xf32> to vector<8x64xf32>
    %153 = arith.subf %152, %151 : vector<8x64xf32>
    %c0_36 = arith.constant 0 : index
    %c0_37 = arith.constant 0 : index
    %154 = vector.load %arg3[%c0_36, %c0_37] : memref<1x30xf32, #tpu.memory_space<vmem>>, vector<1x30xf32>
    %155 = vector.shape_cast %154 : vector<1x30xf32> to vector<1x30xf32>
    %156 = vector.broadcast %155 : vector<1x30xf32> to vector<8x30xf32>
    %c0_38 = arith.constant 0 : index
    %c0_39 = arith.constant 0 : index
    %157 = vector.load %arg4[%c0_38, %c0_39] : memref<1x30xf32, #tpu.memory_space<vmem>>, vector<1x30xf32>
    %158 = vector.shape_cast %157 : vector<1x30xf32> to vector<1x30xf32>
    %159 = vector.broadcast %158 : vector<1x30xf32> to vector<8x30xf32>
    %cst = arith.constant 0.000000e+00 : f32
    %160 = vector.broadcast %cst : f32 to vector<8x10xf32>
    %cst_40 = arith.constant 0.000000e+00 : f32
    %161 = vector.broadcast %cst_40 : f32 to vector<8x10xf32>
    %cst_41 = arith.constant 0.000000e+00 : f32
    %162 = vector.broadcast %cst_41 : f32 to vector<8x10xf32>
    %cst_42 = arith.constant 0.000000e+00 : f32
    %163 = vector.broadcast %cst_42 : f32 to vector<8x1xf32>
    %c0_43 = arith.constant 0 : index
    %c0_44 = arith.constant 0 : index
    %c0_45 = arith.constant 0 : index
    %164 = vector.load %arg2[%c0_43, %c0_44, %c0_45] : memref<8x8x30xf32, #tpu.memory_space<vmem>>, vector<1x8x30xf32>
    %165 = vector.shape_cast %164 : vector<1x8x30xf32> to vector<8x30xf32>
    %cst_46 = arith.constant dense<0.000000e+00> : vector<8x64xf32>
    %166 = tpu.matmul %156, %0, %cst_46 {dimension_numbers = #tpu.dot_dimension_numbers<[1], [0], [0], [1], [0, 0, 1, 1], [], []>, precision = #tpu.contract_precision<fp32>} : vector<8x30xf32>, vector<30x64xf32>, vector<8x64xf32> -> vector<8x64xf32>
    %167 = arith.addf %166, %27 : vector<8x64xf32>
    %cst_47 = arith.constant 0.000000e+00 : f32
    %168 = vector.broadcast %cst_47 : f32 to vector<8x64xf32>
    %169 = arith.maximumf %167, %168 : vector<8x64xf32>
    %cst_48 = arith.constant dense<0.000000e+00> : vector<8x30xf32>
    %170 = tpu.matmul %169, %1, %cst_48 {dimension_numbers = #tpu.dot_dimension_numbers<[1], [0], [0], [1], [0, 0, 1, 1], [], []>, precision = #tpu.contract_precision<fp32>} : vector<8x64xf32>, vector<64x30xf32>, vector<8x30xf32> -> vector<8x30xf32>
    %171 = arith.addf %156, %170 : vector<8x30xf32>
    %172 = vector.broadcast %3 : vector<1x30xf32> to vector<8x30xf32>
    %173 = arith.addf %171, %172 : vector<8x30xf32>
    %174 = arith.addf %173, %159 : vector<8x30xf32>
    %175 = arith.subf %173, %165 : vector<8x30xf32>
    %176 = arith.addf %159, %165 : vector<8x30xf32>
    %177 = vector.extract_strided_slice %174 {offsets = [0, 0], sizes = [8, 10], strides = [1, 1]} : vector<8x30xf32> to vector<8x10xf32>
    %178 = vector.extract_strided_slice %174 {offsets = [0, 10], sizes = [8, 10], strides = [1, 1]} : vector<8x30xf32> to vector<8x10xf32>
    %179 = vector.extract_strided_slice %174 {offsets = [0, 20], sizes = [8, 10], strides = [1, 1]} : vector<8x30xf32> to vector<8x10xf32>
    %180 = vector.broadcast %7 : vector<1x10xf32> to vector<8x10xf32>
    %181 = arith.subf %180, %177 : vector<8x10xf32>
    %182 = vector.broadcast %8 : vector<1x10xf32> to vector<8x10xf32>
    %183 = arith.subf %182, %178 : vector<8x10xf32>
    %184 = vector.broadcast %9 : vector<1x10xf32> to vector<8x10xf32>
    %185 = arith.subf %184, %179 : vector<8x10xf32>
    %cst_49 = arith.constant 3.000000e-01 : f32
    %186 = vector.broadcast %cst_49 : f32 to vector<8x10xf32>
    %187 = arith.mulf %181, %186 : vector<8x10xf32>
    %188 = arith.addf %181, %187 : vector<8x10xf32>
    %189 = arith.addf %183, %187 : vector<8x10xf32>
    %190 = arith.addf %185, %187 : vector<8x10xf32>
    %191 = math.absf %188 : vector<8x10xf32>
    %192 = math.absf %189 : vector<8x10xf32>
    %193 = arith.addf %191, %192 : vector<8x10xf32>
    %194 = math.absf %190 : vector<8x10xf32>
    %195 = arith.addf %193, %194 : vector<8x10xf32>
    %cst_50 = arith.constant 1.250000e-01 : f32
    %196 = vector.broadcast %cst_50 : f32 to vector<8x10xf32>
    %197 = arith.mulf %195, %196 : vector<8x10xf32>
    %198 = arith.addf %160, %197 : vector<8x10xf32>
    %cst_51 = arith.constant 5.000000e-01 : f32
    %199 = vector.broadcast %cst_51 : f32 to vector<8x10xf32>
    %200 = arith.subf %177, %199 : vector<8x10xf32>
    %cst_52 = arith.constant 5.000000e-01 : f32
    %201 = vector.broadcast %cst_52 : f32 to vector<8x10xf32>
    %202 = arith.subf %178, %201 : vector<8x10xf32>
    %cst_53 = arith.constant 5.000000e-01 : f32
    %203 = vector.broadcast %cst_53 : f32 to vector<8x10xf32>
    %204 = arith.subf %179, %203 : vector<8x10xf32>
    %205 = arith.mulf %200, %200 : vector<8x10xf32>
    %206 = arith.mulf %202, %202 : vector<8x10xf32>
    %207 = arith.addf %205, %206 : vector<8x10xf32>
    %208 = arith.mulf %204, %204 : vector<8x10xf32>
    %209 = arith.addf %207, %208 : vector<8x10xf32>
    %cst_54 = arith.constant 6.400000e-01 : f32
    %210 = vector.broadcast %cst_54 : f32 to vector<8x10xf32>
    %211 = arith.subf %209, %210 : vector<8x10xf32>
    %cst_55 = arith.constant 0.000000e+00 : f32
    %212 = vector.broadcast %cst_55 : f32 to vector<8x10xf32>
    %213 = arith.maximumf %211, %212 : vector<8x10xf32>
    %214 = arith.addf %161, %213 : vector<8x10xf32>
    %cst_56 = arith.constant -0.699999988 : f32
    %215 = vector.broadcast %cst_56 : f32 to vector<8x10xf32>
    %216 = arith.subf %177, %215 : vector<8x10xf32>
    %217 = math.absf %216 : vector<8x10xf32>
    %cst_57 = arith.constant 3.000000e-01 : f32
    %218 = vector.broadcast %cst_57 : f32 to vector<8x10xf32>
    %219 = arith.subf %218, %217 : vector<8x10xf32>
    %cst_58 = arith.constant 0.000000e+00 : f32
    %220 = vector.broadcast %cst_58 : f32 to vector<8x10xf32>
    %221 = arith.maximumf %219, %220 : vector<8x10xf32>
    %cst_59 = arith.constant -0.699999988 : f32
    %222 = vector.broadcast %cst_59 : f32 to vector<8x10xf32>
    %223 = arith.subf %178, %222 : vector<8x10xf32>
    %224 = math.absf %223 : vector<8x10xf32>
    %cst_60 = arith.constant 3.000000e-01 : f32
    %225 = vector.broadcast %cst_60 : f32 to vector<8x10xf32>
    %226 = arith.subf %225, %224 : vector<8x10xf32>
    %cst_61 = arith.constant 0.000000e+00 : f32
    %227 = vector.broadcast %cst_61 : f32 to vector<8x10xf32>
    %228 = arith.maximumf %226, %227 : vector<8x10xf32>
    %cst_62 = arith.constant 6.000000e-01 : f32
    %229 = vector.broadcast %cst_62 : f32 to vector<8x10xf32>
    %230 = arith.subf %179, %229 : vector<8x10xf32>
    %231 = math.absf %230 : vector<8x10xf32>
    %cst_63 = arith.constant 6.000000e-01 : f32
    %232 = vector.broadcast %cst_63 : f32 to vector<8x10xf32>
    %233 = arith.subf %232, %231 : vector<8x10xf32>
    %cst_64 = arith.constant 0.000000e+00 : f32
    %234 = vector.broadcast %cst_64 : f32 to vector<8x10xf32>
    %235 = arith.maximumf %233, %234 : vector<8x10xf32>
    %236 = arith.minimumf %221, %228 : vector<8x10xf32>
    %237 = arith.minimumf %236, %235 : vector<8x10xf32>
    %cst_65 = arith.constant 0.699999988 : f32
    %238 = vector.broadcast %cst_65 : f32 to vector<8x10xf32>
    %239 = arith.subf %177, %238 : vector<8x10xf32>
    %240 = math.absf %239 : vector<8x10xf32>
    %cst_66 = arith.constant 3.000000e-01 : f32
    %241 = vector.broadcast %cst_66 : f32 to vector<8x10xf32>
    %242 = arith.subf %241, %240 : vector<8x10xf32>
    %cst_67 = arith.constant 0.000000e+00 : f32
    %243 = vector.broadcast %cst_67 : f32 to vector<8x10xf32>
    %244 = arith.maximumf %242, %243 : vector<8x10xf32>
    %cst_68 = arith.constant -0.699999988 : f32
    %245 = vector.broadcast %cst_68 : f32 to vector<8x10xf32>
    %246 = arith.subf %178, %245 : vector<8x10xf32>
    %247 = math.absf %246 : vector<8x10xf32>
    %cst_69 = arith.constant 3.000000e-01 : f32
    %248 = vector.broadcast %cst_69 : f32 to vector<8x10xf32>
    %249 = arith.subf %248, %247 : vector<8x10xf32>
    %cst_70 = arith.constant 0.000000e+00 : f32
    %250 = vector.broadcast %cst_70 : f32 to vector<8x10xf32>
    %251 = arith.maximumf %249, %250 : vector<8x10xf32>
    %cst_71 = arith.constant 6.000000e-01 : f32
    %252 = vector.broadcast %cst_71 : f32 to vector<8x10xf32>
    %253 = arith.subf %179, %252 : vector<8x10xf32>
    %254 = math.absf %253 : vector<8x10xf32>
    %cst_72 = arith.constant 6.000000e-01 : f32
    %255 = vector.broadcast %cst_72 : f32 to vector<8x10xf32>
    %256 = arith.subf %255, %254 : vector<8x10xf32>
    %cst_73 = arith.constant 0.000000e+00 : f32
    %257 = vector.broadcast %cst_73 : f32 to vector<8x10xf32>
    %258 = arith.maximumf %256, %257 : vector<8x10xf32>
    %259 = arith.minimumf %244, %251 : vector<8x10xf32>
    %260 = arith.minimumf %259, %258 : vector<8x10xf32>
    %cst_74 = arith.constant 5.000000e-01 : f32
    %261 = vector.broadcast %cst_74 : f32 to vector<8x10xf32>
    %262 = arith.subf %261, %179 : vector<8x10xf32>
    %cst_75 = arith.constant 0.000000e+00 : f32
    %263 = vector.broadcast %cst_75 : f32 to vector<8x10xf32>
    %264 = arith.maximumf %262, %263 : vector<8x10xf32>
    %265 = arith.addf %162, %237 : vector<8x10xf32>
    %266 = arith.addf %265, %260 : vector<8x10xf32>
    %267 = arith.addf %266, %264 : vector<8x10xf32>
    %268 = vector.extract_strided_slice %176 {offsets = [0, 10], sizes = [8, 1], strides = [1, 1]} : vector<8x30xf32> to vector<8x1xf32>
    %269 = vector.extract_strided_slice %176 {offsets = [0, 20], sizes = [8, 1], strides = [1, 1]} : vector<8x30xf32> to vector<8x1xf32>
    %cst_76 = arith.constant 1.100000e+00 : f32
    %270 = vector.broadcast %cst_76 : f32 to vector<8x1xf32>
    %271 = arith.subf %270, %269 : vector<8x1xf32>
    %cst_77 = arith.constant 0.000000e+00 : f32
    %272 = vector.broadcast %cst_77 : f32 to vector<8x1xf32>
    %273 = arith.maximumf %271, %272 : vector<8x1xf32>
    %274 = arith.addf %163, %273 : vector<8x1xf32>
    %cst_78 = arith.constant -2.450000e+00 : f32
    %275 = vector.broadcast %cst_78 : f32 to vector<8x1xf32>
    %276 = arith.subf %275, %268 : vector<8x1xf32>
    %cst_79 = arith.constant 0.000000e+00 : f32
    %277 = vector.broadcast %cst_79 : f32 to vector<8x1xf32>
    %278 = arith.maximumf %276, %277 : vector<8x1xf32>
    %279 = arith.addf %274, %278 : vector<8x1xf32>
    %c1_80 = arith.constant 1 : index
    %c0_81 = arith.constant 0 : index
    %c0_82 = arith.constant 0 : index
    %280 = vector.load %arg2[%c1_80, %c0_81, %c0_82] : memref<8x8x30xf32, #tpu.memory_space<vmem>>, vector<1x8x30xf32>
    %281 = vector.shape_cast %280 : vector<1x8x30xf32> to vector<8x30xf32>
    %cst_83 = arith.constant dense<0.000000e+00> : vector<8x64xf32>
    %282 = tpu.matmul %175, %0, %cst_83 {dimension_numbers = #tpu.dot_dimension_numbers<[1], [0], [0], [1], [0, 0, 1, 1], [], []>, precision = #tpu.contract_precision<fp32>} : vector<8x30xf32>, vector<30x64xf32>, vector<8x64xf32> -> vector<8x64xf32>
    %283 = arith.addf %282, %45 : vector<8x64xf32>
    %cst_84 = arith.constant 0.000000e+00 : f32
    %284 = vector.broadcast %cst_84 : f32 to vector<8x64xf32>
    %285 = arith.maximumf %283, %284 : vector<8x64xf32>
    %cst_85 = arith.constant dense<0.000000e+00> : vector<8x30xf32>
    %286 = tpu.matmul %285, %1, %cst_85 {dimension_numbers = #tpu.dot_dimension_numbers<[1], [0], [0], [1], [0, 0, 1, 1], [], []>, precision = #tpu.contract_precision<fp32>} : vector<8x64xf32>, vector<64x30xf32>, vector<8x30xf32> -> vector<8x30xf32>
    %287 = arith.addf %175, %286 : vector<8x30xf32>
    %288 = vector.broadcast %3 : vector<1x30xf32> to vector<8x30xf32>
    %289 = arith.addf %287, %288 : vector<8x30xf32>
    %290 = arith.addf %289, %176 : vector<8x30xf32>
    %291 = arith.subf %289, %281 : vector<8x30xf32>
    %292 = arith.addf %176, %281 : vector<8x30xf32>
    %293 = vector.extract_strided_slice %290 {offsets = [0, 0], sizes = [8, 10], strides = [1, 1]} : vector<8x30xf32> to vector<8x10xf32>
    %294 = vector.extract_strided_slice %290 {offsets = [0, 10], sizes = [8, 10], strides = [1, 1]} : vector<8x30xf32> to vector<8x10xf32>
    %295 = vector.extract_strided_slice %290 {offsets = [0, 20], sizes = [8, 10], strides = [1, 1]} : vector<8x30xf32> to vector<8x10xf32>
    %296 = vector.broadcast %7 : vector<1x10xf32> to vector<8x10xf32>
    %297 = arith.subf %296, %293 : vector<8x10xf32>
    %298 = vector.broadcast %8 : vector<1x10xf32> to vector<8x10xf32>
    %299 = arith.subf %298, %294 : vector<8x10xf32>
    %300 = vector.broadcast %9 : vector<1x10xf32> to vector<8x10xf32>
    %301 = arith.subf %300, %295 : vector<8x10xf32>
    %cst_86 = arith.constant 3.000000e-01 : f32
    %302 = vector.broadcast %cst_86 : f32 to vector<8x10xf32>
    %303 = arith.mulf %297, %302 : vector<8x10xf32>
    %304 = arith.addf %297, %303 : vector<8x10xf32>
    %305 = arith.addf %299, %303 : vector<8x10xf32>
    %306 = arith.addf %301, %303 : vector<8x10xf32>
    %307 = math.absf %304 : vector<8x10xf32>
    %308 = math.absf %305 : vector<8x10xf32>
    %309 = arith.addf %307, %308 : vector<8x10xf32>
    %310 = math.absf %306 : vector<8x10xf32>
    %311 = arith.addf %309, %310 : vector<8x10xf32>
    %cst_87 = arith.constant 2.500000e-01 : f32
    %312 = vector.broadcast %cst_87 : f32 to vector<8x10xf32>
    %313 = arith.mulf %311, %312 : vector<8x10xf32>
    %314 = arith.addf %198, %313 : vector<8x10xf32>
    %cst_88 = arith.constant 5.000000e-01 : f32
    %315 = vector.broadcast %cst_88 : f32 to vector<8x10xf32>
    %316 = arith.subf %293, %315 : vector<8x10xf32>
    %cst_89 = arith.constant 5.000000e-01 : f32
    %317 = vector.broadcast %cst_89 : f32 to vector<8x10xf32>
    %318 = arith.subf %294, %317 : vector<8x10xf32>
    %cst_90 = arith.constant 5.000000e-01 : f32
    %319 = vector.broadcast %cst_90 : f32 to vector<8x10xf32>
    %320 = arith.subf %295, %319 : vector<8x10xf32>
    %321 = arith.mulf %316, %316 : vector<8x10xf32>
    %322 = arith.mulf %318, %318 : vector<8x10xf32>
    %323 = arith.addf %321, %322 : vector<8x10xf32>
    %324 = arith.mulf %320, %320 : vector<8x10xf32>
    %325 = arith.addf %323, %324 : vector<8x10xf32>
    %cst_91 = arith.constant 6.400000e-01 : f32
    %326 = vector.broadcast %cst_91 : f32 to vector<8x10xf32>
    %327 = arith.subf %325, %326 : vector<8x10xf32>
    %cst_92 = arith.constant 0.000000e+00 : f32
    %328 = vector.broadcast %cst_92 : f32 to vector<8x10xf32>
    %329 = arith.maximumf %327, %328 : vector<8x10xf32>
    %330 = arith.addf %214, %329 : vector<8x10xf32>
    %cst_93 = arith.constant -0.699999988 : f32
    %331 = vector.broadcast %cst_93 : f32 to vector<8x10xf32>
    %332 = arith.subf %293, %331 : vector<8x10xf32>
    %333 = math.absf %332 : vector<8x10xf32>
    %cst_94 = arith.constant 3.000000e-01 : f32
    %334 = vector.broadcast %cst_94 : f32 to vector<8x10xf32>
    %335 = arith.subf %334, %333 : vector<8x10xf32>
    %cst_95 = arith.constant 0.000000e+00 : f32
    %336 = vector.broadcast %cst_95 : f32 to vector<8x10xf32>
    %337 = arith.maximumf %335, %336 : vector<8x10xf32>
    %cst_96 = arith.constant -0.699999988 : f32
    %338 = vector.broadcast %cst_96 : f32 to vector<8x10xf32>
    %339 = arith.subf %294, %338 : vector<8x10xf32>
    %340 = math.absf %339 : vector<8x10xf32>
    %cst_97 = arith.constant 3.000000e-01 : f32
    %341 = vector.broadcast %cst_97 : f32 to vector<8x10xf32>
    %342 = arith.subf %341, %340 : vector<8x10xf32>
    %cst_98 = arith.constant 0.000000e+00 : f32
    %343 = vector.broadcast %cst_98 : f32 to vector<8x10xf32>
    %344 = arith.maximumf %342, %343 : vector<8x10xf32>
    %cst_99 = arith.constant 6.000000e-01 : f32
    %345 = vector.broadcast %cst_99 : f32 to vector<8x10xf32>
    %346 = arith.subf %295, %345 : vector<8x10xf32>
    %347 = math.absf %346 : vector<8x10xf32>
    %cst_100 = arith.constant 6.000000e-01 : f32
    %348 = vector.broadcast %cst_100 : f32 to vector<8x10xf32>
    %349 = arith.subf %348, %347 : vector<8x10xf32>
    %cst_101 = arith.constant 0.000000e+00 : f32
    %350 = vector.broadcast %cst_101 : f32 to vector<8x10xf32>
    %351 = arith.maximumf %349, %350 : vector<8x10xf32>
    %352 = arith.minimumf %337, %344 : vector<8x10xf32>
    %353 = arith.minimumf %352, %351 : vector<8x10xf32>
    %cst_102 = arith.constant 0.699999988 : f32
    %354 = vector.broadcast %cst_102 : f32 to vector<8x10xf32>
    %355 = arith.subf %293, %354 : vector<8x10xf32>
    %356 = math.absf %355 : vector<8x10xf32>
    %cst_103 = arith.constant 3.000000e-01 : f32
    %357 = vector.broadcast %cst_103 : f32 to vector<8x10xf32>
    %358 = arith.subf %357, %356 : vector<8x10xf32>
    %cst_104 = arith.constant 0.000000e+00 : f32
    %359 = vector.broadcast %cst_104 : f32 to vector<8x10xf32>
    %360 = arith.maximumf %358, %359 : vector<8x10xf32>
    %cst_105 = arith.constant -0.699999988 : f32
    %361 = vector.broadcast %cst_105 : f32 to vector<8x10xf32>
    %362 = arith.subf %294, %361 : vector<8x10xf32>
    %363 = math.absf %362 : vector<8x10xf32>
    %cst_106 = arith.constant 3.000000e-01 : f32
    %364 = vector.broadcast %cst_106 : f32 to vector<8x10xf32>
    %365 = arith.subf %364, %363 : vector<8x10xf32>
    %cst_107 = arith.constant 0.000000e+00 : f32
    %366 = vector.broadcast %cst_107 : f32 to vector<8x10xf32>
    %367 = arith.maximumf %365, %366 : vector<8x10xf32>
    %cst_108 = arith.constant 6.000000e-01 : f32
    %368 = vector.broadcast %cst_108 : f32 to vector<8x10xf32>
    %369 = arith.subf %295, %368 : vector<8x10xf32>
    %370 = math.absf %369 : vector<8x10xf32>
    %cst_109 = arith.constant 6.000000e-01 : f32
    %371 = vector.broadcast %cst_109 : f32 to vector<8x10xf32>
    %372 = arith.subf %371, %370 : vector<8x10xf32>
    %cst_110 = arith.constant 0.000000e+00 : f32
    %373 = vector.broadcast %cst_110 : f32 to vector<8x10xf32>
    %374 = arith.maximumf %372, %373 : vector<8x10xf32>
    %375 = arith.minimumf %360, %367 : vector<8x10xf32>
    %376 = arith.minimumf %375, %374 : vector<8x10xf32>
    %cst_111 = arith.constant 5.000000e-01 : f32
    %377 = vector.broadcast %cst_111 : f32 to vector<8x10xf32>
    %378 = arith.subf %377, %295 : vector<8x10xf32>
    %cst_112 = arith.constant 0.000000e+00 : f32
    %379 = vector.broadcast %cst_112 : f32 to vector<8x10xf32>
    %380 = arith.maximumf %378, %379 : vector<8x10xf32>
    %381 = arith.addf %267, %353 : vector<8x10xf32>
    %382 = arith.addf %381, %376 : vector<8x10xf32>
    %383 = arith.addf %382, %380 : vector<8x10xf32>
    %384 = vector.extract_strided_slice %292 {offsets = [0, 10], sizes = [8, 1], strides = [1, 1]} : vector<8x30xf32> to vector<8x1xf32>
    %385 = vector.extract_strided_slice %292 {offsets = [0, 20], sizes = [8, 1], strides = [1, 1]} : vector<8x30xf32> to vector<8x1xf32>
    %cst_113 = arith.constant 1.100000e+00 : f32
    %386 = vector.broadcast %cst_113 : f32 to vector<8x1xf32>
    %387 = arith.subf %386, %385 : vector<8x1xf32>
    %cst_114 = arith.constant 0.000000e+00 : f32
    %388 = vector.broadcast %cst_114 : f32 to vector<8x1xf32>
    %389 = arith.maximumf %387, %388 : vector<8x1xf32>
    %390 = arith.addf %279, %389 : vector<8x1xf32>
    %cst_115 = arith.constant -2.450000e+00 : f32
    %391 = vector.broadcast %cst_115 : f32 to vector<8x1xf32>
    %392 = arith.subf %391, %384 : vector<8x1xf32>
    %cst_116 = arith.constant 0.000000e+00 : f32
    %393 = vector.broadcast %cst_116 : f32 to vector<8x1xf32>
    %394 = arith.maximumf %392, %393 : vector<8x1xf32>
    %395 = arith.addf %390, %394 : vector<8x1xf32>
    %c2_117 = arith.constant 2 : index
    %c0_118 = arith.constant 0 : index
    %c0_119 = arith.constant 0 : index
    %396 = vector.load %arg2[%c2_117, %c0_118, %c0_119] : memref<8x8x30xf32, #tpu.memory_space<vmem>>, vector<1x8x30xf32>
    %397 = vector.shape_cast %396 : vector<1x8x30xf32> to vector<8x30xf32>
    %cst_120 = arith.constant dense<0.000000e+00> : vector<8x64xf32>
    %398 = tpu.matmul %291, %0, %cst_120 {dimension_numbers = #tpu.dot_dimension_numbers<[1], [0], [0], [1], [0, 0, 1, 1], [], []>, precision = #tpu.contract_precision<fp32>} : vector<8x30xf32>, vector<30x64xf32>, vector<8x64xf32> -> vector<8x64xf32>
    %399 = arith.addf %398, %63 : vector<8x64xf32>
    %cst_121 = arith.constant 0.000000e+00 : f32
    %400 = vector.broadcast %cst_121 : f32 to vector<8x64xf32>
    %401 = arith.maximumf %399, %400 : vector<8x64xf32>
    %cst_122 = arith.constant dense<0.000000e+00> : vector<8x30xf32>
    %402 = tpu.matmul %401, %1, %cst_122 {dimension_numbers = #tpu.dot_dimension_numbers<[1], [0], [0], [1], [0, 0, 1, 1], [], []>, precision = #tpu.contract_precision<fp32>} : vector<8x64xf32>, vector<64x30xf32>, vector<8x30xf32> -> vector<8x30xf32>
    %403 = arith.addf %291, %402 : vector<8x30xf32>
    %404 = vector.broadcast %3 : vector<1x30xf32> to vector<8x30xf32>
    %405 = arith.addf %403, %404 : vector<8x30xf32>
    %406 = arith.addf %405, %292 : vector<8x30xf32>
    %407 = arith.subf %405, %397 : vector<8x30xf32>
    %408 = arith.addf %292, %397 : vector<8x30xf32>
    %409 = vector.extract_strided_slice %406 {offsets = [0, 0], sizes = [8, 10], strides = [1, 1]} : vector<8x30xf32> to vector<8x10xf32>
    %410 = vector.extract_strided_slice %406 {offsets = [0, 10], sizes = [8, 10], strides = [1, 1]} : vector<8x30xf32> to vector<8x10xf32>
    %411 = vector.extract_strided_slice %406 {offsets = [0, 20], sizes = [8, 10], strides = [1, 1]} : vector<8x30xf32> to vector<8x10xf32>
    %412 = vector.broadcast %7 : vector<1x10xf32> to vector<8x10xf32>
    %413 = arith.subf %412, %409 : vector<8x10xf32>
    %414 = vector.broadcast %8 : vector<1x10xf32> to vector<8x10xf32>
    %415 = arith.subf %414, %410 : vector<8x10xf32>
    %416 = vector.broadcast %9 : vector<1x10xf32> to vector<8x10xf32>
    %417 = arith.subf %416, %411 : vector<8x10xf32>
    %cst_123 = arith.constant 3.000000e-01 : f32
    %418 = vector.broadcast %cst_123 : f32 to vector<8x10xf32>
    %419 = arith.mulf %413, %418 : vector<8x10xf32>
    %420 = arith.addf %413, %419 : vector<8x10xf32>
    %421 = arith.addf %415, %419 : vector<8x10xf32>
    %422 = arith.addf %417, %419 : vector<8x10xf32>
    %423 = math.absf %420 : vector<8x10xf32>
    %424 = math.absf %421 : vector<8x10xf32>
    %425 = arith.addf %423, %424 : vector<8x10xf32>
    %426 = math.absf %422 : vector<8x10xf32>
    %427 = arith.addf %425, %426 : vector<8x10xf32>
    %cst_124 = arith.constant 3.750000e-01 : f32
    %428 = vector.broadcast %cst_124 : f32 to vector<8x10xf32>
    %429 = arith.mulf %427, %428 : vector<8x10xf32>
    %430 = arith.addf %314, %429 : vector<8x10xf32>
    %cst_125 = arith.constant 5.000000e-01 : f32
    %431 = vector.broadcast %cst_125 : f32 to vector<8x10xf32>
    %432 = arith.subf %409, %431 : vector<8x10xf32>
    %cst_126 = arith.constant 5.000000e-01 : f32
    %433 = vector.broadcast %cst_126 : f32 to vector<8x10xf32>
    %434 = arith.subf %410, %433 : vector<8x10xf32>
    %cst_127 = arith.constant 5.000000e-01 : f32
    %435 = vector.broadcast %cst_127 : f32 to vector<8x10xf32>
    %436 = arith.subf %411, %435 : vector<8x10xf32>
    %437 = arith.mulf %432, %432 : vector<8x10xf32>
    %438 = arith.mulf %434, %434 : vector<8x10xf32>
    %439 = arith.addf %437, %438 : vector<8x10xf32>
    %440 = arith.mulf %436, %436 : vector<8x10xf32>
    %441 = arith.addf %439, %440 : vector<8x10xf32>
    %cst_128 = arith.constant 6.400000e-01 : f32
    %442 = vector.broadcast %cst_128 : f32 to vector<8x10xf32>
    %443 = arith.subf %441, %442 : vector<8x10xf32>
    %cst_129 = arith.constant 0.000000e+00 : f32
    %444 = vector.broadcast %cst_129 : f32 to vector<8x10xf32>
    %445 = arith.maximumf %443, %444 : vector<8x10xf32>
    %446 = arith.addf %330, %445 : vector<8x10xf32>
    %cst_130 = arith.constant -0.699999988 : f32
    %447 = vector.broadcast %cst_130 : f32 to vector<8x10xf32>
    %448 = arith.subf %409, %447 : vector<8x10xf32>
    %449 = math.absf %448 : vector<8x10xf32>
    %cst_131 = arith.constant 3.000000e-01 : f32
    %450 = vector.broadcast %cst_131 : f32 to vector<8x10xf32>
    %451 = arith.subf %450, %449 : vector<8x10xf32>
    %cst_132 = arith.constant 0.000000e+00 : f32
    %452 = vector.broadcast %cst_132 : f32 to vector<8x10xf32>
    %453 = arith.maximumf %451, %452 : vector<8x10xf32>
    %cst_133 = arith.constant -0.699999988 : f32
    %454 = vector.broadcast %cst_133 : f32 to vector<8x10xf32>
    %455 = arith.subf %410, %454 : vector<8x10xf32>
    %456 = math.absf %455 : vector<8x10xf32>
    %cst_134 = arith.constant 3.000000e-01 : f32
    %457 = vector.broadcast %cst_134 : f32 to vector<8x10xf32>
    %458 = arith.subf %457, %456 : vector<8x10xf32>
    %cst_135 = arith.constant 0.000000e+00 : f32
    %459 = vector.broadcast %cst_135 : f32 to vector<8x10xf32>
    %460 = arith.maximumf %458, %459 : vector<8x10xf32>
    %cst_136 = arith.constant 6.000000e-01 : f32
    %461 = vector.broadcast %cst_136 : f32 to vector<8x10xf32>
    %462 = arith.subf %411, %461 : vector<8x10xf32>
    %463 = math.absf %462 : vector<8x10xf32>
    %cst_137 = arith.constant 6.000000e-01 : f32
    %464 = vector.broadcast %cst_137 : f32 to vector<8x10xf32>
    %465 = arith.subf %464, %463 : vector<8x10xf32>
    %cst_138 = arith.constant 0.000000e+00 : f32
    %466 = vector.broadcast %cst_138 : f32 to vector<8x10xf32>
    %467 = arith.maximumf %465, %466 : vector<8x10xf32>
    %468 = arith.minimumf %453, %460 : vector<8x10xf32>
    %469 = arith.minimumf %468, %467 : vector<8x10xf32>
    %cst_139 = arith.constant 0.699999988 : f32
    %470 = vector.broadcast %cst_139 : f32 to vector<8x10xf32>
    %471 = arith.subf %409, %470 : vector<8x10xf32>
    %472 = math.absf %471 : vector<8x10xf32>
    %cst_140 = arith.constant 3.000000e-01 : f32
    %473 = vector.broadcast %cst_140 : f32 to vector<8x10xf32>
    %474 = arith.subf %473, %472 : vector<8x10xf32>
    %cst_141 = arith.constant 0.000000e+00 : f32
    %475 = vector.broadcast %cst_141 : f32 to vector<8x10xf32>
    %476 = arith.maximumf %474, %475 : vector<8x10xf32>
    %cst_142 = arith.constant -0.699999988 : f32
    %477 = vector.broadcast %cst_142 : f32 to vector<8x10xf32>
    %478 = arith.subf %410, %477 : vector<8x10xf32>
    %479 = math.absf %478 : vector<8x10xf32>
    %cst_143 = arith.constant 3.000000e-01 : f32
    %480 = vector.broadcast %cst_143 : f32 to vector<8x10xf32>
    %481 = arith.subf %480, %479 : vector<8x10xf32>
    %cst_144 = arith.constant 0.000000e+00 : f32
    %482 = vector.broadcast %cst_144 : f32 to vector<8x10xf32>
    %483 = arith.maximumf %481, %482 : vector<8x10xf32>
    %cst_145 = arith.constant 6.000000e-01 : f32
    %484 = vector.broadcast %cst_145 : f32 to vector<8x10xf32>
    %485 = arith.subf %411, %484 : vector<8x10xf32>
    %486 = math.absf %485 : vector<8x10xf32>
    %cst_146 = arith.constant 6.000000e-01 : f32
    %487 = vector.broadcast %cst_146 : f32 to vector<8x10xf32>
    %488 = arith.subf %487, %486 : vector<8x10xf32>
    %cst_147 = arith.constant 0.000000e+00 : f32
    %489 = vector.broadcast %cst_147 : f32 to vector<8x10xf32>
    %490 = arith.maximumf %488, %489 : vector<8x10xf32>
    %491 = arith.minimumf %476, %483 : vector<8x10xf32>
    %492 = arith.minimumf %491, %490 : vector<8x10xf32>
    %cst_148 = arith.constant 5.000000e-01 : f32
    %493 = vector.broadcast %cst_148 : f32 to vector<8x10xf32>
    %494 = arith.subf %493, %411 : vector<8x10xf32>
    %cst_149 = arith.constant 0.000000e+00 : f32
    %495 = vector.broadcast %cst_149 : f32 to vector<8x10xf32>
    %496 = arith.maximumf %494, %495 : vector<8x10xf32>
    %497 = arith.addf %383, %469 : vector<8x10xf32>
    %498 = arith.addf %497, %492 : vector<8x10xf32>
    %499 = arith.addf %498, %496 : vector<8x10xf32>
    %500 = vector.extract_strided_slice %408 {offsets = [0, 10], sizes = [8, 1], strides = [1, 1]} : vector<8x30xf32> to vector<8x1xf32>
    %501 = vector.extract_strided_slice %408 {offsets = [0, 20], sizes = [8, 1], strides = [1, 1]} : vector<8x30xf32> to vector<8x1xf32>
    %cst_150 = arith.constant 1.100000e+00 : f32
    %502 = vector.broadcast %cst_150 : f32 to vector<8x1xf32>
    %503 = arith.subf %502, %501 : vector<8x1xf32>
    %cst_151 = arith.constant 0.000000e+00 : f32
    %504 = vector.broadcast %cst_151 : f32 to vector<8x1xf32>
    %505 = arith.maximumf %503, %504 : vector<8x1xf32>
    %506 = arith.addf %395, %505 : vector<8x1xf32>
    %cst_152 = arith.constant -2.450000e+00 : f32
    %507 = vector.broadcast %cst_152 : f32 to vector<8x1xf32>
    %508 = arith.subf %507, %500 : vector<8x1xf32>
    %cst_153 = arith.constant 0.000000e+00 : f32
    %509 = vector.broadcast %cst_153 : f32 to vector<8x1xf32>
    %510 = arith.maximumf %508, %509 : vector<8x1xf32>
    %511 = arith.addf %506, %510 : vector<8x1xf32>
    %c3_154 = arith.constant 3 : index
    %c0_155 = arith.constant 0 : index
    %c0_156 = arith.constant 0 : index
    %512 = vector.load %arg2[%c3_154, %c0_155, %c0_156] : memref<8x8x30xf32, #tpu.memory_space<vmem>>, vector<1x8x30xf32>
    %513 = vector.shape_cast %512 : vector<1x8x30xf32> to vector<8x30xf32>
    %cst_157 = arith.constant dense<0.000000e+00> : vector<8x64xf32>
    %514 = tpu.matmul %407, %0, %cst_157 {dimension_numbers = #tpu.dot_dimension_numbers<[1], [0], [0], [1], [0, 0, 1, 1], [], []>, precision = #tpu.contract_precision<fp32>} : vector<8x30xf32>, vector<30x64xf32>, vector<8x64xf32> -> vector<8x64xf32>
    %515 = arith.addf %514, %81 : vector<8x64xf32>
    %cst_158 = arith.constant 0.000000e+00 : f32
    %516 = vector.broadcast %cst_158 : f32 to vector<8x64xf32>
    %517 = arith.maximumf %515, %516 : vector<8x64xf32>
    %cst_159 = arith.constant dense<0.000000e+00> : vector<8x30xf32>
    %518 = tpu.matmul %517, %1, %cst_159 {dimension_numbers = #tpu.dot_dimension_numbers<[1], [0], [0], [1], [0, 0, 1, 1], [], []>, precision = #tpu.contract_precision<fp32>} : vector<8x64xf32>, vector<64x30xf32>, vector<8x30xf32> -> vector<8x30xf32>
    %519 = arith.addf %407, %518 : vector<8x30xf32>
    %520 = vector.broadcast %3 : vector<1x30xf32> to vector<8x30xf32>
    %521 = arith.addf %519, %520 : vector<8x30xf32>
    %522 = arith.addf %521, %408 : vector<8x30xf32>
    %523 = arith.subf %521, %513 : vector<8x30xf32>
    %524 = arith.addf %408, %513 : vector<8x30xf32>
    %525 = vector.extract_strided_slice %522 {offsets = [0, 0], sizes = [8, 10], strides = [1, 1]} : vector<8x30xf32> to vector<8x10xf32>
    %526 = vector.extract_strided_slice %522 {offsets = [0, 10], sizes = [8, 10], strides = [1, 1]} : vector<8x30xf32> to vector<8x10xf32>
    %527 = vector.extract_strided_slice %522 {offsets = [0, 20], sizes = [8, 10], strides = [1, 1]} : vector<8x30xf32> to vector<8x10xf32>
    %528 = vector.broadcast %7 : vector<1x10xf32> to vector<8x10xf32>
    %529 = arith.subf %528, %525 : vector<8x10xf32>
    %530 = vector.broadcast %8 : vector<1x10xf32> to vector<8x10xf32>
    %531 = arith.subf %530, %526 : vector<8x10xf32>
    %532 = vector.broadcast %9 : vector<1x10xf32> to vector<8x10xf32>
    %533 = arith.subf %532, %527 : vector<8x10xf32>
    %cst_160 = arith.constant 3.000000e-01 : f32
    %534 = vector.broadcast %cst_160 : f32 to vector<8x10xf32>
    %535 = arith.mulf %529, %534 : vector<8x10xf32>
    %536 = arith.addf %529, %535 : vector<8x10xf32>
    %537 = arith.addf %531, %535 : vector<8x10xf32>
    %538 = arith.addf %533, %535 : vector<8x10xf32>
    %539 = math.absf %536 : vector<8x10xf32>
    %540 = math.absf %537 : vector<8x10xf32>
    %541 = arith.addf %539, %540 : vector<8x10xf32>
    %542 = math.absf %538 : vector<8x10xf32>
    %543 = arith.addf %541, %542 : vector<8x10xf32>
    %cst_161 = arith.constant 5.000000e-01 : f32
    %544 = vector.broadcast %cst_161 : f32 to vector<8x10xf32>
    %545 = arith.mulf %543, %544 : vector<8x10xf32>
    %546 = arith.addf %430, %545 : vector<8x10xf32>
    %cst_162 = arith.constant 5.000000e-01 : f32
    %547 = vector.broadcast %cst_162 : f32 to vector<8x10xf32>
    %548 = arith.subf %525, %547 : vector<8x10xf32>
    %cst_163 = arith.constant 5.000000e-01 : f32
    %549 = vector.broadcast %cst_163 : f32 to vector<8x10xf32>
    %550 = arith.subf %526, %549 : vector<8x10xf32>
    %cst_164 = arith.constant 5.000000e-01 : f32
    %551 = vector.broadcast %cst_164 : f32 to vector<8x10xf32>
    %552 = arith.subf %527, %551 : vector<8x10xf32>
    %553 = arith.mulf %548, %548 : vector<8x10xf32>
    %554 = arith.mulf %550, %550 : vector<8x10xf32>
    %555 = arith.addf %553, %554 : vector<8x10xf32>
    %556 = arith.mulf %552, %552 : vector<8x10xf32>
    %557 = arith.addf %555, %556 : vector<8x10xf32>
    %cst_165 = arith.constant 6.400000e-01 : f32
    %558 = vector.broadcast %cst_165 : f32 to vector<8x10xf32>
    %559 = arith.subf %557, %558 : vector<8x10xf32>
    %cst_166 = arith.constant 0.000000e+00 : f32
    %560 = vector.broadcast %cst_166 : f32 to vector<8x10xf32>
    %561 = arith.maximumf %559, %560 : vector<8x10xf32>
    %562 = arith.addf %446, %561 : vector<8x10xf32>
    %cst_167 = arith.constant -0.699999988 : f32
    %563 = vector.broadcast %cst_167 : f32 to vector<8x10xf32>
    %564 = arith.subf %525, %563 : vector<8x10xf32>
    %565 = math.absf %564 : vector<8x10xf32>
    %cst_168 = arith.constant 3.000000e-01 : f32
    %566 = vector.broadcast %cst_168 : f32 to vector<8x10xf32>
    %567 = arith.subf %566, %565 : vector<8x10xf32>
    %cst_169 = arith.constant 0.000000e+00 : f32
    %568 = vector.broadcast %cst_169 : f32 to vector<8x10xf32>
    %569 = arith.maximumf %567, %568 : vector<8x10xf32>
    %cst_170 = arith.constant -0.699999988 : f32
    %570 = vector.broadcast %cst_170 : f32 to vector<8x10xf32>
    %571 = arith.subf %526, %570 : vector<8x10xf32>
    %572 = math.absf %571 : vector<8x10xf32>
    %cst_171 = arith.constant 3.000000e-01 : f32
    %573 = vector.broadcast %cst_171 : f32 to vector<8x10xf32>
    %574 = arith.subf %573, %572 : vector<8x10xf32>
    %cst_172 = arith.constant 0.000000e+00 : f32
    %575 = vector.broadcast %cst_172 : f32 to vector<8x10xf32>
    %576 = arith.maximumf %574, %575 : vector<8x10xf32>
    %cst_173 = arith.constant 6.000000e-01 : f32
    %577 = vector.broadcast %cst_173 : f32 to vector<8x10xf32>
    %578 = arith.subf %527, %577 : vector<8x10xf32>
    %579 = math.absf %578 : vector<8x10xf32>
    %cst_174 = arith.constant 6.000000e-01 : f32
    %580 = vector.broadcast %cst_174 : f32 to vector<8x10xf32>
    %581 = arith.subf %580, %579 : vector<8x10xf32>
    %cst_175 = arith.constant 0.000000e+00 : f32
    %582 = vector.broadcast %cst_175 : f32 to vector<8x10xf32>
    %583 = arith.maximumf %581, %582 : vector<8x10xf32>
    %584 = arith.minimumf %569, %576 : vector<8x10xf32>
    %585 = arith.minimumf %584, %583 : vector<8x10xf32>
    %cst_176 = arith.constant 0.699999988 : f32
    %586 = vector.broadcast %cst_176 : f32 to vector<8x10xf32>
    %587 = arith.subf %525, %586 : vector<8x10xf32>
    %588 = math.absf %587 : vector<8x10xf32>
    %cst_177 = arith.constant 3.000000e-01 : f32
    %589 = vector.broadcast %cst_177 : f32 to vector<8x10xf32>
    %590 = arith.subf %589, %588 : vector<8x10xf32>
    %cst_178 = arith.constant 0.000000e+00 : f32
    %591 = vector.broadcast %cst_178 : f32 to vector<8x10xf32>
    %592 = arith.maximumf %590, %591 : vector<8x10xf32>
    %cst_179 = arith.constant -0.699999988 : f32
    %593 = vector.broadcast %cst_179 : f32 to vector<8x10xf32>
    %594 = arith.subf %526, %593 : vector<8x10xf32>
    %595 = math.absf %594 : vector<8x10xf32>
    %cst_180 = arith.constant 3.000000e-01 : f32
    %596 = vector.broadcast %cst_180 : f32 to vector<8x10xf32>
    %597 = arith.subf %596, %595 : vector<8x10xf32>
    %cst_181 = arith.constant 0.000000e+00 : f32
    %598 = vector.broadcast %cst_181 : f32 to vector<8x10xf32>
    %599 = arith.maximumf %597, %598 : vector<8x10xf32>
    %cst_182 = arith.constant 6.000000e-01 : f32
    %600 = vector.broadcast %cst_182 : f32 to vector<8x10xf32>
    %601 = arith.subf %527, %600 : vector<8x10xf32>
    %602 = math.absf %601 : vector<8x10xf32>
    %cst_183 = arith.constant 6.000000e-01 : f32
    %603 = vector.broadcast %cst_183 : f32 to vector<8x10xf32>
    %604 = arith.subf %603, %602 : vector<8x10xf32>
    %cst_184 = arith.constant 0.000000e+00 : f32
    %605 = vector.broadcast %cst_184 : f32 to vector<8x10xf32>
    %606 = arith.maximumf %604, %605 : vector<8x10xf32>
    %607 = arith.minimumf %592, %599 : vector<8x10xf32>
    %608 = arith.minimumf %607, %606 : vector<8x10xf32>
    %cst_185 = arith.constant 5.000000e-01 : f32
    %609 = vector.broadcast %cst_185 : f32 to vector<8x10xf32>
    %610 = arith.subf %609, %527 : vector<8x10xf32>
    %cst_186 = arith.constant 0.000000e+00 : f32
    %611 = vector.broadcast %cst_186 : f32 to vector<8x10xf32>
    %612 = arith.maximumf %610, %611 : vector<8x10xf32>
    %613 = arith.addf %499, %585 : vector<8x10xf32>
    %614 = arith.addf %613, %608 : vector<8x10xf32>
    %615 = arith.addf %614, %612 : vector<8x10xf32>
    %616 = vector.extract_strided_slice %524 {offsets = [0, 10], sizes = [8, 1], strides = [1, 1]} : vector<8x30xf32> to vector<8x1xf32>
    %617 = vector.extract_strided_slice %524 {offsets = [0, 20], sizes = [8, 1], strides = [1, 1]} : vector<8x30xf32> to vector<8x1xf32>
    %cst_187 = arith.constant 1.100000e+00 : f32
    %618 = vector.broadcast %cst_187 : f32 to vector<8x1xf32>
    %619 = arith.subf %618, %617 : vector<8x1xf32>
    %cst_188 = arith.constant 0.000000e+00 : f32
    %620 = vector.broadcast %cst_188 : f32 to vector<8x1xf32>
    %621 = arith.maximumf %619, %620 : vector<8x1xf32>
    %622 = arith.addf %511, %621 : vector<8x1xf32>
    %cst_189 = arith.constant -2.450000e+00 : f32
    %623 = vector.broadcast %cst_189 : f32 to vector<8x1xf32>
    %624 = arith.subf %623, %616 : vector<8x1xf32>
    %cst_190 = arith.constant 0.000000e+00 : f32
    %625 = vector.broadcast %cst_190 : f32 to vector<8x1xf32>
    %626 = arith.maximumf %624, %625 : vector<8x1xf32>
    %627 = arith.addf %622, %626 : vector<8x1xf32>
    %c4_191 = arith.constant 4 : index
    %c0_192 = arith.constant 0 : index
    %c0_193 = arith.constant 0 : index
    %628 = vector.load %arg2[%c4_191, %c0_192, %c0_193] : memref<8x8x30xf32, #tpu.memory_space<vmem>>, vector<1x8x30xf32>
    %629 = vector.shape_cast %628 : vector<1x8x30xf32> to vector<8x30xf32>
    %cst_194 = arith.constant dense<0.000000e+00> : vector<8x64xf32>
    %630 = tpu.matmul %523, %0, %cst_194 {dimension_numbers = #tpu.dot_dimension_numbers<[1], [0], [0], [1], [0, 0, 1, 1], [], []>, precision = #tpu.contract_precision<fp32>} : vector<8x30xf32>, vector<30x64xf32>, vector<8x64xf32> -> vector<8x64xf32>
    %631 = arith.addf %630, %99 : vector<8x64xf32>
    %cst_195 = arith.constant 0.000000e+00 : f32
    %632 = vector.broadcast %cst_195 : f32 to vector<8x64xf32>
    %633 = arith.maximumf %631, %632 : vector<8x64xf32>
    %cst_196 = arith.constant dense<0.000000e+00> : vector<8x30xf32>
    %634 = tpu.matmul %633, %1, %cst_196 {dimension_numbers = #tpu.dot_dimension_numbers<[1], [0], [0], [1], [0, 0, 1, 1], [], []>, precision = #tpu.contract_precision<fp32>} : vector<8x64xf32>, vector<64x30xf32>, vector<8x30xf32> -> vector<8x30xf32>
    %635 = arith.addf %523, %634 : vector<8x30xf32>
    %636 = vector.broadcast %3 : vector<1x30xf32> to vector<8x30xf32>
    %637 = arith.addf %635, %636 : vector<8x30xf32>
    %638 = arith.addf %637, %524 : vector<8x30xf32>
    %639 = arith.subf %637, %629 : vector<8x30xf32>
    %640 = arith.addf %524, %629 : vector<8x30xf32>
    %641 = vector.extract_strided_slice %638 {offsets = [0, 0], sizes = [8, 10], strides = [1, 1]} : vector<8x30xf32> to vector<8x10xf32>
    %642 = vector.extract_strided_slice %638 {offsets = [0, 10], sizes = [8, 10], strides = [1, 1]} : vector<8x30xf32> to vector<8x10xf32>
    %643 = vector.extract_strided_slice %638 {offsets = [0, 20], sizes = [8, 10], strides = [1, 1]} : vector<8x30xf32> to vector<8x10xf32>
    %644 = vector.broadcast %7 : vector<1x10xf32> to vector<8x10xf32>
    %645 = arith.subf %644, %641 : vector<8x10xf32>
    %646 = vector.broadcast %8 : vector<1x10xf32> to vector<8x10xf32>
    %647 = arith.subf %646, %642 : vector<8x10xf32>
    %648 = vector.broadcast %9 : vector<1x10xf32> to vector<8x10xf32>
    %649 = arith.subf %648, %643 : vector<8x10xf32>
    %cst_197 = arith.constant 3.000000e-01 : f32
    %650 = vector.broadcast %cst_197 : f32 to vector<8x10xf32>
    %651 = arith.mulf %645, %650 : vector<8x10xf32>
    %652 = arith.addf %645, %651 : vector<8x10xf32>
    %653 = arith.addf %647, %651 : vector<8x10xf32>
    %654 = arith.addf %649, %651 : vector<8x10xf32>
    %655 = math.absf %652 : vector<8x10xf32>
    %656 = math.absf %653 : vector<8x10xf32>
    %657 = arith.addf %655, %656 : vector<8x10xf32>
    %658 = math.absf %654 : vector<8x10xf32>
    %659 = arith.addf %657, %658 : vector<8x10xf32>
    %cst_198 = arith.constant 6.250000e-01 : f32
    %660 = vector.broadcast %cst_198 : f32 to vector<8x10xf32>
    %661 = arith.mulf %659, %660 : vector<8x10xf32>
    %662 = arith.addf %546, %661 : vector<8x10xf32>
    %cst_199 = arith.constant 5.000000e-01 : f32
    %663 = vector.broadcast %cst_199 : f32 to vector<8x10xf32>
    %664 = arith.subf %641, %663 : vector<8x10xf32>
    %cst_200 = arith.constant 5.000000e-01 : f32
    %665 = vector.broadcast %cst_200 : f32 to vector<8x10xf32>
    %666 = arith.subf %642, %665 : vector<8x10xf32>
    %cst_201 = arith.constant 5.000000e-01 : f32
    %667 = vector.broadcast %cst_201 : f32 to vector<8x10xf32>
    %668 = arith.subf %643, %667 : vector<8x10xf32>
    %669 = arith.mulf %664, %664 : vector<8x10xf32>
    %670 = arith.mulf %666, %666 : vector<8x10xf32>
    %671 = arith.addf %669, %670 : vector<8x10xf32>
    %672 = arith.mulf %668, %668 : vector<8x10xf32>
    %673 = arith.addf %671, %672 : vector<8x10xf32>
    %cst_202 = arith.constant 6.400000e-01 : f32
    %674 = vector.broadcast %cst_202 : f32 to vector<8x10xf32>
    %675 = arith.subf %673, %674 : vector<8x10xf32>
    %cst_203 = arith.constant 0.000000e+00 : f32
    %676 = vector.broadcast %cst_203 : f32 to vector<8x10xf32>
    %677 = arith.maximumf %675, %676 : vector<8x10xf32>
    %678 = arith.addf %562, %677 : vector<8x10xf32>
    %cst_204 = arith.constant -0.699999988 : f32
    %679 = vector.broadcast %cst_204 : f32 to vector<8x10xf32>
    %680 = arith.subf %641, %679 : vector<8x10xf32>
    %681 = math.absf %680 : vector<8x10xf32>
    %cst_205 = arith.constant 3.000000e-01 : f32
    %682 = vector.broadcast %cst_205 : f32 to vector<8x10xf32>
    %683 = arith.subf %682, %681 : vector<8x10xf32>
    %cst_206 = arith.constant 0.000000e+00 : f32
    %684 = vector.broadcast %cst_206 : f32 to vector<8x10xf32>
    %685 = arith.maximumf %683, %684 : vector<8x10xf32>
    %cst_207 = arith.constant -0.699999988 : f32
    %686 = vector.broadcast %cst_207 : f32 to vector<8x10xf32>
    %687 = arith.subf %642, %686 : vector<8x10xf32>
    %688 = math.absf %687 : vector<8x10xf32>
    %cst_208 = arith.constant 3.000000e-01 : f32
    %689 = vector.broadcast %cst_208 : f32 to vector<8x10xf32>
    %690 = arith.subf %689, %688 : vector<8x10xf32>
    %cst_209 = arith.constant 0.000000e+00 : f32
    %691 = vector.broadcast %cst_209 : f32 to vector<8x10xf32>
    %692 = arith.maximumf %690, %691 : vector<8x10xf32>
    %cst_210 = arith.constant 6.000000e-01 : f32
    %693 = vector.broadcast %cst_210 : f32 to vector<8x10xf32>
    %694 = arith.subf %643, %693 : vector<8x10xf32>
    %695 = math.absf %694 : vector<8x10xf32>
    %cst_211 = arith.constant 6.000000e-01 : f32
    %696 = vector.broadcast %cst_211 : f32 to vector<8x10xf32>
    %697 = arith.subf %696, %695 : vector<8x10xf32>
    %cst_212 = arith.constant 0.000000e+00 : f32
    %698 = vector.broadcast %cst_212 : f32 to vector<8x10xf32>
    %699 = arith.maximumf %697, %698 : vector<8x10xf32>
    %700 = arith.minimumf %685, %692 : vector<8x10xf32>
    %701 = arith.minimumf %700, %699 : vector<8x10xf32>
    %cst_213 = arith.constant 0.699999988 : f32
    %702 = vector.broadcast %cst_213 : f32 to vector<8x10xf32>
    %703 = arith.subf %641, %702 : vector<8x10xf32>
    %704 = math.absf %703 : vector<8x10xf32>
    %cst_214 = arith.constant 3.000000e-01 : f32
    %705 = vector.broadcast %cst_214 : f32 to vector<8x10xf32>
    %706 = arith.subf %705, %704 : vector<8x10xf32>
    %cst_215 = arith.constant 0.000000e+00 : f32
    %707 = vector.broadcast %cst_215 : f32 to vector<8x10xf32>
    %708 = arith.maximumf %706, %707 : vector<8x10xf32>
    %cst_216 = arith.constant -0.699999988 : f32
    %709 = vector.broadcast %cst_216 : f32 to vector<8x10xf32>
    %710 = arith.subf %642, %709 : vector<8x10xf32>
    %711 = math.absf %710 : vector<8x10xf32>
    %cst_217 = arith.constant 3.000000e-01 : f32
    %712 = vector.broadcast %cst_217 : f32 to vector<8x10xf32>
    %713 = arith.subf %712, %711 : vector<8x10xf32>
    %cst_218 = arith.constant 0.000000e+00 : f32
    %714 = vector.broadcast %cst_218 : f32 to vector<8x10xf32>
    %715 = arith.maximumf %713, %714 : vector<8x10xf32>
    %cst_219 = arith.constant 6.000000e-01 : f32
    %716 = vector.broadcast %cst_219 : f32 to vector<8x10xf32>
    %717 = arith.subf %643, %716 : vector<8x10xf32>
    %718 = math.absf %717 : vector<8x10xf32>
    %cst_220 = arith.constant 6.000000e-01 : f32
    %719 = vector.broadcast %cst_220 : f32 to vector<8x10xf32>
    %720 = arith.subf %719, %718 : vector<8x10xf32>
    %cst_221 = arith.constant 0.000000e+00 : f32
    %721 = vector.broadcast %cst_221 : f32 to vector<8x10xf32>
    %722 = arith.maximumf %720, %721 : vector<8x10xf32>
    %723 = arith.minimumf %708, %715 : vector<8x10xf32>
    %724 = arith.minimumf %723, %722 : vector<8x10xf32>
    %cst_222 = arith.constant 5.000000e-01 : f32
    %725 = vector.broadcast %cst_222 : f32 to vector<8x10xf32>
    %726 = arith.subf %725, %643 : vector<8x10xf32>
    %cst_223 = arith.constant 0.000000e+00 : f32
    %727 = vector.broadcast %cst_223 : f32 to vector<8x10xf32>
    %728 = arith.maximumf %726, %727 : vector<8x10xf32>
    %729 = arith.addf %615, %701 : vector<8x10xf32>
    %730 = arith.addf %729, %724 : vector<8x10xf32>
    %731 = arith.addf %730, %728 : vector<8x10xf32>
    %732 = vector.extract_strided_slice %640 {offsets = [0, 10], sizes = [8, 1], strides = [1, 1]} : vector<8x30xf32> to vector<8x1xf32>
    %733 = vector.extract_strided_slice %640 {offsets = [0, 20], sizes = [8, 1], strides = [1, 1]} : vector<8x30xf32> to vector<8x1xf32>
    %cst_224 = arith.constant 1.100000e+00 : f32
    %734 = vector.broadcast %cst_224 : f32 to vector<8x1xf32>
    %735 = arith.subf %734, %733 : vector<8x1xf32>
    %cst_225 = arith.constant 0.000000e+00 : f32
    %736 = vector.broadcast %cst_225 : f32 to vector<8x1xf32>
    %737 = arith.maximumf %735, %736 : vector<8x1xf32>
    %738 = arith.addf %627, %737 : vector<8x1xf32>
    %cst_226 = arith.constant -2.450000e+00 : f32
    %739 = vector.broadcast %cst_226 : f32 to vector<8x1xf32>
    %740 = arith.subf %739, %732 : vector<8x1xf32>
    %cst_227 = arith.constant 0.000000e+00 : f32
    %741 = vector.broadcast %cst_227 : f32 to vector<8x1xf32>
    %742 = arith.maximumf %740, %741 : vector<8x1xf32>
    %743 = arith.addf %738, %742 : vector<8x1xf32>
    %c5_228 = arith.constant 5 : index
    %c0_229 = arith.constant 0 : index
    %c0_230 = arith.constant 0 : index
    %744 = vector.load %arg2[%c5_228, %c0_229, %c0_230] : memref<8x8x30xf32, #tpu.memory_space<vmem>>, vector<1x8x30xf32>
    %745 = vector.shape_cast %744 : vector<1x8x30xf32> to vector<8x30xf32>
    %cst_231 = arith.constant dense<0.000000e+00> : vector<8x64xf32>
    %746 = tpu.matmul %639, %0, %cst_231 {dimension_numbers = #tpu.dot_dimension_numbers<[1], [0], [0], [1], [0, 0, 1, 1], [], []>, precision = #tpu.contract_precision<fp32>} : vector<8x30xf32>, vector<30x64xf32>, vector<8x64xf32> -> vector<8x64xf32>
    %747 = arith.addf %746, %117 : vector<8x64xf32>
    %cst_232 = arith.constant 0.000000e+00 : f32
    %748 = vector.broadcast %cst_232 : f32 to vector<8x64xf32>
    %749 = arith.maximumf %747, %748 : vector<8x64xf32>
    %cst_233 = arith.constant dense<0.000000e+00> : vector<8x30xf32>
    %750 = tpu.matmul %749, %1, %cst_233 {dimension_numbers = #tpu.dot_dimension_numbers<[1], [0], [0], [1], [0, 0, 1, 1], [], []>, precision = #tpu.contract_precision<fp32>} : vector<8x64xf32>, vector<64x30xf32>, vector<8x30xf32> -> vector<8x30xf32>
    %751 = arith.addf %639, %750 : vector<8x30xf32>
    %752 = vector.broadcast %3 : vector<1x30xf32> to vector<8x30xf32>
    %753 = arith.addf %751, %752 : vector<8x30xf32>
    %754 = arith.addf %753, %640 : vector<8x30xf32>
    %755 = arith.subf %753, %745 : vector<8x30xf32>
    %756 = arith.addf %640, %745 : vector<8x30xf32>
    %757 = vector.extract_strided_slice %754 {offsets = [0, 0], sizes = [8, 10], strides = [1, 1]} : vector<8x30xf32> to vector<8x10xf32>
    %758 = vector.extract_strided_slice %754 {offsets = [0, 10], sizes = [8, 10], strides = [1, 1]} : vector<8x30xf32> to vector<8x10xf32>
    %759 = vector.extract_strided_slice %754 {offsets = [0, 20], sizes = [8, 10], strides = [1, 1]} : vector<8x30xf32> to vector<8x10xf32>
    %760 = vector.broadcast %7 : vector<1x10xf32> to vector<8x10xf32>
    %761 = arith.subf %760, %757 : vector<8x10xf32>
    %762 = vector.broadcast %8 : vector<1x10xf32> to vector<8x10xf32>
    %763 = arith.subf %762, %758 : vector<8x10xf32>
    %764 = vector.broadcast %9 : vector<1x10xf32> to vector<8x10xf32>
    %765 = arith.subf %764, %759 : vector<8x10xf32>
    %cst_234 = arith.constant 3.000000e-01 : f32
    %766 = vector.broadcast %cst_234 : f32 to vector<8x10xf32>
    %767 = arith.mulf %761, %766 : vector<8x10xf32>
    %768 = arith.addf %761, %767 : vector<8x10xf32>
    %769 = arith.addf %763, %767 : vector<8x10xf32>
    %770 = arith.addf %765, %767 : vector<8x10xf32>
    %771 = math.absf %768 : vector<8x10xf32>
    %772 = math.absf %769 : vector<8x10xf32>
    %773 = arith.addf %771, %772 : vector<8x10xf32>
    %774 = math.absf %770 : vector<8x10xf32>
    %775 = arith.addf %773, %774 : vector<8x10xf32>
    %cst_235 = arith.constant 7.500000e-01 : f32
    %776 = vector.broadcast %cst_235 : f32 to vector<8x10xf32>
    %777 = arith.mulf %775, %776 : vector<8x10xf32>
    %778 = arith.addf %662, %777 : vector<8x10xf32>
    %cst_236 = arith.constant 5.000000e-01 : f32
    %779 = vector.broadcast %cst_236 : f32 to vector<8x10xf32>
    %780 = arith.subf %757, %779 : vector<8x10xf32>
    %cst_237 = arith.constant 5.000000e-01 : f32
    %781 = vector.broadcast %cst_237 : f32 to vector<8x10xf32>
    %782 = arith.subf %758, %781 : vector<8x10xf32>
    %cst_238 = arith.constant 5.000000e-01 : f32
    %783 = vector.broadcast %cst_238 : f32 to vector<8x10xf32>
    %784 = arith.subf %759, %783 : vector<8x10xf32>
    %785 = arith.mulf %780, %780 : vector<8x10xf32>
    %786 = arith.mulf %782, %782 : vector<8x10xf32>
    %787 = arith.addf %785, %786 : vector<8x10xf32>
    %788 = arith.mulf %784, %784 : vector<8x10xf32>
    %789 = arith.addf %787, %788 : vector<8x10xf32>
    %cst_239 = arith.constant 6.400000e-01 : f32
    %790 = vector.broadcast %cst_239 : f32 to vector<8x10xf32>
    %791 = arith.subf %789, %790 : vector<8x10xf32>
    %cst_240 = arith.constant 0.000000e+00 : f32
    %792 = vector.broadcast %cst_240 : f32 to vector<8x10xf32>
    %793 = arith.maximumf %791, %792 : vector<8x10xf32>
    %794 = arith.addf %678, %793 : vector<8x10xf32>
    %cst_241 = arith.constant -0.699999988 : f32
    %795 = vector.broadcast %cst_241 : f32 to vector<8x10xf32>
    %796 = arith.subf %757, %795 : vector<8x10xf32>
    %797 = math.absf %796 : vector<8x10xf32>
    %cst_242 = arith.constant 3.000000e-01 : f32
    %798 = vector.broadcast %cst_242 : f32 to vector<8x10xf32>
    %799 = arith.subf %798, %797 : vector<8x10xf32>
    %cst_243 = arith.constant 0.000000e+00 : f32
    %800 = vector.broadcast %cst_243 : f32 to vector<8x10xf32>
    %801 = arith.maximumf %799, %800 : vector<8x10xf32>
    %cst_244 = arith.constant -0.699999988 : f32
    %802 = vector.broadcast %cst_244 : f32 to vector<8x10xf32>
    %803 = arith.subf %758, %802 : vector<8x10xf32>
    %804 = math.absf %803 : vector<8x10xf32>
    %cst_245 = arith.constant 3.000000e-01 : f32
    %805 = vector.broadcast %cst_245 : f32 to vector<8x10xf32>
    %806 = arith.subf %805, %804 : vector<8x10xf32>
    %cst_246 = arith.constant 0.000000e+00 : f32
    %807 = vector.broadcast %cst_246 : f32 to vector<8x10xf32>
    %808 = arith.maximumf %806, %807 : vector<8x10xf32>
    %cst_247 = arith.constant 6.000000e-01 : f32
    %809 = vector.broadcast %cst_247 : f32 to vector<8x10xf32>
    %810 = arith.subf %759, %809 : vector<8x10xf32>
    %811 = math.absf %810 : vector<8x10xf32>
    %cst_248 = arith.constant 6.000000e-01 : f32
    %812 = vector.broadcast %cst_248 : f32 to vector<8x10xf32>
    %813 = arith.subf %812, %811 : vector<8x10xf32>
    %cst_249 = arith.constant 0.000000e+00 : f32
    %814 = vector.broadcast %cst_249 : f32 to vector<8x10xf32>
    %815 = arith.maximumf %813, %814 : vector<8x10xf32>
    %816 = arith.minimumf %801, %808 : vector<8x10xf32>
    %817 = arith.minimumf %816, %815 : vector<8x10xf32>
    %cst_250 = arith.constant 0.699999988 : f32
    %818 = vector.broadcast %cst_250 : f32 to vector<8x10xf32>
    %819 = arith.subf %757, %818 : vector<8x10xf32>
    %820 = math.absf %819 : vector<8x10xf32>
    %cst_251 = arith.constant 3.000000e-01 : f32
    %821 = vector.broadcast %cst_251 : f32 to vector<8x10xf32>
    %822 = arith.subf %821, %820 : vector<8x10xf32>
    %cst_252 = arith.constant 0.000000e+00 : f32
    %823 = vector.broadcast %cst_252 : f32 to vector<8x10xf32>
    %824 = arith.maximumf %822, %823 : vector<8x10xf32>
    %cst_253 = arith.constant -0.699999988 : f32
    %825 = vector.broadcast %cst_253 : f32 to vector<8x10xf32>
    %826 = arith.subf %758, %825 : vector<8x10xf32>
    %827 = math.absf %826 : vector<8x10xf32>
    %cst_254 = arith.constant 3.000000e-01 : f32
    %828 = vector.broadcast %cst_254 : f32 to vector<8x10xf32>
    %829 = arith.subf %828, %827 : vector<8x10xf32>
    %cst_255 = arith.constant 0.000000e+00 : f32
    %830 = vector.broadcast %cst_255 : f32 to vector<8x10xf32>
    %831 = arith.maximumf %829, %830 : vector<8x10xf32>
    %cst_256 = arith.constant 6.000000e-01 : f32
    %832 = vector.broadcast %cst_256 : f32 to vector<8x10xf32>
    %833 = arith.subf %759, %832 : vector<8x10xf32>
    %834 = math.absf %833 : vector<8x10xf32>
    %cst_257 = arith.constant 6.000000e-01 : f32
    %835 = vector.broadcast %cst_257 : f32 to vector<8x10xf32>
    %836 = arith.subf %835, %834 : vector<8x10xf32>
    %cst_258 = arith.constant 0.000000e+00 : f32
    %837 = vector.broadcast %cst_258 : f32 to vector<8x10xf32>
    %838 = arith.maximumf %836, %837 : vector<8x10xf32>
    %839 = arith.minimumf %824, %831 : vector<8x10xf32>
    %840 = arith.minimumf %839, %838 : vector<8x10xf32>
    %cst_259 = arith.constant 5.000000e-01 : f32
    %841 = vector.broadcast %cst_259 : f32 to vector<8x10xf32>
    %842 = arith.subf %841, %759 : vector<8x10xf32>
    %cst_260 = arith.constant 0.000000e+00 : f32
    %843 = vector.broadcast %cst_260 : f32 to vector<8x10xf32>
    %844 = arith.maximumf %842, %843 : vector<8x10xf32>
    %845 = arith.addf %731, %817 : vector<8x10xf32>
    %846 = arith.addf %845, %840 : vector<8x10xf32>
    %847 = arith.addf %846, %844 : vector<8x10xf32>
    %848 = vector.extract_strided_slice %756 {offsets = [0, 10], sizes = [8, 1], strides = [1, 1]} : vector<8x30xf32> to vector<8x1xf32>
    %849 = vector.extract_strided_slice %756 {offsets = [0, 20], sizes = [8, 1], strides = [1, 1]} : vector<8x30xf32> to vector<8x1xf32>
    %cst_261 = arith.constant 1.100000e+00 : f32
    %850 = vector.broadcast %cst_261 : f32 to vector<8x1xf32>
    %851 = arith.subf %850, %849 : vector<8x1xf32>
    %cst_262 = arith.constant 0.000000e+00 : f32
    %852 = vector.broadcast %cst_262 : f32 to vector<8x1xf32>
    %853 = arith.maximumf %851, %852 : vector<8x1xf32>
    %854 = arith.addf %743, %853 : vector<8x1xf32>
    %cst_263 = arith.constant -2.450000e+00 : f32
    %855 = vector.broadcast %cst_263 : f32 to vector<8x1xf32>
    %856 = arith.subf %855, %848 : vector<8x1xf32>
    %cst_264 = arith.constant 0.000000e+00 : f32
    %857 = vector.broadcast %cst_264 : f32 to vector<8x1xf32>
    %858 = arith.maximumf %856, %857 : vector<8x1xf32>
    %859 = arith.addf %854, %858 : vector<8x1xf32>
    %c6_265 = arith.constant 6 : index
    %c0_266 = arith.constant 0 : index
    %c0_267 = arith.constant 0 : index
    %860 = vector.load %arg2[%c6_265, %c0_266, %c0_267] : memref<8x8x30xf32, #tpu.memory_space<vmem>>, vector<1x8x30xf32>
    %861 = vector.shape_cast %860 : vector<1x8x30xf32> to vector<8x30xf32>
    %cst_268 = arith.constant dense<0.000000e+00> : vector<8x64xf32>
    %862 = tpu.matmul %755, %0, %cst_268 {dimension_numbers = #tpu.dot_dimension_numbers<[1], [0], [0], [1], [0, 0, 1, 1], [], []>, precision = #tpu.contract_precision<fp32>} : vector<8x30xf32>, vector<30x64xf32>, vector<8x64xf32> -> vector<8x64xf32>
    %863 = arith.addf %862, %135 : vector<8x64xf32>
    %cst_269 = arith.constant 0.000000e+00 : f32
    %864 = vector.broadcast %cst_269 : f32 to vector<8x64xf32>
    %865 = arith.maximumf %863, %864 : vector<8x64xf32>
    %cst_270 = arith.constant dense<0.000000e+00> : vector<8x30xf32>
    %866 = tpu.matmul %865, %1, %cst_270 {dimension_numbers = #tpu.dot_dimension_numbers<[1], [0], [0], [1], [0, 0, 1, 1], [], []>, precision = #tpu.contract_precision<fp32>} : vector<8x64xf32>, vector<64x30xf32>, vector<8x30xf32> -> vector<8x30xf32>
    %867 = arith.addf %755, %866 : vector<8x30xf32>
    %868 = vector.broadcast %3 : vector<1x30xf32> to vector<8x30xf32>
    %869 = arith.addf %867, %868 : vector<8x30xf32>
    %870 = arith.addf %869, %756 : vector<8x30xf32>
    %871 = arith.subf %869, %861 : vector<8x30xf32>
    %872 = arith.addf %756, %861 : vector<8x30xf32>
    %873 = vector.extract_strided_slice %870 {offsets = [0, 0], sizes = [8, 10], strides = [1, 1]} : vector<8x30xf32> to vector<8x10xf32>
    %874 = vector.extract_strided_slice %870 {offsets = [0, 10], sizes = [8, 10], strides = [1, 1]} : vector<8x30xf32> to vector<8x10xf32>
    %875 = vector.extract_strided_slice %870 {offsets = [0, 20], sizes = [8, 10], strides = [1, 1]} : vector<8x30xf32> to vector<8x10xf32>
    %876 = vector.broadcast %7 : vector<1x10xf32> to vector<8x10xf32>
    %877 = arith.subf %876, %873 : vector<8x10xf32>
    %878 = vector.broadcast %8 : vector<1x10xf32> to vector<8x10xf32>
    %879 = arith.subf %878, %874 : vector<8x10xf32>
    %880 = vector.broadcast %9 : vector<1x10xf32> to vector<8x10xf32>
    %881 = arith.subf %880, %875 : vector<8x10xf32>
    %cst_271 = arith.constant 3.000000e-01 : f32
    %882 = vector.broadcast %cst_271 : f32 to vector<8x10xf32>
    %883 = arith.mulf %877, %882 : vector<8x10xf32>
    %884 = arith.addf %877, %883 : vector<8x10xf32>
    %885 = arith.addf %879, %883 : vector<8x10xf32>
    %886 = arith.addf %881, %883 : vector<8x10xf32>
    %887 = math.absf %884 : vector<8x10xf32>
    %888 = math.absf %885 : vector<8x10xf32>
    %889 = arith.addf %887, %888 : vector<8x10xf32>
    %890 = math.absf %886 : vector<8x10xf32>
    %891 = arith.addf %889, %890 : vector<8x10xf32>
    %cst_272 = arith.constant 8.750000e-01 : f32
    %892 = vector.broadcast %cst_272 : f32 to vector<8x10xf32>
    %893 = arith.mulf %891, %892 : vector<8x10xf32>
    %894 = arith.addf %778, %893 : vector<8x10xf32>
    %cst_273 = arith.constant 5.000000e-01 : f32
    %895 = vector.broadcast %cst_273 : f32 to vector<8x10xf32>
    %896 = arith.subf %873, %895 : vector<8x10xf32>
    %cst_274 = arith.constant 5.000000e-01 : f32
    %897 = vector.broadcast %cst_274 : f32 to vector<8x10xf32>
    %898 = arith.subf %874, %897 : vector<8x10xf32>
    %cst_275 = arith.constant 5.000000e-01 : f32
    %899 = vector.broadcast %cst_275 : f32 to vector<8x10xf32>
    %900 = arith.subf %875, %899 : vector<8x10xf32>
    %901 = arith.mulf %896, %896 : vector<8x10xf32>
    %902 = arith.mulf %898, %898 : vector<8x10xf32>
    %903 = arith.addf %901, %902 : vector<8x10xf32>
    %904 = arith.mulf %900, %900 : vector<8x10xf32>
    %905 = arith.addf %903, %904 : vector<8x10xf32>
    %cst_276 = arith.constant 6.400000e-01 : f32
    %906 = vector.broadcast %cst_276 : f32 to vector<8x10xf32>
    %907 = arith.subf %905, %906 : vector<8x10xf32>
    %cst_277 = arith.constant 0.000000e+00 : f32
    %908 = vector.broadcast %cst_277 : f32 to vector<8x10xf32>
    %909 = arith.maximumf %907, %908 : vector<8x10xf32>
    %910 = arith.addf %794, %909 : vector<8x10xf32>
    %cst_278 = arith.constant -0.699999988 : f32
    %911 = vector.broadcast %cst_278 : f32 to vector<8x10xf32>
    %912 = arith.subf %873, %911 : vector<8x10xf32>
    %913 = math.absf %912 : vector<8x10xf32>
    %cst_279 = arith.constant 3.000000e-01 : f32
    %914 = vector.broadcast %cst_279 : f32 to vector<8x10xf32>
    %915 = arith.subf %914, %913 : vector<8x10xf32>
    %cst_280 = arith.constant 0.000000e+00 : f32
    %916 = vector.broadcast %cst_280 : f32 to vector<8x10xf32>
    %917 = arith.maximumf %915, %916 : vector<8x10xf32>
    %cst_281 = arith.constant -0.699999988 : f32
    %918 = vector.broadcast %cst_281 : f32 to vector<8x10xf32>
    %919 = arith.subf %874, %918 : vector<8x10xf32>
    %920 = math.absf %919 : vector<8x10xf32>
    %cst_282 = arith.constant 3.000000e-01 : f32
    %921 = vector.broadcast %cst_282 : f32 to vector<8x10xf32>
    %922 = arith.subf %921, %920 : vector<8x10xf32>
    %cst_283 = arith.constant 0.000000e+00 : f32
    %923 = vector.broadcast %cst_283 : f32 to vector<8x10xf32>
    %924 = arith.maximumf %922, %923 : vector<8x10xf32>
    %cst_284 = arith.constant 6.000000e-01 : f32
    %925 = vector.broadcast %cst_284 : f32 to vector<8x10xf32>
    %926 = arith.subf %875, %925 : vector<8x10xf32>
    %927 = math.absf %926 : vector<8x10xf32>
    %cst_285 = arith.constant 6.000000e-01 : f32
    %928 = vector.broadcast %cst_285 : f32 to vector<8x10xf32>
    %929 = arith.subf %928, %927 : vector<8x10xf32>
    %cst_286 = arith.constant 0.000000e+00 : f32
    %930 = vector.broadcast %cst_286 : f32 to vector<8x10xf32>
    %931 = arith.maximumf %929, %930 : vector<8x10xf32>
    %932 = arith.minimumf %917, %924 : vector<8x10xf32>
    %933 = arith.minimumf %932, %931 : vector<8x10xf32>
    %cst_287 = arith.constant 0.699999988 : f32
    %934 = vector.broadcast %cst_287 : f32 to vector<8x10xf32>
    %935 = arith.subf %873, %934 : vector<8x10xf32>
    %936 = math.absf %935 : vector<8x10xf32>
    %cst_288 = arith.constant 3.000000e-01 : f32
    %937 = vector.broadcast %cst_288 : f32 to vector<8x10xf32>
    %938 = arith.subf %937, %936 : vector<8x10xf32>
    %cst_289 = arith.constant 0.000000e+00 : f32
    %939 = vector.broadcast %cst_289 : f32 to vector<8x10xf32>
    %940 = arith.maximumf %938, %939 : vector<8x10xf32>
    %cst_290 = arith.constant -0.699999988 : f32
    %941 = vector.broadcast %cst_290 : f32 to vector<8x10xf32>
    %942 = arith.subf %874, %941 : vector<8x10xf32>
    %943 = math.absf %942 : vector<8x10xf32>
    %cst_291 = arith.constant 3.000000e-01 : f32
    %944 = vector.broadcast %cst_291 : f32 to vector<8x10xf32>
    %945 = arith.subf %944, %943 : vector<8x10xf32>
    %cst_292 = arith.constant 0.000000e+00 : f32
    %946 = vector.broadcast %cst_292 : f32 to vector<8x10xf32>
    %947 = arith.maximumf %945, %946 : vector<8x10xf32>
    %cst_293 = arith.constant 6.000000e-01 : f32
    %948 = vector.broadcast %cst_293 : f32 to vector<8x10xf32>
    %949 = arith.subf %875, %948 : vector<8x10xf32>
    %950 = math.absf %949 : vector<8x10xf32>
    %cst_294 = arith.constant 6.000000e-01 : f32
    %951 = vector.broadcast %cst_294 : f32 to vector<8x10xf32>
    %952 = arith.subf %951, %950 : vector<8x10xf32>
    %cst_295 = arith.constant 0.000000e+00 : f32
    %953 = vector.broadcast %cst_295 : f32 to vector<8x10xf32>
    %954 = arith.maximumf %952, %953 : vector<8x10xf32>
    %955 = arith.minimumf %940, %947 : vector<8x10xf32>
    %956 = arith.minimumf %955, %954 : vector<8x10xf32>
    %cst_296 = arith.constant 5.000000e-01 : f32
    %957 = vector.broadcast %cst_296 : f32 to vector<8x10xf32>
    %958 = arith.subf %957, %875 : vector<8x10xf32>
    %cst_297 = arith.constant 0.000000e+00 : f32
    %959 = vector.broadcast %cst_297 : f32 to vector<8x10xf32>
    %960 = arith.maximumf %958, %959 : vector<8x10xf32>
    %961 = arith.addf %847, %933 : vector<8x10xf32>
    %962 = arith.addf %961, %956 : vector<8x10xf32>
    %963 = arith.addf %962, %960 : vector<8x10xf32>
    %964 = vector.extract_strided_slice %872 {offsets = [0, 10], sizes = [8, 1], strides = [1, 1]} : vector<8x30xf32> to vector<8x1xf32>
    %965 = vector.extract_strided_slice %872 {offsets = [0, 20], sizes = [8, 1], strides = [1, 1]} : vector<8x30xf32> to vector<8x1xf32>
    %cst_298 = arith.constant 1.100000e+00 : f32
    %966 = vector.broadcast %cst_298 : f32 to vector<8x1xf32>
    %967 = arith.subf %966, %965 : vector<8x1xf32>
    %cst_299 = arith.constant 0.000000e+00 : f32
    %968 = vector.broadcast %cst_299 : f32 to vector<8x1xf32>
    %969 = arith.maximumf %967, %968 : vector<8x1xf32>
    %970 = arith.addf %859, %969 : vector<8x1xf32>
    %cst_300 = arith.constant -2.450000e+00 : f32
    %971 = vector.broadcast %cst_300 : f32 to vector<8x1xf32>
    %972 = arith.subf %971, %964 : vector<8x1xf32>
    %cst_301 = arith.constant 0.000000e+00 : f32
    %973 = vector.broadcast %cst_301 : f32 to vector<8x1xf32>
    %974 = arith.maximumf %972, %973 : vector<8x1xf32>
    %975 = arith.addf %970, %974 : vector<8x1xf32>
    %c7_302 = arith.constant 7 : index
    %c0_303 = arith.constant 0 : index
    %c0_304 = arith.constant 0 : index
    %976 = vector.load %arg2[%c7_302, %c0_303, %c0_304] : memref<8x8x30xf32, #tpu.memory_space<vmem>>, vector<1x8x30xf32>
    %977 = vector.shape_cast %976 : vector<1x8x30xf32> to vector<8x30xf32>
    %cst_305 = arith.constant dense<0.000000e+00> : vector<8x64xf32>
    %978 = tpu.matmul %871, %0, %cst_305 {dimension_numbers = #tpu.dot_dimension_numbers<[1], [0], [0], [1], [0, 0, 1, 1], [], []>, precision = #tpu.contract_precision<fp32>} : vector<8x30xf32>, vector<30x64xf32>, vector<8x64xf32> -> vector<8x64xf32>
    %979 = arith.addf %978, %153 : vector<8x64xf32>
    %cst_306 = arith.constant 0.000000e+00 : f32
    %980 = vector.broadcast %cst_306 : f32 to vector<8x64xf32>
    %981 = arith.maximumf %979, %980 : vector<8x64xf32>
    %cst_307 = arith.constant dense<0.000000e+00> : vector<8x30xf32>
    %982 = tpu.matmul %981, %1, %cst_307 {dimension_numbers = #tpu.dot_dimension_numbers<[1], [0], [0], [1], [0, 0, 1, 1], [], []>, precision = #tpu.contract_precision<fp32>} : vector<8x64xf32>, vector<64x30xf32>, vector<8x30xf32> -> vector<8x30xf32>
    %983 = arith.addf %871, %982 : vector<8x30xf32>
    %984 = vector.broadcast %3 : vector<1x30xf32> to vector<8x30xf32>
    %985 = arith.addf %983, %984 : vector<8x30xf32>
    %986 = arith.addf %985, %872 : vector<8x30xf32>
    %987 = arith.addf %872, %977 : vector<8x30xf32>
    %988 = vector.extract_strided_slice %986 {offsets = [0, 0], sizes = [8, 10], strides = [1, 1]} : vector<8x30xf32> to vector<8x10xf32>
    %989 = vector.extract_strided_slice %986 {offsets = [0, 10], sizes = [8, 10], strides = [1, 1]} : vector<8x30xf32> to vector<8x10xf32>
    %990 = vector.extract_strided_slice %986 {offsets = [0, 20], sizes = [8, 10], strides = [1, 1]} : vector<8x30xf32> to vector<8x10xf32>
    %991 = vector.broadcast %7 : vector<1x10xf32> to vector<8x10xf32>
    %992 = arith.subf %991, %988 : vector<8x10xf32>
    %993 = vector.broadcast %8 : vector<1x10xf32> to vector<8x10xf32>
    %994 = arith.subf %993, %989 : vector<8x10xf32>
    %995 = vector.broadcast %9 : vector<1x10xf32> to vector<8x10xf32>
    %996 = arith.subf %995, %990 : vector<8x10xf32>
    %cst_308 = arith.constant 3.000000e-01 : f32
    %997 = vector.broadcast %cst_308 : f32 to vector<8x10xf32>
    %998 = arith.mulf %992, %997 : vector<8x10xf32>
    %999 = arith.addf %992, %998 : vector<8x10xf32>
    %1000 = arith.addf %994, %998 : vector<8x10xf32>
    %1001 = arith.addf %996, %998 : vector<8x10xf32>
    %1002 = math.absf %999 : vector<8x10xf32>
    %1003 = math.absf %1000 : vector<8x10xf32>
    %1004 = arith.addf %1002, %1003 : vector<8x10xf32>
    %1005 = math.absf %1001 : vector<8x10xf32>
    %1006 = arith.addf %1004, %1005 : vector<8x10xf32>
    %cst_309 = arith.constant 1.000000e+00 : f32
    %1007 = vector.broadcast %cst_309 : f32 to vector<8x10xf32>
    %1008 = arith.mulf %1006, %1007 : vector<8x10xf32>
    %1009 = arith.addf %894, %1008 : vector<8x10xf32>
    %cst_310 = arith.constant 5.000000e-01 : f32
    %1010 = vector.broadcast %cst_310 : f32 to vector<8x10xf32>
    %1011 = arith.subf %988, %1010 : vector<8x10xf32>
    %cst_311 = arith.constant 5.000000e-01 : f32
    %1012 = vector.broadcast %cst_311 : f32 to vector<8x10xf32>
    %1013 = arith.subf %989, %1012 : vector<8x10xf32>
    %cst_312 = arith.constant 5.000000e-01 : f32
    %1014 = vector.broadcast %cst_312 : f32 to vector<8x10xf32>
    %1015 = arith.subf %990, %1014 : vector<8x10xf32>
    %1016 = arith.mulf %1011, %1011 : vector<8x10xf32>
    %1017 = arith.mulf %1013, %1013 : vector<8x10xf32>
    %1018 = arith.addf %1016, %1017 : vector<8x10xf32>
    %1019 = arith.mulf %1015, %1015 : vector<8x10xf32>
    %1020 = arith.addf %1018, %1019 : vector<8x10xf32>
    %cst_313 = arith.constant 6.400000e-01 : f32
    %1021 = vector.broadcast %cst_313 : f32 to vector<8x10xf32>
    %1022 = arith.subf %1020, %1021 : vector<8x10xf32>
    %cst_314 = arith.constant 0.000000e+00 : f32
    %1023 = vector.broadcast %cst_314 : f32 to vector<8x10xf32>
    %1024 = arith.maximumf %1022, %1023 : vector<8x10xf32>
    %1025 = arith.addf %910, %1024 : vector<8x10xf32>
    %cst_315 = arith.constant -0.699999988 : f32
    %1026 = vector.broadcast %cst_315 : f32 to vector<8x10xf32>
    %1027 = arith.subf %988, %1026 : vector<8x10xf32>
    %1028 = math.absf %1027 : vector<8x10xf32>
    %cst_316 = arith.constant 3.000000e-01 : f32
    %1029 = vector.broadcast %cst_316 : f32 to vector<8x10xf32>
    %1030 = arith.subf %1029, %1028 : vector<8x10xf32>
    %cst_317 = arith.constant 0.000000e+00 : f32
    %1031 = vector.broadcast %cst_317 : f32 to vector<8x10xf32>
    %1032 = arith.maximumf %1030, %1031 : vector<8x10xf32>
    %cst_318 = arith.constant -0.699999988 : f32
    %1033 = vector.broadcast %cst_318 : f32 to vector<8x10xf32>
    %1034 = arith.subf %989, %1033 : vector<8x10xf32>
    %1035 = math.absf %1034 : vector<8x10xf32>
    %cst_319 = arith.constant 3.000000e-01 : f32
    %1036 = vector.broadcast %cst_319 : f32 to vector<8x10xf32>
    %1037 = arith.subf %1036, %1035 : vector<8x10xf32>
    %cst_320 = arith.constant 0.000000e+00 : f32
    %1038 = vector.broadcast %cst_320 : f32 to vector<8x10xf32>
    %1039 = arith.maximumf %1037, %1038 : vector<8x10xf32>
    %cst_321 = arith.constant 6.000000e-01 : f32
    %1040 = vector.broadcast %cst_321 : f32 to vector<8x10xf32>
    %1041 = arith.subf %990, %1040 : vector<8x10xf32>
    %1042 = math.absf %1041 : vector<8x10xf32>
    %cst_322 = arith.constant 6.000000e-01 : f32
    %1043 = vector.broadcast %cst_322 : f32 to vector<8x10xf32>
    %1044 = arith.subf %1043, %1042 : vector<8x10xf32>
    %cst_323 = arith.constant 0.000000e+00 : f32
    %1045 = vector.broadcast %cst_323 : f32 to vector<8x10xf32>
    %1046 = arith.maximumf %1044, %1045 : vector<8x10xf32>
    %1047 = arith.minimumf %1032, %1039 : vector<8x10xf32>
    %1048 = arith.minimumf %1047, %1046 : vector<8x10xf32>
    %cst_324 = arith.constant 0.699999988 : f32
    %1049 = vector.broadcast %cst_324 : f32 to vector<8x10xf32>
    %1050 = arith.subf %988, %1049 : vector<8x10xf32>
    %1051 = math.absf %1050 : vector<8x10xf32>
    %cst_325 = arith.constant 3.000000e-01 : f32
    %1052 = vector.broadcast %cst_325 : f32 to vector<8x10xf32>
    %1053 = arith.subf %1052, %1051 : vector<8x10xf32>
    %cst_326 = arith.constant 0.000000e+00 : f32
    %1054 = vector.broadcast %cst_326 : f32 to vector<8x10xf32>
    %1055 = arith.maximumf %1053, %1054 : vector<8x10xf32>
    %cst_327 = arith.constant -0.699999988 : f32
    %1056 = vector.broadcast %cst_327 : f32 to vector<8x10xf32>
    %1057 = arith.subf %989, %1056 : vector<8x10xf32>
    %1058 = math.absf %1057 : vector<8x10xf32>
    %cst_328 = arith.constant 3.000000e-01 : f32
    %1059 = vector.broadcast %cst_328 : f32 to vector<8x10xf32>
    %1060 = arith.subf %1059, %1058 : vector<8x10xf32>
    %cst_329 = arith.constant 0.000000e+00 : f32
    %1061 = vector.broadcast %cst_329 : f32 to vector<8x10xf32>
    %1062 = arith.maximumf %1060, %1061 : vector<8x10xf32>
    %cst_330 = arith.constant 6.000000e-01 : f32
    %1063 = vector.broadcast %cst_330 : f32 to vector<8x10xf32>
    %1064 = arith.subf %990, %1063 : vector<8x10xf32>
    %1065 = math.absf %1064 : vector<8x10xf32>
    %cst_331 = arith.constant 6.000000e-01 : f32
    %1066 = vector.broadcast %cst_331 : f32 to vector<8x10xf32>
    %1067 = arith.subf %1066, %1065 : vector<8x10xf32>
    %cst_332 = arith.constant 0.000000e+00 : f32
    %1068 = vector.broadcast %cst_332 : f32 to vector<8x10xf32>
    %1069 = arith.maximumf %1067, %1068 : vector<8x10xf32>
    %1070 = arith.minimumf %1055, %1062 : vector<8x10xf32>
    %1071 = arith.minimumf %1070, %1069 : vector<8x10xf32>
    %cst_333 = arith.constant 5.000000e-01 : f32
    %1072 = vector.broadcast %cst_333 : f32 to vector<8x10xf32>
    %1073 = arith.subf %1072, %990 : vector<8x10xf32>
    %cst_334 = arith.constant 0.000000e+00 : f32
    %1074 = vector.broadcast %cst_334 : f32 to vector<8x10xf32>
    %1075 = arith.maximumf %1073, %1074 : vector<8x10xf32>
    %1076 = arith.addf %963, %1048 : vector<8x10xf32>
    %1077 = arith.addf %1076, %1071 : vector<8x10xf32>
    %1078 = arith.addf %1077, %1075 : vector<8x10xf32>
    %1079 = vector.extract_strided_slice %987 {offsets = [0, 10], sizes = [8, 1], strides = [1, 1]} : vector<8x30xf32> to vector<8x1xf32>
    %1080 = vector.extract_strided_slice %987 {offsets = [0, 20], sizes = [8, 1], strides = [1, 1]} : vector<8x30xf32> to vector<8x1xf32>
    %cst_335 = arith.constant 1.100000e+00 : f32
    %1081 = vector.broadcast %cst_335 : f32 to vector<8x1xf32>
    %1082 = arith.subf %1081, %1080 : vector<8x1xf32>
    %cst_336 = arith.constant 0.000000e+00 : f32
    %1083 = vector.broadcast %cst_336 : f32 to vector<8x1xf32>
    %1084 = arith.maximumf %1082, %1083 : vector<8x1xf32>
    %1085 = arith.addf %975, %1084 : vector<8x1xf32>
    %cst_337 = arith.constant -2.450000e+00 : f32
    %1086 = vector.broadcast %cst_337 : f32 to vector<8x1xf32>
    %1087 = arith.subf %1086, %1079 : vector<8x1xf32>
    %cst_338 = arith.constant 0.000000e+00 : f32
    %1088 = vector.broadcast %cst_338 : f32 to vector<8x1xf32>
    %1089 = arith.maximumf %1087, %1088 : vector<8x1xf32>
    %1090 = arith.addf %1085, %1089 : vector<8x1xf32>
    %cst_339 = arith.constant dense<0.000000e+00> : vector<8xf32>
    %1091 = vector.multi_reduction <add>, %1009, %cst_339 [1] : vector<8x10xf32> to vector<8xf32>
    %1092 = vector.shape_cast %1091 : vector<8xf32> to vector<8x1xf32>
    %cst_340 = arith.constant dense<0.000000e+00> : vector<8xf32>
    %1093 = vector.multi_reduction <add>, %1078, %cst_340 [1] : vector<8x10xf32> to vector<8xf32>
    %1094 = vector.shape_cast %1093 : vector<8xf32> to vector<8x1xf32>
    %cst_341 = arith.constant dense<0.000000e+00> : vector<8xf32>
    %1095 = vector.multi_reduction <add>, %1025, %cst_341 [1] : vector<8x10xf32> to vector<8xf32>
    %1096 = vector.shape_cast %1095 : vector<8xf32> to vector<8x1xf32>
    %1097 = arith.addf %1094, %1096 : vector<8x1xf32>
    %1098 = arith.addf %1097, %1090 : vector<8x1xf32>
    %cst_342 = arith.constant 1.000000e+05 : f32
    %1099 = vector.broadcast %cst_342 : f32 to vector<8x1xf32>
    %1100 = arith.mulf %1098, %1099 : vector<8x1xf32>
    %1101 = arith.addf %1092, %1100 : vector<8x1xf32>
    %c0_343 = arith.constant 0 : index
    %c0_344 = arith.constant 0 : index
    %1102 = vector.load %arg11[%c0_343, %c0_344] : memref<8x1xf32, #tpu.memory_space<vmem>>, vector<8x1xf32>
    tpu.vector_store %arg11[%c0_343, %c0_344], %1101 {strides = array<i32>} : memref<8x1xf32, #tpu.memory_space<vmem>>, vector<8x1xf32>,
    return
  }
  func.func @transform_0(%arg0: i32) -> (i32, i32, i32) {
    %c0_i32 = arith.constant 0 : i32
    %c0_i32_0 = arith.constant 0 : i32
    %c0_i32_1 = arith.constant 0 : i32
    return %c0_i32, %arg0, %c0_i32_0 : i32, i32, i32
  }
  func.func @transform_1(%arg0: i32) -> (i32, i32, i32) {
    %c0_i32 = arith.constant 0 : i32
    %c0_i32_0 = arith.constant 0 : i32
    %c0_i32_1 = arith.constant 0 : i32
    return %c0_i32, %arg0, %c0_i32_0 : i32, i32, i32
  }
  func.func @transform_2(%arg0: i32) -> (i32, i32) {
    %c0_i32 = arith.constant 0 : i32
    %c0_i32_0 = arith.constant 0 : i32
    %c0_i32_1 = arith.constant 0 : i32
    return %c0_i32, %c0_i32_0 : i32, i32
  }
  func.func @transform_3(%arg0: i32) -> (i32, i32) {
    %c0_i32 = arith.constant 0 : i32
    %c0_i32_0 = arith.constant 0 : i32
    %c0_i32_1 = arith.constant 0 : i32
    return %c0_i32, %c0_i32_0 : i32, i32
  }
  func.func @transform_4(%arg0: i32) -> (i32, i32) {
    %c0_i32 = arith.constant 0 : i32
    %c0_i32_0 = arith.constant 0 : i32
    %c0_i32_1 = arith.constant 0 : i32
    return %c0_i32, %c0_i32_0 : i32, i32
  }
  func.func @transform_5(%arg0: i32) -> (i32, i32) {
    %c0_i32 = arith.constant 0 : i32
    %c0_i32_0 = arith.constant 0 : i32
    %c0_i32_1 = arith.constant 0 : i32
    return %c0_i32, %c0_i32_0 : i32, i32
  }
  func.func @transform_6(%arg0: i32) -> (i32, i32) {
    %c0_i32 = arith.constant 0 : i32
    %c0_i32_0 = arith.constant 0 : i32
    %c0_i32_1 = arith.constant 0 : i32
    return %c0_i32, %c0_i32_0 : i32, i32
  }
  func.func @transform_7(%arg0: i32) -> (i32, i32) {
    %c0_i32 = arith.constant 0 : i32
    %c0_i32_0 = arith.constant 0 : i32
    %c0_i32_1 = arith.constant 0 : i32
    return %c0_i32, %c0_i32_0 : i32, i32
  }
  func.func @transform_8(%arg0: i32) -> (i32, i32) {
    %c0_i32 = arith.constant 0 : i32
    %c0_i32_0 = arith.constant 0 : i32
    %c0_i32_1 = arith.constant 0 : i32
    return %c0_i32, %c0_i32_0 : i32, i32
  }
  func.func @transform_9(%arg0: i32) -> (i32, i32) {
    %c0_i32 = arith.constant 0 : i32
    %c0_i32_0 = arith.constant 0 : i32
    %c0_i32_1 = arith.constant 0 : i32
    return %c0_i32, %c0_i32_0 : i32, i32
  }
  func.func @transform_10(%arg0: i32) -> (i32, i32) {
    %c0_i32 = arith.constant 0 : i32
    %c0_i32_0 = arith.constant 0 : i32
    return %arg0, %c0_i32 : i32, i32
  }
}

</mosaic_0001>

<bundles_post_ra>
// kernel: tpu_custom_call.1
= control target key start
LH: loop header
LB: loop body
LE: loop exit
PB: predicated region body
PF: predicated region fallthrough
CT: control target
= control target key end

     0   :  { %s13049_s13 = smov 0   ;;  %s13051_s14 = smov 0   ;;  %s14735_s0 = inlined_call_operand.vmem [shape: f32[8,16,3], index: 0, kind: input, shape index: {}]   ;;  %s14736_s1 = inlined_call_operand.vmem [shape: f32[8,16,30], index: 1, kind: input, shape index: {}]   ;;  %s14737_s2 = inlined_call_operand.vmem [shape: f32[1,30], index: 2, kind: input, shape index: {}]   ;;  %s14738_s3 = inlined_call_operand.vmem [shape: f32[1,30], index: 3, kind: input, shape index: {}]   ;;  %s14739_s4 = inlined_call_operand.vmem [shape: f32[3,10], index: 4, kind: input, shape index: {}]   ;;  %s14740_s5 = inlined_call_operand.vmem [shape: f32[30,64], index: 5, kind: input, shape index: {}]   ;;  %s14741_s6 = inlined_call_operand.vmem [shape: f32[3,64], index: 6, kind: input, shape index: {}]   ;;  %s14742_s7 = inlined_call_operand.vmem [shape: f32[1,64], index: 7, kind: input, shape index: {}]   ;;  %s14743_s8 = inlined_call_operand.vmem [shape: f32[64,30], index: 8, kind: input, shape index: {}]   ;;  %s14744_s9 = inlined_call_operand.vmem [shape: f32[1,30], index: 9, kind: input, shape index: {}]   ;;  %s14745_s10 = inlined_call_operand.vmem [shape: f32[16,1], index: 10, kind: output, shape index: {}]  }
   0x1   :  { %s13053_s15 = smov 0  }
   0x2 LB: > { %s9750_s16 = sadd.s32 4294967295, %s12983_s15   ;;  %s13066_s17 = sadd.s32 1, %s12983_s15   ;;  %s12983_s15 = sphi %s13053_s15, %s14836_s15   ;;  %s12979_s14 = sphi %s13051_s14, %s14835_s14   ;;  %s12975_s13 = sphi %s13049_s13, %s14834_s13  }
   0x3   : > { %s24_s18 = ssub.s32 %s12983_s15, %s13066_s17  ;;  %s27_s19 = sadd.s32 1, %s12979_s14 }
   0x4   : > { %p25_p0 = scmp.eq.s32.totalorder %s24_s18, 0  ;;  %p34_p1 = scmp.ne.s32.totalorder %s12979_s14, %s12975_s13 }
   0x5   : > { %p35_p2 = scmp.eq.s32.totalorder %s12983_s15, 0  ;;  %p9753_p4 = scmp.ge.s32.totalorder %s12983_s15, 2 }
   0x6   : > { %s13075_s20 = scalar_select %p25_p0, %s12979_s14, %s27_s19  }
   0x7   : > { %p13077_p3 = por %p35_p2, %p34_p1  ;;  %304 = sbr.rel (%p9753_p4) target bundleno = 30 (0x1e), region = 48 }
   0xe   : > { %307 = sbr.rel (!%p13077_p3) target bundleno = 22 (0x16), region = 52  ;;  %s309_s22 = sand.u32 (%p13077_p3), 1, %s12979_s14  }
   0xf   : > { %s9755_s23 = sshll.u32 (%p13077_p3), %s12983_s15, 3  ;;  %s9754_s24 = sshll.u32 (%p13077_p3), %s309_s22, 6 }
  0x10   : > { %s313_s27 = scalar_lea.vmem (%p13077_p3), %s14735_s0, %s9755_s23  ;;  %s311_s28 = scalar_lea.vmem (%p13077_p3), [#allocation2], %s9754_s24 }
  0x11   : > { %v355_v0 = vld [vmem:[%s313_s27] sm:$0xff] (%p13077_p3)  ;;  %v357_v1 = vld [vmem:[%s313_s27 + $0x10] sm:$0xff] (%p13077_p3) }
  0x12   : > { %v359_v2 = vld [vmem:[%s313_s27 + $0x20] sm:$0xff] (%p13077_p3)  ;;  %356 = vst [vmem:[%s311_s28] sm:$0xff] (%p13077_p3), %v355_v0  ;;  %358 = vst [vmem:[%s311_s28 + $0x8] sm:$0xff] (%p13077_p3), %v357_v1  ;;  %v361_v3 = vld [vmem:[%s313_s27 + $0x30] sm:$0xff] (%p13077_p3) }
  0x13   : > { %360 = vst [vmem:[%s311_s28 + $0x10] sm:$0xff] (%p13077_p3), %v359_v2  ;;  %v363_v4 = vld [vmem:[%s313_s27 + $0x40] sm:$0xff] (%p13077_p3)  ;;  %v365_v5 = vld [vmem:[%s313_s27 + $0x50] sm:$0xff] (%p13077_p3)  ;;  %362 = vst [vmem:[%s311_s28 + $0x18] sm:$0xff] (%p13077_p3), %v361_v3 }
  0x14   : > { %364 = vst [vmem:[%s311_s28 + $0x20] sm:$0xff] (%p13077_p3), %v363_v4  ;;  %366 = vst [vmem:[%s311_s28 + $0x28] sm:$0xff] (%p13077_p3), %v365_v5  ;;  %v367_v6 = vld [vmem:[%s313_s27 + $0x60] sm:$0xff] (%p13077_p3)  ;;  %v369_v7 = vld [vmem:[%s313_s27 + $0x70] sm:$0xff] (%p13077_p3) }
  0x15   : > { %368 = vst [vmem:[%s311_s28 + $0x30] sm:$0xff] %v367_v6  ;;  %370 = vst [vmem:[%s311_s28 + $0x38] sm:$0xff] %v369_v7 }
  0x16 PF: > { %376 = sbr.rel (!%p13077_p3) target bundleno = 30 (0x1e), region = 90  ;;  %s378_s29 = sand.u32 (%p13077_p3), 1, %s12979_s14  }
  0x17   : > { %s9757_s30 = sshll.u32 (%p13077_p3), %s12983_s15, 3  ;;  %s9756_s11 = sshll.u32 (%p13077_p3), %s378_s29, 6 }
  0x18   : > { %s382_s19 = scalar_lea.vmem (%p13077_p3), %s14736_s1, %s9757_s30  ;;  %s380_s22 = scalar_lea.vmem (%p13077_p3), [#allocation3], %s9756_s11 }
  0x19   : > { %v424_v8 = vld [vmem:[%s382_s19] sm:$0xff] (%p13077_p3)  ;;  %v426_v9 = vld [vmem:[%s382_s19 + $0x10] sm:$0xff] (%p13077_p3) }
  0x1a   : > { %v428_v10 = vld [vmem:[%s382_s19 + $0x20] sm:$0xff] (%p13077_p3)  ;;  %425 = vst [vmem:[%s380_s22] sm:$0xff] (%p13077_p3), %v424_v8  ;;  %427 = vst [vmem:[%s380_s22 + $0x8] sm:$0xff] (%p13077_p3), %v426_v9  ;;  %v430_v11 = vld [vmem:[%s382_s19 + $0x30] sm:$0xff] (%p13077_p3) }
  0x1b   : > { %429 = vst [vmem:[%s380_s22 + $0x10] sm:$0xff] (%p13077_p3), %v428_v10  ;;  %v432_v12 = vld [vmem:[%s382_s19 + $0x40] sm:$0xff] (%p13077_p3)  ;;  %v434_v13 = vld [vmem:[%s382_s19 + $0x50] sm:$0xff] (%p13077_p3)  ;;  %431 = vst [vmem:[%s380_s22 + $0x18] sm:$0xff] (%p13077_p3), %v430_v11 }
  0x1c   : > { %433 = vst [vmem:[%s380_s22 + $0x20] sm:$0xff] (%p13077_p3), %v432_v12  ;;  %435 = vst [vmem:[%s380_s22 + $0x28] sm:$0xff] (%p13077_p3), %v434_v13  ;;  %v436_v14 = vld [vmem:[%s382_s19 + $0x60] sm:$0xff] (%p13077_p3)  ;;  %v438_v15 = vld [vmem:[%s382_s19 + $0x70] sm:$0xff] (%p13077_p3) }
  0x1d   : > { %437 = vst [vmem:[%s380_s22 + $0x30] sm:$0xff] %v436_v14  ;;  %439 = vst [vmem:[%s380_s22 + $0x38] sm:$0xff] %v438_v15 }
  0x1e PF: > { %p9758_p5 = scmp.ge.s32.totalorder %s12983_s15, 1  ;;  %p444_p6 = scmp.lt.s32.totalorder %s12983_s15, 3 }
  0x20   : > { %p445_p7 = pnand %p9758_p5, %p444_p6 }
  0x22   : > { %448 = sbr.rel (%p445_p7) target bundleno = 4877 (0x130d), region = 128 }
  0x29   : > { %v502_v16 = vld [vmem:[%s14740_s5] sm:$0xff]  ;;  %v503_v17 = vld [vmem:[%s14740_s5 + $0x8] sm:$0xff]  ;;  %v504_v18 = vld [vmem:[%s14740_s5 + $0x10] sm:$0xff]  ;;  %vm725_vm0 = vcmask 1045504   ;;  %v14746_v19 = vmov 0.0|0.0   ;;  %vm12986_vm1 = vmmov 0  }
  0x2a   : > { %11940 = vmatprep.subr.bf16.mxu0 %v14746_v19  ;;  %v730_v20 = vand.u32 4294901760, %v502_v16  ;;  %v733_v21 = vand.u32 4294901760, %v503_v17  ;;  %v505_v22 = vld [vmem:[%s14740_s5 + $0x18] sm:$0x3f]  ;;  %v736_v23 = vand.u32 4294901760, %v504_v18  ;;  %11976 = vmatprep.subr.bf16.mxu1 %v14746_v19  ;;  %v14748_v25 = vmov 0.0  }
  0x2b   : > { %v727_v24 = vsel %vm725_vm0, %v505_v22, 0  ;;  %10508 = vmatprep.mubr.msk.f32.mxu0 %vm12986_vm1, %v14748_v25  ;;  %v13117_v26 = vld [vmem:[%s14737_s2] ss:$0 sm:$0xff]  ;;  %vm722_vm2 = vcmask 244736   ;;  %s451_s12 = sand.u32 1, %s12975_s13   ;;  %10582 = vmatprep.mubr.msk.f32.mxu1 %vm12986_vm1, %v14748_v25  ;;  %v12988_v31 = vmov 0  }
  0x2c   : > { %v13122_v27 = vpack.c.bf16 %v733_v21, %v730_v20  ;;  %v739_v28 = vand.u32 4294901760, %v727_v24  ;;  %v723_v29 = vsel %vm722_vm2, %v13117_v26, 0  ;;  %v13126_v30 = vsub.f32 %v502_v16, %v730_v20  ;;  %12925 = vset.pattern.permute.xlu0 %v12988_v31  ;;  %s13129_s18 = sshll.u32 %s451_s12, 6  ;;  %v13171_v58 = vld [vmem:[%s14743_s8] sm:$0xff]  ;;  %v13176_v59 = vld [vmem:[%s14743_s8 + $0x8] sm:$0xff]  ;;  %v508_v3 = vld [vmem:[%s14743_s8 + $0x10] sm:$0xff] }
  0x2d   : > { %v13131_v32 = vand.u32 4294901760, %v723_v29  ;;  %v13133_v33 = vsub.f32 %v503_v17, %v733_v21  ;;  %v13135_v34 = vsub.f32 %v504_v18, %v736_v23  ;;  %s13144_s13 = scalar_lea.vmem [#allocation2], %s13129_s18  ;;  %v12989_v44 = vmov 2   ;;  %v509_v4 = vld [vmem:[%s14743_s8 + $0x18] sm:$0xff]  ;;  %v510_v8 = vld [vmem:[%s14743_s8 + $0x20] sm:$0xff]  ;;  %v511_v9 = vld [vmem:[%s14743_s8 + $0x28] sm:$0xff] }
  0x2e   : > { %11942 = vmatpush3.bf16.msra.mxu0 %v13122_v27  ;;  %v13138_v35 = vpack.c.bf16 %v739_v28, %v736_v23  ;;  %v811_v36 = vand.u32 4294901760, %v13126_v30  ;;  %v13141_v37 = vsub.f32 %v727_v24, %v739_v28  ;;  %v522_v38 = vld [vmem:[%s13144_s13] sm:$0xff]  ;;  %12927 = vset.pattern.permute.xlu1 %v12989_v44  ;;  %v12990_v52 = vmov 1   ;;  %v512_v13 = vld [vmem:[%s14743_s8 + $0x30] sm:$0xff]  ;;  %v513_v14 = vld [vmem:[%s14743_s8 + $0x38] sm:$0xff]  ;;  %s13416_s22 = scalar_lea.vmem [#allocation3], %s13129_s18 }
  0x2f   : > { %11943 = vmatprep.subr.bf16.mxu0 %v14746_v19  ;;  %v799_v39 = vsub.f32 %v723_v29, %v13131_v32  ;;  %v818_v40 = vand.u32 4294901760, %v13133_v33  ;;  %v825_v41 = vand.u32 4294901760, %v13135_v34  ;;  %525 = vperm.xlu0 %12925, %v522_v38   ;;  %v1220_v60 = vand.u32 4294901760, %v13171_v58  ;;  %s12991_s21 = smov 108   ;;  %s12992_s18 = smov 118  }
  0x30   : > { %v812_v42 = vsub.f32 %v13126_v30, %v811_v36  ;;  %v832_v43 = vand.u32 4294901760, %v13141_v37  ;;  %544 = vperm.xlu1 %12927, %v522_v38   ;;  %v1223_v61 = vand.u32 4294901760, %v13176_v59  ;;  %v13191_v63 = vpack.c.bf16 %v13133_v33, %v13126_v30  ;;  %s12993_s25 = smov 10   ;;  %p498_p8 = scmp.lt.s32.totalorder %s9750_s16, 1 }
  0x31   : > { %v800_v45 = vand.u32 4294901760, %v799_v39  ;;  %v819_v46 = vsub.f32 %v13133_v33, %v818_v40  ;;  %v826_v47 = vsub.f32 %v13135_v34, %v825_v41  ;;  %v13200_v0 = vpack.c.bf16 %v13141_v37, %v13135_v34 }
  0x32   : > { %11945 = vmatpush3.bf16.msra.mxu0 %v13138_v35  ;;  %v813_v48 = vand.u32 4294901760, %v812_v42  ;;  %v833_v49 = vsub.f32 %v13141_v37, %v832_v43  ;;  %v13186_v62 = vpack.c.bf16 %v1223_v61, %v1220_v60  ;;  %v13212_v1 = vpack.c.bf16 %v818_v40, %v811_v36  ;;  %s14838_s16 = smov (!%p498_p8, %s9750_s16), 1 }
  0x33   : > { %v801_v50 = vsub.f32 %v799_v39, %v800_v45  ;;  %11946 = vmatprep.subr.bf16.mxu0 %v14746_v19  ;;  %v820_v51 = vand.u32 4294901760, %v819_v46  ;;  %12926 = vset.pattern.permute.xlu0 %v12990_v52  ;;  %v827_v53 = vand.u32 4294901760, %v826_v47  ;;  %v13216_v2 = vpack.c.bf16 %v832_v43, %v825_v41 }
  0x34   : > { %v834_v54 = vand.u32 4294901760, %v833_v49  ;;  %534 = vperm.xlu0 %12926, %v522_v38   ;;  %12928 = vset.pattern.permute.xlu1 %v12988_v31  ;;  %v1226_v5 = vand.u32 4294901760, %v508_v3  ;;  %v1229_v6 = vand.u32 4294901760, %v509_v4  ;;  %v1232_v10 = vand.u32 4294901760, %v510_v8 }
  0x35   : > { %v802_v55 = vand.u32 4294901760, %v801_v50  ;;  %v13160_v56 = vpack.c.bf16 %v820_v51, %v813_v48  ;;  %11978 = vmatpush3.bf16.msra.mxu1 %v13186_v62  ;;  %14768 = vst [vmem:[#allocation4_spill] sm:$0xff] %v13216_v2  ;;  %v1235_v11 = vand.u32 4294901760, %v511_v9  ;;  %v1238_v15 = vand.u32 4294901760, %v512_v13 }
  0x36   : > { %v13164_v57 = vpack.c.bf16 %v834_v54, %v827_v53  ;;  %11979 = vmatprep.subr.bf16.mxu1 %v14746_v19  ;;  %v13241_v7 = vpack.c.bf16 %v1229_v6, %v1226_v5  ;;  %v1241_v16 = vand.u32 4294901760, %v513_v14  ;;  %v1318_v18 = vsub.f32 %v508_v3, %v1226_v5 }
  0x37   : > { %10509 = vmatmul.mubr.f32.vlgmr.msra.gmra.mrb[0].mxu0 %v802_v55  ;;  %v13253_v12 = vpack.c.bf16 %v1235_v11, %v1232_v10  ;;  %v1325_v20 = vsub.f32 %v509_v4, %v1229_v6  ;;  %v1332_v28 = vsub.f32 %v510_v8, %v1232_v10  ;;  %v1339_v29 = vsub.f32 %v511_v9, %v1235_v11  ;;  %v9766_v6 = vld [vmem:[%s13144_s13 + $0x8] sm:$0xff]  ;;  %v9767_v8 = vld [vmem:[%s13144_s13 + $0x10] sm:$0xff]  ;;  %v13299_v10 = vld [vmem:[%s14741_s6] ss:$0 sm:$0xff] }
  0x38   : > { %11948 = vmatpush3.bf16.msra.mxu0 %v13160_v56  ;;  %10519 = vmatprep.mubr.msk.f32.mxu0 %vm12986_vm1, %v14748_v25  ;;  %v13265_v17 = vpack.c.bf16 %v1241_v16, %v1238_v15  ;;  %v1319_v21 = vand.u32 4294901760, %v1318_v18  ;;  %v1346_v38 = vsub.f32 %v512_v13, %v1238_v15  ;;  %v13304_v11 = vld [vmem:[%s14741_s6 + $0x1] ss:$0 sm:$0xff]  ;;  %vm1215_vm3 = vcmask 523264  }
  0x39   : > { %11949 = vmatprep.subr.bf16.mxu0 %v14746_v19  ;;  %12930 = vset.pattern.permute.xlu0 %v12989_v44  ;;  %v1326_v22 = vand.u32 4294901760, %v1325_v20  ;;  %v1333_v33 = vand.u32 4294901760, %v1332_v28  ;;  %v1340_v34 = vand.u32 4294901760, %v1339_v29  ;;  %v13277_v53 = vpack.c.bf16 %v1325_v20, %v1318_v18 }
  0x3a   : > { %11981 = vmatpush3.bf16.msra.mxu1 %v13241_v7  ;;  %v1320_v23 = vsub.f32 %v1318_v18, %v1319_v21  ;;  %v1347_v42 = vand.u32 4294901760, %v1346_v38  ;;  %v13279_v54 = vpack.c.bf16 %v1339_v29, %v1332_v28  ;;  %564 = vperm.xlu1 %12928, %v9766_v6   ;;  %vm9653_vm4 = vcmask 80896  }
  0x3b   : > { %11982 = vmatprep.subr.bf16.mxu1 %v14746_v19  ;;  %v1327_v24 = vsub.f32 %v1325_v20, %v1326_v22  ;;  %v1334_v37 = vsub.f32 %v1332_v28, %v1333_v33  ;;  %v1341_v40 = vsub.f32 %v1339_v29, %v1340_v34  ;;  %v13283_v3 = vpack.c.bf16 %v1326_v22, %v1319_v21 }
  0x3c   : > { %11951 = vmatpush3.bf16.msra.mxu0 %v13164_v57  ;;  %v1321_v30 = vand.u32 4294901760, %v1320_v23  ;;  %v1348_v46 = vsub.f32 %v1346_v38, %v1347_v42  ;;  %v13285_v4 = vpack.c.bf16 %v1340_v34, %v1333_v33  ;;  %575 = vperm.xlu0 %12930, %v9766_v6   ;;  %v13317_v23 = vld [vmem:[%s14742_s7] ss:$0 sm:$0xff]  ;;  %v1311_v28 = vsub.f32 %v13176_v59, %v1223_v61 }
  0x3d   : > { %11952 = vmatprep.subr.bf16.mxu0 %v14746_v19  ;;  %v1335_v41 = vand.u32 4294901760, %v1334_v37  ;;  %vm9671_vm5 = vcmask 7168  }
  0x3e   : > { %11984 = vmatpush3.bf16.msra.mxu1 %v13253_v12  ;;  %v1349_v49 = vand.u32 4294901760, %v1348_v46  ;;  %12929 = vset.pattern.permute.xlu1 %v12990_v52  ;;  %v1312_v37 = vand.u32 4294901760, %v1311_v28 }
  0x3f   : > { %10520 = vmatmul.mubr.f32.vlgmr.msra.gmra.mrb[0].mxu0 %v13131_v32  ;;  %11985 = vmatprep.subr.bf16.mxu1 %v14746_v19 }
  0x40   : > { %11954 = vmatpush3.bf16.msra.mxu0 %v13191_v63  ;;  %10530 = vmatprep.mubr.msk.f32.mxu0 %vm12986_vm1, %v14748_v25 }
  0x41   : > { %11955 = vmatprep.subr.bf16.mxu0 %v14746_v19  ;;  %596 = vperm.xlu0 %12930, %v9767_v8  }
  0x42   : > { %11987 = vmatpush3.bf16.msra.mxu1 %v13265_v17  ;;  %569 = vperm.xlu1 %12929, %v9766_v6   ;;  %v9769_v6 = vld [vmem:[%s13144_s13 + $0x20] sm:$0xff] }
  0x43   : > { %11988 = vmatprep.subr.bf16.mxu1 %v14746_v19 }
  0x44   : > { %11957 = vmatpush3.bf16.msra.mxu0 %v13200_v0 }
  0x45   : > { %11958 = vmatprep.subr.bf16.mxu0 %v14746_v19  ;;  %12934 = vset.pattern.permute.xlu0 %v12990_v52 }
  0x46   : > { %12931 = vset.pattern.permute.xlu1 %v12988_v31 }
  0x47   : > { %10531 = vmatmul.mubr.f32.vlgmr.msra.gmra.mrb[0].mxu0 %v799_v39  ;;  %v1353_v39 = vsub.f32 %v513_v14, %v1241_v16  ;;  %585 = vperm.xlu1 %12931, %v9767_v8   ;;  %v13311_v16 = vld [vmem:[%s14741_s6 + $0x2] ss:$0 sm:$0xff] }
  0x48   : > { %11960 = vmatpush3.bf16.msra.mxu0 %v13122_v27  ;;  %10541 = vmatprep.mubr.msk.f32.mxu0 %vm12986_vm1, %v14748_v25 }
  0x49   : > { %11961 = vmatprep.subr.bf16.mxu0 %v14746_v19  ;;  %v1354_v43 = vand.u32 4294901760, %v1353_v39  ;;  %v13281_v55 = vpack.c.bf16 %v1353_v39, %v1346_v38 }
  0x4b   : > { %v1355_v47 = vsub.f32 %v1353_v39, %v1354_v43  ;;  %v13287_v5 = vpack.c.bf16 %v1354_v43, %v1347_v42  ;;  %12932 = vset.pattern.permute.xlu1 %v12990_v52 }
  0x4c   : > { %11963 = vmatpush3.bf16.msra.mxu0 %v13138_v35  ;;  %590 = vperm.xlu1 %12932, %v9767_v8   ;;  %v9770_v8 = vld [vmem:[%s13144_s13 + $0x28] sm:$0xff] }
  0x4d   : > { %11964 = vmatprep.subr.bf16.mxu0 %v14746_v19  ;;  %v1356_v50 = vand.u32 4294901760, %v1355_v47 }
  0x4f   : > { %10542 = vmatmul.mubr.f32.vlgmr.msra.gmra.mrb[0].mxu0 %v800_v45  ;;  %v1342_v45 = vand.u32 4294901760, %v1341_v40  ;;  %v13275_v51 = vpack.c.bf16 %v1356_v50, %v1349_v49  ;;  %v9768_v50 = vld [vmem:[%s13144_s13 + $0x18] sm:$0xff] }
  0x50   : > { %11966 = vmatpush3.bf16.msra.mxu0 %v13212_v1  ;;  %10552 = vmatprep.mubr.msk.f32.mxu0 %vm12986_vm1, %v14748_v25 }
  0x51   : > { %11967 = vmatprep.subr.bf16.mxu0 %v14746_v19  ;;  %v13273_v48 = vpack.c.bf16 %v1342_v45, %v1335_v41  ;;  %12933 = vset.pattern.permute.xlu1 %v12988_v31  ;;  %v1313_v41 = vsub.f32 %v1311_v28, %v1312_v37 }
  0x52   : > { %606 = vperm.xlu1 %12933, %v9768_v50   ;;  %611 = vperm.xlu0 %12934, %v9768_v50  }
  0x54   : > { %11969 = vmatpush3.bf16.msra.mxu0 %v13216_v2 }
  0x55   : > { %11970 = vmatprep.subr.bf16.mxu0 %v14746_v19 }
  0x56   : > { %12935 = vset.pattern.permute.xlu1 %v12989_v44  ;;  %632 = vperm.xlu0 %12934, %v9769_v6  }
  0x57   : > { %10553 = vmatmul.mubr.f32.vlgmr.msra.gmra.mrb[0].mxu0 %v13131_v32  ;;  %617 = vperm.xlu1 %12935, %v9768_v50  }
  0x58   : > { %11972 = vmatpush3.bf16.msra.mxu0 %v13122_v27  ;;  %10563 = vmatprep.mubr.msk.f32.mxu0 %vm12986_vm1, %v14748_v25 }
  0x59   : > { %11973 = vmatprep.subr.bf16.mxu0 %v14746_v19 }
  0x5a   : > { %12938 = vset.pattern.permute.xlu0 %v12988_v31 }
  0x5b   : > { %12936 = vset.pattern.permute.xlu1 %v12988_v31  ;;  %648 = vperm.xlu0 %12938, %v9770_v8  }
  0x5c   : > { %11975 = vmatpush3.bf16.msra.mxu0 %v13138_v35  ;;  %627 = vperm.xlu1 %12936, %v9769_v6  }
  0x5d   : > { %12012 = vmatprep.subr.bf16.mxu0 %v14746_v19 }
  0x5f   : > { %10564 = vmatmul.mubr.f32.vlgmr.msra.gmra.mrb[0].mxu0 %v13131_v32  ;;  %v1328_v32 = vand.u32 4294901760, %v1327_v24  ;;  %v1304_v24 = vsub.f32 %v13171_v58, %v1220_v60  ;;  %v1314_v60 = vand.u32 4294901760, %v1313_v41  ;;  %v13419_v41 = vld [vmem:[%s13416_s22] sm:$0xff] }
  0x60   : > { %12014 = vmatpush3.bf16.msra.mxu0 %v13186_v62  ;;  %10639 = vmatprep.mubr.msk.f32.mxu0 %vm12986_vm1, %v14748_v25 }
  0x61   : > { %12015 = vmatprep.subr.bf16.mxu0 %v14746_v19  ;;  %v13271_v36 = vpack.c.bf16 %v1328_v32, %v1321_v30  ;;  %v1305_v34 = vand.u32 4294901760, %v1304_v24  ;;  %v13348_v47 = vpack.c.bf16 %v1311_v28, %v1304_v24  ;;  %12937 = vset.pattern.permute.xlu1 %v12989_v44 }
  0x62   : > { %638 = vperm.xlu1 %12937, %v9769_v6  }
  0x63   : > { %v1306_v40 = vsub.f32 %v1304_v24, %v1305_v34  ;;  %v13370_v49 = vpack.c.bf16 %v1312_v37, %v1305_v34 }
  0x64   : > { %12017 = vmatpush3.bf16.msra.mxu0 %v13241_v7 }
  0x65   : > { %12018 = vmatprep.subr.bf16.mxu0 %v14746_v19  ;;  %v1307_v58 = vand.u32 4294901760, %v1306_v40  ;;  %v13413_v40 = vld [vmem:[%s14738_s3] ss:$0 sm:$0xff] }
  0x66   : > { %12939 = vset.pattern.permute.xlu1 %v12990_v52 }
  0x67   : > { %v13328_v61 = vpack.c.bf16 %v1314_v60, %v1307_v58  ;;  %653 = vperm.xlu1 %12939, %v9770_v8  }
  0x68   : > { %12020 = vmatpush3.bf16.msra.mxu0 %v13253_v12 }
  0x69   : > { %12021 = vmatprep.subr.bf16.mxu0 %v14746_v19 }
  0x6b   : > { %12940 = vset.pattern.permute.xlu1 %v12989_v44 }
  0x6c   : > { %12023 = vmatpush3.bf16.msra.mxu0 %v13265_v17  ;;  %659 = vperm.xlu1 %12940, %v9770_v8  }
  0x6d   : > { %12036 = vmatprep.subr.bf16.mxu0 %v14746_v19 }
  0x70   : > { %12941 = vset.pattern.permute.xlu1 %v12990_v52 }
  0xae   : > { %v526_v9 = vpop.permute.xlu0 %525 }
  0xaf   : > { %v532_v14 = vmul.f32 %v13299_v10, %v526_v9  ;;  %v545_v18 = vpop.permute.xlu1 %544  ;;  %v9771_v9 = vld [vmem:[%s13144_s13 + $0x30] sm:$0xff] }
  0xb0   : > { %v551_v21 = vmul.f32 %v13311_v16, %v545_v18  ;;  %669 = vperm.xlu0 %12938, %v9771_v9   ;;  %674 = vperm.xlu1 %12941, %v9771_v9  }
  0xb3   : > { %v535_v13 = vpop.permute.xlu0 %534 }
  0xb4   : > { %v541_v15 = vmul.f32 %v13304_v11, %v535_v13  ;;  %12942 = vset.pattern.permute.xlu0 %v12989_v44  ;;  %v9772_v13 = vld [vmem:[%s13144_s13 + $0x38] sm:$0xff]  ;;  %12943 = vset.pattern.permute.xlu1 %v12988_v31 }
  0xb5   : > { %680 = vperm.xlu0 %12942, %v9771_v9   ;;  %690 = vperm.xlu1 %12943, %v9772_v13  }
  0xb6   : > { %v542_v20 = vadd.f32 %v541_v15, %v532_v14 }
  0xb8   : > { %v552_v22 = vadd.f32 %v551_v21, %v542_v20 }
  0xb9   : > { %701 = vperm.xlu0 %12942, %v9772_v13   ;;  %12944 = vset.pattern.permute.xlu1 %v12990_v52  ;;  %v13407_v52 = vld [vmem:[%s14744_s9] ss:$0 sm:$0xff] }
  0xba   : > { %v559_v29 = vsub.f32 %v13317_v23, %v552_v22  ;;  %695 = vperm.xlu1 %12944, %v9772_v13  }
 0x132   : > { %v1210_v30 = vpop.f32.mrb[0].mxu0 }
 0x133   : > { %v12804_v32 = vadd.f32 %v1210_v30, %v559_v29  ;;  %v10565_v33 = vpop.f32.mrb[1].mxu0 }
 0x135   : > { %v1214_v38 = vmax.f32 %v12804_v32, 0.0 }
 0x137   : > { %v1217_v39 = vsel %vm1215_vm3, %v1214_v38, 0 }
 0x138   : > { %v1292_v42 = vand.u32 4294901760, %v1217_v39 }
 0x13a   : > { %v1293_v43 = vsub.f32 %v1217_v39, %v1292_v42 }
 0x13c   : > { %v1294_v45 = vand.u32 4294901760, %v1293_v43 }
 0x13e   : > { %10640 = vmatmul.mubr.f32.vlgmr.msra.gmra.mrb[2].mxu0 %v1294_v45  ;;  %v1295_v59 = vsub.f32 %v1293_v43, %v1294_v45 }
 0x13f   : > { %12038 = vmatpush3.bf16.msra.mxu0 %v13186_v62  ;;  %10677 = vmatprep.mubr.msk.f32.mxu0 %vm12986_vm1, %v14748_v25 }
 0x140   : > { %12039 = vmatprep.subr.bf16.mxu0 %v14746_v19  ;;  %v1296_v46 = vand.u32 4294901760, %v1295_v59 }
 0x142   : > { %10583 = vmatmul.mubr.f32.vlgmr.msra.gmra.mrb[0].mxu1 %v1296_v46 }
 0x143   : > { %11990 = vmatpush3.bf16.msra.mxu1 %v13328_v61  ;;  %12041 = vmatpush3.bf16.msra.mxu0 %v13241_v7 }
 0x144   : > { %11991 = vmatprep.subr.bf16.mxu1 %v14746_v19  ;;  %12042 = vmatprep.subr.bf16.mxu0 %v14746_v19 }
 0x145   : > { %10601 = vmatprep.mubr.msk.f32.mxu1 %vm12986_vm1, %v14748_v25 }
 0x147   : > { %11993 = vmatpush3.bf16.msra.mxu1 %v13271_v36  ;;  %12044 = vmatpush3.bf16.msra.mxu0 %v13253_v12 }
 0x148   : > { %11994 = vmatprep.subr.bf16.mxu1 %v14746_v19  ;;  %12045 = vmatprep.subr.bf16.mxu0 %v14746_v19 }
 0x14b   : > { %11996 = vmatpush3.bf16.msra.mxu1 %v13273_v48  ;;  %12047 = vmatpush3.bf16.msra.mxu0 %v13265_v17 }
 0x14c   : > { %11997 = vmatprep.subr.bf16.mxu1 %v14746_v19  ;;  %12084 = vmatprep.subr.bf16.mxu0 %v14746_v19 }
 0x14e   : > { %10678 = vmatmul.mubr.f32.vlgmr.msra.gmra.mrb[4].mxu0 %v1292_v42 }
 0x14f   : > { %11999 = vmatpush3.bf16.msra.mxu1 %v13275_v51  ;;  %12086 = vmatpush3.bf16.msra.mxu0 %v13186_v62 }
 0x150   : > { %12000 = vmatprep.subr.bf16.mxu1 %v14746_v19  ;;  %12087 = vmatprep.subr.bf16.mxu0 %v14746_v19 }
 0x151   : > { %10762 = vmatprep.mubr.msk.f32.mxu0 %vm12986_vm1, %v14748_v25 }
 0x152   : > { %10602 = vmatmul.mubr.f32.vlgmr.msra.gmra.mrb[2].mxu1 %v1292_v42 }
 0x153   : > { %12002 = vmatpush3.bf16.msra.mxu1 %v13348_v47  ;;  %10620 = vmatprep.mubr.msk.f32.mxu1 %vm12986_vm1, %v14748_v25 }
 0x154   : > { %12003 = vmatprep.subr.bf16.mxu1 %v14746_v19  ;;  %12089 = vmatpush3.bf16.msra.mxu0 %v13241_v7 }
 0x155   : > { %12090 = vmatprep.subr.bf16.mxu0 %v14746_v19 }
 0x157   : > { %12005 = vmatpush3.bf16.msra.mxu1 %v13277_v53 }
 0x158   : > { %12006 = vmatprep.subr.bf16.mxu1 %v14746_v19  ;;  %12092 = vmatpush3.bf16.msra.mxu0 %v13253_v12 }
 0x159   : > { %12093 = vmatprep.subr.bf16.mxu0 %v14746_v19 }
 0x15b   : > { %12008 = vmatpush3.bf16.msra.mxu1 %v13279_v54 }
 0x15c   : > { %12009 = vmatprep.subr.bf16.mxu1 %v14746_v19  ;;  %12095 = vmatpush3.bf16.msra.mxu0 %v13265_v17 }
 0x15d   : > { %12096 = vmatprep.subr.bf16.mxu0 %v14746_v19 }
 0x15f   : > { %12011 = vmatpush3.bf16.msra.mxu1 %v13281_v55 }
 0x160   : > { %12024 = vmatprep.subr.bf16.mxu1 %v14746_v19 }
 0x162   : > { %10621 = vmatmul.mubr.f32.vlgmr.msra.gmra.mrb[4].mxu1 %v1293_v43 }
 0x163   : > { %12026 = vmatpush3.bf16.msra.mxu1 %v13370_v49  ;;  %10658 = vmatprep.mubr.msk.f32.mxu1 %vm12986_vm1, %v14748_v25 }
 0x164   : > { %12027 = vmatprep.subr.bf16.mxu1 %v14746_v19 }
 0x167   : > { %12029 = vmatpush3.bf16.msra.mxu1 %v13283_v3 }
 0x168   : > { %12030 = vmatprep.subr.bf16.mxu1 %v14746_v19 }
 0x16b   : > { %12032 = vmatpush3.bf16.msra.mxu1 %v13285_v4 }
 0x16c   : > { %12033 = vmatprep.subr.bf16.mxu1 %v14746_v19 }
 0x16f   : > { %12035 = vmatpush3.bf16.msra.mxu1 %v13287_v5 }
 0x170   : > { %12048 = vmatprep.subr.bf16.mxu1 %v14746_v19 }
 0x172   : > { %10659 = vmatmul.mubr.f32.vlgmr.msra.gmra.mrb[6].mxu1 %v1292_v42 }
 0x173   : > { %12050 = vmatpush3.bf16.msra.mxu1 %v13122_v27  ;;  %10688 = vmatprep.mubr.msk.f32.mxu1 %vm12986_vm1, %v14748_v25 }
 0x174   : > { %12051 = vmatprep.subr.bf16.mxu1 %v14746_v19 }
 0x177   : > { %12053 = vmatpush3.bf16.msra.mxu1 %v13138_v35 }
 0x178   : > { %12054 = vmatprep.subr.bf16.mxu1 %v14746_v19 }
 0x211   : > { %v1578_v14 = vpop.f32.mrb[2].mxu0 }
 0x212   : > { %v10641_v15 = vpop.f32.mrb[3].mxu0 }
 0x215   : > { %v1298_v18 = vpop.f32.mrb[0].mxu1 }
 0x216   : > { %v10584_v20 = vpop.f32.mrb[1].mxu1 }
 0x221   : > { %v1752_v21 = vpop.f32.mrb[4].mxu0 }
 0x222   : > { %v10679_v22 = vpop.f32.mrb[5].mxu0 }
 0x225   : > { %v1409_v44 = vpop.f32.mrb[2].mxu1 }
 0x226   : > { %v1410_v24 = vadd.f32 %v1409_v44, %v1298_v18  ;;  %v10603_v28 = vpop.f32.mrb[3].mxu1 }
 0x227   : > { %v13473_v28 = vpop.permute.xlu1 %564 }
 0x235   : > { %v1497_v29 = vpop.f32.mrb[4].mxu1 }
 0x236   : > { %v1498_v30 = vadd.f32 %v1497_v29, %v1410_v24  ;;  %v10622_v32 = vpop.f32.mrb[5].mxu1  ;;  %v13478_v29 = vpop.permute.xlu1 %569 }
 0x238   : > { %v1579_v33 = vadd.f32 %v1578_v14, %v1498_v30 }
 0x23a   : > { %v13485_v30 = vpop.permute.xlu1 %585 }
 0x23e   : > { %v13492_v32 = vpop.permute.xlu1 %590 }
 0x245   : > { %v1673_v34 = vpop.f32.mrb[6].mxu1 }
 0x246   : > { %v1674_v31 = vadd.f32 %v1673_v34, %v1579_v33  ;;  %v10660_v37 = vpop.f32.mrb[7].mxu1  ;;  %v13496_v33 = vpop.permute.xlu1 %606 }
 0x247   : > { %14769 = vst [vmem:[#allocation5_spill] sm:$0xff] %v13496_v33 }
 0x248   : > { %v1753_v38 = vadd.f32 %v1752_v21, %v1674_v31  ;;  %v576_v31 = vpop.permute.xlu0 %575 }
 0x24a   : > { %v1756_v39 = vadd.f32 %v13117_v26, %v1753_v38  ;;  %v13502_v34 = vpop.permute.xlu1 %617 }
 0x24b   : > { %14770 = vst [vmem:[#allocation6_spill] sm:$0xff] %v13502_v34 }
 0x24c   : > { %v1763_v42 = vadd.f32 %v13407_v52, %v1756_v39  ;;  %v13506_v38 = vpop.permute.xlu0 %596 }
 0x24d   : > { %14772 = vst [vmem:[#allocation8_spill] sm:$0xff] %v13506_v38 }
 0x24e   : > { %v13423_v43 = vadd.f32 %v13413_v40, %v1763_v42  ;;  %v13426_v58 = vsub.f32 %v1763_v42, %v13419_v41  ;;  %v13504_v37 = vpop.permute.xlu1 %627 }
 0x24f   : > { %14771 = vst [vmem:[#allocation7_spill] sm:$0xff] %v13504_v37 }
 0x250   : > { %v1860_v26 = vsel %vm722_vm2, %v13426_v58, 0  ;;  %1785 = vrot.lane.b32.xlu1 %v13423_v43, %s12991_s21  ;;  %1777 = vrot.lane.b32.xlu0 %v13423_v43, %s12992_s18  ;;  %v1838_v60 = vsub.f32 0.5, %v13423_v43  ;;  %v9779_v45 = vadd.f32 -0.5, %v13423_v43  ;;  %v9782_v59 = vadd.f32 -0.6, %v13423_v43  ;;  %v13510_v42 = vpop.permute.xlu0 %611 }
 0x251   : > { %v1931_v46 = vand.u32 4294901760, %v1860_v26  ;;  %v9781_v50 = vadd.f32 0.7, %v13423_v43  ;;  %14774 = vst [vmem:[#allocation10_spill] sm:$0xff] %v13510_v42 }
 0x252   : > { %v1839_v6 = vmax.f32 %v1838_v60, 0.0  ;;  %v13438_v8 = vmul.f32 %v9779_v45, %v9779_v45  ;;  %v1819_v9 = vand.u32 2147483647, %v9782_v59  ;;  %v13508_v39 = vpop.permute.xlu1 %638 }
 0x253   : > { %v1932_v13 = vsub.f32 %v1860_v26, %v1931_v46  ;;  %v1815_v14 = vand.u32 2147483647, %v9781_v50  ;;  %14773 = vst [vmem:[#allocation9_spill] sm:$0xff] %v13508_v39 }
 0x254   : > { %1843 = vrot.lane.b32.xlu0 %v1839_v6, %s12991_s21  ;;  %1803 = vrot.lane.b32.xlu1 %v13438_v8, %s12992_s18  ;;  %v1820_v15 = vsub.f32 0.6, %v1819_v9  ;;  %v13514_v60 = vpop.permute.xlu0 %632 }
 0x255   : > { %v1933_v18 = vand.u32 4294901760, %v1932_v13  ;;  %v13443_v21 = vsub.f32 0.3, %v1815_v14  ;;  %14776 = vst [vmem:[#allocation12_spill] sm:$0xff] %v13514_v60 }
 0x256   : > { %v1821_v20 = vmax.f32 %v1820_v15, 0.0  ;;  %v13512_v26 = vpop.permute.xlu1 %653 }
 0x257   : > { %v1934_v22 = vsub.f32 %v1932_v13, %v1933_v18  ;;  %v14750_v24 = vmax.f32 %v13443_v21, 0.0  ;;  %14775 = vst [vmem:[#allocation11_spill] sm:$0xff] %v13512_v26 }
 0x258   : > { %1828 = vrot.lane.b32.xlu0 %v1821_v20, %s12991_s21  ;;  %1807 = vrot.lane.b32.xlu1 %v13438_v8, %s12991_s21  ;;  %v13518_v59 = vpop.permute.xlu0 %648 }
 0x259   : > { %v1935_v44 = vand.u32 4294901760, %v1934_v22  ;;  %14778 = vst [vmem:[#allocation14_spill] sm:$0xff] %v13518_v59  ;;  %v13542_v22 = vld [vmem:[%s14739_s4 + $0x2] ss:$0 sm:$0xff] }
 0x25a   : > { %v13516_v45 = vpop.permute.xlu1 %659 }
 0x25b   : > { %10689 = vmatmul.mubr.f32.vlgmr.msra.gmra.mrb[8].mxu1 %v1935_v44  ;;  %14777 = vst [vmem:[#allocation13_spill] sm:$0xff] %v13516_v45  ;;  %v13547_v44 = vld [vmem:[%s14739_s4 + $0x1] ss:$0 sm:$0xff] }
 0x25c   : > { %12056 = vmatpush3.bf16.msra.mxu1 %v13160_v56  ;;  %1823 = vrot.lane.b32.xlu1 %v14750_v24, %s12992_s18  ;;  %v13522_v50 = vpop.permute.xlu0 %669  ;;  %14786 = vst [vmem:[#allocation22_spill] sm:$0xff] %v13547_v44 }
 0x25d   : > { %12057 = vmatprep.subr.bf16.mxu1 %v14746_v19  ;;  %10699 = vmatprep.mubr.msk.f32.mxu1 %vm12986_vm1, %v14748_v25  ;;  %14780 = vst [vmem:[#allocation16_spill] sm:$0xff] %v13522_v50 }
 0x260   : > { %12059 = vmatpush3.bf16.msra.mxu1 %v13164_v57  ;;  %v13526_v9 = vpop.permute.xlu0 %680 }
 0x261   : > { %12060 = vmatprep.subr.bf16.mxu1 %v14746_v19  ;;  %14782 = vst [vmem:[#allocation18_spill] sm:$0xff] %v13526_v9 }
 0x263   : > { %10700 = vmatmul.mubr.f32.vlgmr.msra.gmra.mrb[8].mxu1 %v1931_v46 }
 0x264   : > { %12062 = vmatpush3.bf16.msra.mxu1 %v13191_v63  ;;  %10710 = vmatprep.mubr.msk.f32.mxu1 %vm12986_vm1, %v14748_v25 }
 0x265   : > { %12063 = vmatprep.subr.bf16.mxu1 %v14746_v19 }
 0x268   : > { %12065 = vmatpush3.bf16.msra.mxu1 %v13200_v0 }
 0x269   : > { %12066 = vmatprep.subr.bf16.mxu1 %v14746_v19 }
 0x26b   : > { %10711 = vmatmul.mubr.f32.vlgmr.msra.gmra.mrb[8].mxu1 %v1932_v13  ;;  %v13531_v13 = vld [vmem:[%s14739_s4] ss:$0 sm:$0xff] }
 0x26c   : > { %12068 = vmatpush3.bf16.msra.mxu1 %v13122_v27  ;;  %10721 = vmatprep.mubr.msk.f32.mxu1 %vm12986_vm1, %v14748_v25  ;;  %14783 = vst [vmem:[#allocation19_spill] sm:$0xff] %v13531_v13  ;;  %v1771_v14 = vsub.f32 %v13531_v13, %v13423_v43 }
 0x26d   : > { %12069 = vmatprep.subr.bf16.mxu1 %v14746_v19 }
 0x26e   : > { %v1789_v20 = vmul.f32 0.3, %v1771_v14 }
 0x270   : > { %12071 = vmatpush3.bf16.msra.mxu1 %v13138_v35 }
 0x271   : > { %12072 = vmatprep.subr.bf16.mxu1 %v14746_v19 }
 0x273   : > { %10722 = vmatmul.mubr.f32.vlgmr.msra.gmra.mrb[8].mxu1 %v1933_v18  ;;  %v13537_v18 = vpop.permute.xlu0 %701 }
 0x274   : > { %12074 = vmatpush3.bf16.msra.mxu1 %v13212_v1  ;;  %10732 = vmatprep.mubr.msk.f32.mxu1 %vm12986_vm1, %v14748_v25  ;;  %14785 = vst [vmem:[#allocation21_spill] sm:$0xff] %v13537_v18 }
 0x275   : > { %12075 = vmatprep.subr.bf16.mxu1 %v14746_v19 }
 0x278   : > { %12077 = vmatpush3.bf16.msra.mxu1 %v13216_v2 }
 0x279   : > { %12078 = vmatprep.subr.bf16.mxu1 %v14746_v19 }
 0x27b   : > { %10733 = vmatmul.mubr.f32.vlgmr.msra.gmra.mrb[8].mxu1 %v1931_v46 }
 0x27c   : > { %12080 = vmatpush3.bf16.msra.mxu1 %v13122_v27  ;;  %10743 = vmatprep.mubr.msk.f32.mxu1 %vm12986_vm1, %v14748_v25 }
 0x27d   : > { %12081 = vmatprep.subr.bf16.mxu1 %v14746_v19 }
 0x280   : > { %12083 = vmatpush3.bf16.msra.mxu1 %v13138_v35 }
 0x281   : > { %12120 = vmatprep.subr.bf16.mxu1 %v14746_v19 }
 0x283   : > { %10744 = vmatmul.mubr.f32.vlgmr.msra.gmra.mrb[8].mxu1 %v1931_v46  ;;  %v13520_v46 = vpop.permute.xlu1 %674 }
 0x284   : > { %12122 = vmatpush3.bf16.msra.mxu1 %v13186_v62  ;;  %10819 = vmatprep.mubr.msk.f32.mxu1 %vm12986_vm1, %v14748_v25  ;;  %14779 = vst [vmem:[#allocation15_spill] sm:$0xff] %v13520_v46 }
 0x285   : > { %12123 = vmatprep.subr.bf16.mxu1 %v14746_v19 }
 0x287   : > { %v13524_v6 = vpop.permute.xlu1 %690 }
 0x288   : > { %12125 = vmatpush3.bf16.msra.mxu1 %v13241_v7  ;;  %14781 = vst [vmem:[#allocation17_spill] sm:$0xff] %v13524_v6 }
 0x289   : > { %12126 = vmatprep.subr.bf16.mxu1 %v14746_v19 }
 0x28b   : > { %v13535_v15 = vpop.permute.xlu1 %695 }
 0x28c   : > { %12128 = vmatpush3.bf16.msra.mxu1 %v13253_v12  ;;  %14784 = vst [vmem:[#allocation20_spill] sm:$0xff] %v13535_v15  ;;  %v1790_v15 = vadd.f32 %v1789_v20, %v1771_v14 }
 0x28d   : > { %12129 = vmatprep.subr.bf16.mxu1 %v14746_v19 }
 0x28e   : > { %v1793_v59 = vand.u32 2147483647, %v1790_v15 }
 0x290   : > { %12131 = vmatpush3.bf16.msra.mxu1 %v13265_v17 }
 0x291   : > { %12144 = vmatprep.subr.bf16.mxu1 %v14746_v19  ;;  %v9783_v19 = vadd.f32 -0.7, %v13423_v43 }
 0x293   : > { %v1833_v46 = vand.u32 2147483647, %v9783_v19 }
 0x295   : > { %v1834_v34 = vsub.f32 0.3, %v1833_v46 }
 0x2c2   : > { %v1786_v25 = vpop.permute.xlu1 %1785  ;;  %v1778_v24 = vpop.permute.xlu0 %1777 }
 0x2c3   : > { %v1788_v6 = vsub.f32 %v13542_v22, %v1786_v25  ;;  %v1780_v18 = vsub.f32 %v13547_v44, %v1778_v24  ;;  %v1835_v25 = vmax.f32 %v1834_v34, 0.0  ;;  %v14787_v24 = vmax.f32 %v13443_v21, 0.0 }
 0x2c4   : > { %v578_v34 = vmul.f32 %v13311_v16, %v576_v31  ;;  %v14789_v31 = vmov 0.0|0.0  }
 0x2c5   : > { %v1792_v9 = vadd.f32 %v1789_v20, %v1788_v6  ;;  %v1791_v50 = vadd.f32 %v1789_v20, %v1780_v18 }
 0x2c6   : > { %v1804_v45 = vpop.permute.xlu1 %1803  ;;  %v1844_v42 = vpop.permute.xlu0 %1843 }
 0x2c7   : > { %v1794_v26 = vand.u32 2147483647, %v1791_v50  ;;  %v1796_v39 = vand.u32 2147483647, %v1792_v9  ;;  %v1806_v37 = vadd.f32 %v1804_v45, %v13438_v8  ;;  %v567_v8 = vmul.f32 %v13299_v10, %v13473_v28 }
 0x2c9   : > { %v1795_v60 = vadd.f32 %v1794_v26, %v1793_v59 }
 0x2ca   : > { %v1808_v43 = vpop.permute.xlu1 %1807  ;;  %v1829_v18 = vpop.permute.xlu0 %1828 }
 0x2cb   : > { %v13553_v33 = vadd.f32 %v1796_v39, %v1795_v60  ;;  %v13555_v38 = vadd.f32 %v1808_v43, %v1806_v37  ;;  %v572_v39 = vmul.f32 %v13304_v11, %v13478_v29  ;;  %v14788_v29 = vmov 0.0  }
 0x2cd   : > { %v573_v37 = vadd.f32 %v572_v39, %v567_v8 }
 0x2ce   : > { %v1824_v14 = vpop.permute.xlu1 %1823 }
 0x2cf   : > { %v1826_v6 = vmin.f32 %v14787_v24, %v1824_v14  ;;  %v1836_v19 = vmin.f32 %v1835_v25, %v1824_v14  ;;  %v579_v60 = vadd.f32 %v578_v34, %v573_v37 }
 0x2d1   : > { %v1831_v15 = vmin.f32 %v1826_v6, %v1829_v18  ;;  %v1837_v50 = vmin.f32 %v1836_v19, %v1829_v18  ;;  %v580_v21 = vsub.f32 %v13317_v23, %v579_v60 }
 0x2d3   : > { %v1841_v9 = vadd.f32 %v1837_v50, %v1831_v15 }
 0x2d5   : > { %v13559_v26 = vadd.f32 %v1844_v42, %v1841_v9 }
 0x356   : > { %v2343_v45 = vpop.f32.mrb[8].mxu1 }
 0x357   : > { %v12805_v59 = vadd.f32 %v2343_v45, %v580_v21  ;;  %v10745_v46 = vpop.f32.mrb[9].mxu1 }
 0x359   : > { %v2347_v20 = vmax.f32 %v12805_v59, 0.0 }
 0x35b   : > { %v2349_v43 = vsel %vm1215_vm3, %v2347_v20, 0 }
 0x35c   : > { %v2424_v42 = vand.u32 4294901760, %v2349_v43 }
 0x35e   : > { %v2425_v25 = vsub.f32 %v2349_v43, %v2424_v42 }
 0x360   : > { %v2426_v14 = vand.u32 4294901760, %v2425_v25 }
 0x362   : > { %10820 = vmatmul.mubr.f32.vlgmr.msra.gmra.mrb[10].mxu1 %v2426_v14  ;;  %v2427_v28 = vsub.f32 %v2425_v25, %v2426_v14  ;;  %v13630_v14 = vld [vmem:[%s13416_s22 + $0x8] sm:$0xff] }
 0x363   : > { %12146 = vmatpush3.bf16.msra.mxu1 %v13186_v62  ;;  %10857 = vmatprep.mubr.msk.f32.mxu1 %vm12986_vm1, %v14788_v29 }
 0x364   : > { %12147 = vmatprep.subr.bf16.mxu1 %v14789_v31  ;;  %v2428_v24 = vand.u32 4294901760, %v2427_v28 }
 0x366   : > { %10763 = vmatmul.mubr.f32.vlgmr.msra.gmra.mrb[6].mxu0 %v2428_v24 }
 0x367   : > { %12098 = vmatpush3.bf16.msra.mxu0 %v13328_v61  ;;  %12149 = vmatpush3.bf16.msra.mxu1 %v13241_v7 }
 0x368   : > { %12099 = vmatprep.subr.bf16.mxu0 %v14789_v31  ;;  %12150 = vmatprep.subr.bf16.mxu1 %v14789_v31 }
 0x369   : > { %10781 = vmatprep.mubr.msk.f32.mxu0 %vm12986_vm1, %v14788_v29 }
 0x36b   : > { %12101 = vmatpush3.bf16.msra.mxu0 %v13271_v36  ;;  %12152 = vmatpush3.bf16.msra.mxu1 %v13253_v12 }
 0x36c   : > { %12102 = vmatprep.subr.bf16.mxu0 %v14789_v31  ;;  %12153 = vmatprep.subr.bf16.mxu1 %v14789_v31 }
 0x36f   : > { %12104 = vmatpush3.bf16.msra.mxu0 %v13273_v48  ;;  %12155 = vmatpush3.bf16.msra.mxu1 %v13265_v17 }
 0x370   : > { %12105 = vmatprep.subr.bf16.mxu0 %v14789_v31  ;;  %12192 = vmatprep.subr.bf16.mxu1 %v14789_v31 }
 0x372   : > { %10858 = vmatmul.mubr.f32.vlgmr.msra.gmra.mrb[12].mxu1 %v2424_v42 }
 0x373   : > { %12107 = vmatpush3.bf16.msra.mxu0 %v13275_v51  ;;  %12194 = vmatpush3.bf16.msra.mxu1 %v13186_v62 }
 0x374   : > { %12108 = vmatprep.subr.bf16.mxu0 %v14789_v31  ;;  %12195 = vmatprep.subr.bf16.mxu1 %v14789_v31 }
 0x375   : > { %10942 = vmatprep.mubr.msk.f32.mxu1 %vm12986_vm1, %v14788_v29 }
 0x376   : > { %10782 = vmatmul.mubr.f32.vlgmr.msra.gmra.mrb[8].mxu0 %v2424_v42 }
 0x377   : > { %12110 = vmatpush3.bf16.msra.mxu0 %v13348_v47  ;;  %10800 = vmatprep.mubr.msk.f32.mxu0 %vm12986_vm1, %v14788_v29 }
 0x378   : > { %12111 = vmatprep.subr.bf16.mxu0 %v14789_v31  ;;  %12197 = vmatpush3.bf16.msra.mxu1 %v13241_v7 }
 0x379   : > { %12198 = vmatprep.subr.bf16.mxu1 %v14789_v31 }
 0x37b   : > { %12113 = vmatpush3.bf16.msra.mxu0 %v13277_v53 }
 0x37c   : > { %12114 = vmatprep.subr.bf16.mxu0 %v14789_v31  ;;  %12200 = vmatpush3.bf16.msra.mxu1 %v13253_v12 }
 0x37d   : > { %12201 = vmatprep.subr.bf16.mxu1 %v14789_v31 }
 0x37f   : > { %12116 = vmatpush3.bf16.msra.mxu0 %v13279_v54 }
 0x380   : > { %12117 = vmatprep.subr.bf16.mxu0 %v14789_v31  ;;  %12203 = vmatpush3.bf16.msra.mxu1 %v13265_v17 }
 0x381   : > { %12204 = vmatprep.subr.bf16.mxu1 %v14789_v31 }
 0x383   : > { %12119 = vmatpush3.bf16.msra.mxu0 %v13281_v55 }
 0x384   : > { %12132 = vmatprep.subr.bf16.mxu0 %v14789_v31 }
 0x386   : > { %10801 = vmatmul.mubr.f32.vlgmr.msra.gmra.mrb[10].mxu0 %v2425_v25 }
 0x387   : > { %12134 = vmatpush3.bf16.msra.mxu0 %v13370_v49  ;;  %10838 = vmatprep.mubr.msk.f32.mxu0 %vm12986_vm1, %v14788_v29 }
 0x388   : > { %12135 = vmatprep.subr.bf16.mxu0 %v14789_v31 }
 0x38b   : > { %12137 = vmatpush3.bf16.msra.mxu0 %v13283_v3 }
 0x38c   : > { %12138 = vmatprep.subr.bf16.mxu0 %v14789_v31 }
 0x38f   : > { %12140 = vmatpush3.bf16.msra.mxu0 %v13285_v4 }
 0x390   : > { %12141 = vmatprep.subr.bf16.mxu0 %v14789_v31 }
 0x393   : > { %12143 = vmatpush3.bf16.msra.mxu0 %v13287_v5 }
 0x394   : > { %12156 = vmatprep.subr.bf16.mxu0 %v14789_v31 }
 0x396   : > { %10839 = vmatmul.mubr.f32.vlgmr.msra.gmra.mrb[12].mxu0 %v2424_v42  ;;  %v13626_v42 = vadd.f32 %v13413_v40, %v13419_v41 }
 0x397   : > { %12158 = vmatpush3.bf16.msra.mxu0 %v13122_v27  ;;  %10868 = vmatprep.mubr.msk.f32.mxu0 %vm12986_vm1, %v14788_v29 }
 0x398   : > { %12159 = vmatprep.subr.bf16.mxu0 %v14789_v31  ;;  %14790 = vst [vmem:[#allocation23_spill] sm:$0xff] %v13626_v42 }
 0x39b   : > { %12161 = vmatpush3.bf16.msra.mxu0 %v13138_v35 }
 0x39c   : > { %12162 = vmatprep.subr.bf16.mxu0 %v14789_v31 }
 0x435   : > { %v2710_v6 = vpop.f32.mrb[10].mxu1 }
 0x436   : > { %v10821_v19 = vpop.f32.mrb[11].mxu1 }
 0x439   : > { %v2430_v18 = vpop.f32.mrb[6].mxu0 }
 0x43a   : > { %v10764_v15 = vpop.f32.mrb[7].mxu0 }
 0x445   : > { %v2884_v50 = vpop.f32.mrb[12].mxu1 }
 0x446   : > { %v10859_v9 = vpop.f32.mrb[13].mxu1 }
 0x449   : > { %v2541_v8 = vpop.f32.mrb[8].mxu0 }
 0x44a   : > { %v2542_v39 = vadd.f32 %v2541_v8, %v2430_v18  ;;  %v10783_v37 = vpop.f32.mrb[9].mxu0 }
 0x459   : > { %v2629_v34 = vpop.f32.mrb[10].mxu0 }
 0x45a   : > { %v2630_v60 = vadd.f32 %v2629_v34, %v2542_v39  ;;  %v10802_v21 = vpop.f32.mrb[11].mxu0 }
 0x45c   : > { %v2711_v45 = vadd.f32 %v2710_v6, %v2630_v60 }
 0x469   : > { %v2805_v59 = vpop.f32.mrb[12].mxu0 }
 0x46a   : > { %v2806_v46 = vadd.f32 %v2805_v59, %v2711_v45  ;;  %v10840_v20 = vpop.f32.mrb[13].mxu0 }
 0x46c   : > { %v2885_v43 = vadd.f32 %v2884_v50, %v2806_v46 }
 0x46e   : > { %v2888_v25 = vadd.f32 %v2885_v43, %v13426_v58 }
 0x470   : > { %v2889_v28 = vadd.f32 %v13407_v52, %v2888_v25 }
 0x472   : > { %v13634_v24 = vadd.f32 %v2889_v28, %v13626_v42  ;;  %v13637_v19 = vsub.f32 %v2889_v28, %v13630_v14 }
 0x474   : > { %v2974_v6 = vsel %vm722_vm2, %v13637_v19, 0  ;;  %2895 = vrot.lane.b32.xlu0 %v13634_v24, %s12992_s18  ;;  %v2952_v40 = vsub.f32 0.5, %v13634_v24  ;;  %v9787_v41 = vadd.f32 0.7, %v13634_v24  ;;  %v9785_v15 = vadd.f32 -0.5, %v13634_v24 }
 0x475   : > { %v3045_v58 = vand.u32 4294901760, %v2974_v6  ;;  %v9788_v9 = vadd.f32 -0.6, %v13634_v24  ;;  %v2893_v43 = vsub.f32 %v13531_v13, %v13634_v24  ;;  %v1798_v13 = vmul.f32 0.125, %v13553_v33 }
 0x476   : > { %v2953_v18 = vmax.f32 %v2952_v40, 0.0  ;;  %v2929_v50 = vand.u32 2147483647, %v9787_v41  ;;  %v13650_v37 = vmul.f32 %v9785_v15, %v9785_v15 }
 0x477   : > { %v3046_v8 = vsub.f32 %v2974_v6, %v3045_v58  ;;  %v2933_v60 = vand.u32 2147483647, %v9788_v9  ;;  %v2903_v25 = vmul.f32 0.3, %v2893_v43 }
 0x478   : > { %2899 = vrot.lane.b32.xlu0 %v13634_v24, %s12991_s21  ;;  %2957 = vrot.lane.b32.xlu1 %v2953_v18, %s12991_s21  ;;  %v13652_v34 = vsub.f32 0.3, %v2929_v50 }
 0x479   : > { %v3047_v39 = vand.u32 4294901760, %v3046_v8  ;;  %v2934_v46 = vsub.f32 0.6, %v2933_v60  ;;  %v2904_v6 = vadd.f32 %v2903_v25, %v2893_v43  ;;  %v9780_v43 = vadd.f32 -0.64, %v13555_v38 }
 0x47a   : > { %v14751_v59 = vmax.f32 %v13652_v34, 0.0 }
 0x47b   : > { %v3048_v21 = vsub.f32 %v3046_v8, %v3047_v39  ;;  %v2935_v20 = vmax.f32 %v2934_v46, 0.0  ;;  %v2907_v50 = vand.u32 2147483647, %v2904_v6 }
 0x47c   : > { %2921 = vrot.lane.b32.xlu1 %v13650_v37, %s12991_s21  ;;  %2917 = vrot.lane.b32.xlu0 %v13650_v37, %s12992_s18 }
 0x47d   : > { %v3049_v45 = vand.u32 4294901760, %v3048_v21 }
 0x47f   : > { %10869 = vmatmul.mubr.f32.vlgmr.msra.gmra.mrb[14].mxu0 %v3049_v45 }
 0x480   : > { %12164 = vmatpush3.bf16.msra.mxu0 %v13160_v56  ;;  %2937 = vrot.lane.b32.xlu1 %v14751_v59, %s12992_s18 }
 0x481   : > { %12165 = vmatprep.subr.bf16.mxu0 %v14789_v31  ;;  %10879 = vmatprep.mubr.msk.f32.mxu0 %vm12986_vm1, %v14788_v29 }
 0x484   : > { %12167 = vmatpush3.bf16.msra.mxu0 %v13164_v57  ;;  %2942 = vrot.lane.b32.xlu1 %v2935_v20, %s12991_s21 }
 0x485   : > { %12168 = vmatprep.subr.bf16.mxu0 %v14789_v31 }
 0x487   : > { %10880 = vmatmul.mubr.f32.vlgmr.msra.gmra.mrb[14].mxu0 %v3045_v58 }
 0x488   : > { %12170 = vmatpush3.bf16.msra.mxu0 %v13191_v63  ;;  %10890 = vmatprep.mubr.msk.f32.mxu0 %vm12986_vm1, %v14788_v29 }
 0x489   : > { %12171 = vmatprep.subr.bf16.mxu0 %v14789_v31 }
 0x48c   : > { %12173 = vmatpush3.bf16.msra.mxu0 %v13200_v0 }
 0x48d   : > { %12174 = vmatprep.subr.bf16.mxu0 %v14789_v31 }
 0x48f   : > { %10891 = vmatmul.mubr.f32.vlgmr.msra.gmra.mrb[14].mxu0 %v3046_v8 }
 0x490   : > { %12176 = vmatpush3.bf16.msra.mxu0 %v13122_v27  ;;  %10901 = vmatprep.mubr.msk.f32.mxu0 %vm12986_vm1, %v14788_v29 }
 0x491   : > { %12177 = vmatprep.subr.bf16.mxu0 %v14789_v31 }
 0x494   : > { %12179 = vmatpush3.bf16.msra.mxu0 %v13138_v35 }
 0x495   : > { %12180 = vmatprep.subr.bf16.mxu0 %v14789_v31 }
 0x497   : > { %10902 = vmatmul.mubr.f32.vlgmr.msra.gmra.mrb[14].mxu0 %v3047_v39 }
 0x498   : > { %12182 = vmatpush3.bf16.msra.mxu0 %v13212_v1  ;;  %10912 = vmatprep.mubr.msk.f32.mxu0 %vm12986_vm1, %v14788_v29 }
 0x499   : > { %12183 = vmatprep.subr.bf16.mxu0 %v14789_v31 }
 0x49c   : > { %12185 = vmatpush3.bf16.msra.mxu0 %v13216_v2  ;;  %v1812_v2 = vmax.f32 %v9780_v43, 0.0 }
 0x49d   : > { %12186 = vmatprep.subr.bf16.mxu0 %v14789_v31 }
 0x49f   : > { %10913 = vmatmul.mubr.f32.vlgmr.msra.gmra.mrb[14].mxu0 %v3045_v58 }
 0x4a0   : > { %12188 = vmatpush3.bf16.msra.mxu0 %v13122_v27  ;;  %10923 = vmatprep.mubr.msk.f32.mxu0 %vm12986_vm1, %v14788_v29 }
 0x4a1   : > { %12189 = vmatprep.subr.bf16.mxu0 %v14789_v31 }
 0x4a4   : > { %12191 = vmatpush3.bf16.msra.mxu0 %v13138_v35 }
 0x4a5   : > { %12228 = vmatprep.subr.bf16.mxu0 %v14789_v31 }
 0x4a7   : > { %10924 = vmatmul.mubr.f32.vlgmr.msra.gmra.mrb[14].mxu0 %v3045_v58  ;;  %v9789_v58 = vadd.f32 -0.7, %v13634_v24 }
 0x4a8   : > { %12230 = vmatpush3.bf16.msra.mxu0 %v13186_v62  ;;  %10999 = vmatprep.mubr.msk.f32.mxu0 %vm12986_vm1, %v14788_v29 }
 0x4a9   : > { %12231 = vmatprep.subr.bf16.mxu0 %v14789_v31  ;;  %v2947_v21 = vand.u32 2147483647, %v9789_v58 }
 0x4ac   : > { %12233 = vmatpush3.bf16.msra.mxu0 %v13241_v7 }
 0x4ad   : > { %12234 = vmatprep.subr.bf16.mxu0 %v14789_v31 }
 0x4b0   : > { %12236 = vmatpush3.bf16.msra.mxu0 %v13253_v12 }
 0x4b1   : > { %12237 = vmatprep.subr.bf16.mxu0 %v14789_v31 }
 0x4b4   : > { %12239 = vmatpush3.bf16.msra.mxu0 %v13265_v17 }
 0x4b5   : > { %12252 = vmatprep.subr.bf16.mxu0 %v14789_v31 }
 0x4e6   : > { %v2896_v28 = vpop.permute.xlu0 %2895 }
 0x4e7   : > { %v2898_v40 = vsub.f32 %v13547_v44, %v2896_v28  ;;  %v2948_v44 = vsub.f32 0.3, %v2947_v21 }
 0x4e9   : > { %v2905_v41 = vadd.f32 %v2903_v25, %v2898_v40  ;;  %v2949_v58 = vmax.f32 %v2948_v44, 0.0  ;;  %v593_v44 = vmul.f32 %v13304_v11, %v13492_v32 }
 0x4ea   : > { %v2958_v18 = vpop.permute.xlu1 %2957  ;;  %v2900_v15 = vpop.permute.xlu0 %2899 }
 0x4eb   : > { %v2908_v9 = vand.u32 2147483647, %v2905_v41  ;;  %v2902_v8 = vsub.f32 %v13542_v22, %v2900_v15 }
 0x4ed   : > { %v2909_v39 = vadd.f32 %v2908_v9, %v2907_v50  ;;  %v2906_v60 = vadd.f32 %v2903_v25, %v2902_v8  ;;  %v14791_v50 = vmax.f32 %v13652_v34, 0.0  ;;  %v14793_v34 = vld [vmem:[#allocation8_spill] sm:$0xff] }
 0x4ee   : > { %v2922_v45 = vpop.permute.xlu1 %2921  ;;  %v2918_v46 = vpop.permute.xlu0 %2917 }
 0x4ef   : > { %v2910_v20 = vand.u32 2147483647, %v2906_v60  ;;  %v2920_v59 = vadd.f32 %v2918_v46, %v13650_v37  ;;  %v599_v46 = vmul.f32 %v13311_v16, %v14793_v34  ;;  %v13786_v34 = vadd.f32 %v13630_v14, %v13626_v42 }
 0x4f1   : > { %v2911_v28 = vadd.f32 %v2910_v20, %v2909_v39  ;;  %v2924_v40 = vadd.f32 %v2922_v45, %v2920_v59  ;;  %14794 = vst [vmem:[#allocation8_spill] sm:$0xff] %v13786_v34 }
 0x4f2   : > { %v2938_v24 = vpop.permute.xlu1 %2937 }
 0x4f3   : > { %v2912_v6 = vmul.f32 0.25, %v2911_v28  ;;  %v9786_v41 = vadd.f32 -0.64, %v2924_v40  ;;  %v2940_v9 = vmin.f32 %v14791_v50, %v2938_v24  ;;  %v2950_v37 = vmin.f32 %v2949_v58, %v2938_v24 }
 0x4f5   : > { %v13711_v15 = vadd.f32 %v2912_v6, %v1798_v13  ;;  %v2926_v25 = vmax.f32 %v9786_v41, 0.0  ;;  %v588_v13 = vmul.f32 %v13299_v10, %v13485_v30 }
 0x4f6   : > { %v2943_v8 = vpop.permute.xlu1 %2942 }
 0x4f7   : > { %v2945_v60 = vmin.f32 %v2940_v9, %v2943_v8  ;;  %v13715_v38 = vadd.f32 %v2926_v25, %v1812_v2  ;;  %v2951_v59 = vmin.f32 %v2950_v37, %v2943_v8  ;;  %v594_v45 = vadd.f32 %v593_v44, %v588_v13 }
 0x4f9   : > { %14792 = vst [vmem:[#allocation24_spill] sm:$0xff] %v13715_v38  ;;  %v2954_v39 = vadd.f32 %v2945_v60, %v13559_v26  ;;  %v600_v20 = vadd.f32 %v599_v46, %v594_v45 }
 0x4fb   : > { %v2955_v21 = vadd.f32 %v2954_v39, %v2951_v59  ;;  %v601_v2 = vsub.f32 %v13317_v23, %v600_v20  ;;  %v13790_v20 = vld [vmem:[%s13416_s22 + $0x10] sm:$0xff] }
 0x4fd   : > { %v13718_v33 = vadd.f32 %v2958_v18, %v2955_v21 }
 0x57a   : > { %v3457_v43 = vpop.f32.mrb[14].mxu0 }
 0x57b   : > { %v12806_v28 = vadd.f32 %v3457_v43, %v601_v2  ;;  %v10925_v40 = vpop.f32.mrb[15].mxu0 }
 0x57d   : > { %v3461_v26 = vmax.f32 %v12806_v28, 0.0 }
 0x57f   : > { %v3463_v18 = vsel %vm1215_vm3, %v3461_v26, 0 }
 0x580   : > { %v3538_v24 = vand.u32 4294901760, %v3463_v18 }
 0x582   : > { %v3539_v6 = vsub.f32 %v3463_v18, %v3538_v24 }
 0x584   : > { %v3540_v41 = vand.u32 4294901760, %v3539_v6 }
 0x586   : > { %11000 = vmatmul.mubr.f32.vlgmr.msra.gmra.mrb[16].mxu0 %v3540_v41  ;;  %v3541_v10 = vsub.f32 %v3539_v6, %v3540_v41 }
 0x587   : > { %12254 = vmatpush3.bf16.msra.mxu0 %v13186_v62  ;;  %11037 = vmatprep.mubr.msk.f32.mxu0 %vm12986_vm1, %v14788_v29 }
 0x588   : > { %12255 = vmatprep.subr.bf16.mxu0 %v14789_v31  ;;  %v3542_v11 = vand.u32 4294901760, %v3541_v10 }
 0x58a   : > { %10943 = vmatmul.mubr.f32.vlgmr.msra.gmra.mrb[14].mxu1 %v3542_v11 }
 0x58b   : > { %12206 = vmatpush3.bf16.msra.mxu1 %v13328_v61  ;;  %12257 = vmatpush3.bf16.msra.mxu0 %v13241_v7 }
 0x58c   : > { %12207 = vmatprep.subr.bf16.mxu1 %v14789_v31  ;;  %12258 = vmatprep.subr.bf16.mxu0 %v14789_v31 }
 0x58d   : > { %10961 = vmatprep.mubr.msk.f32.mxu1 %vm12986_vm1, %v14788_v29 }
 0x58f   : > { %12209 = vmatpush3.bf16.msra.mxu1 %v13271_v36  ;;  %12260 = vmatpush3.bf16.msra.mxu0 %v13253_v12 }
 0x590   : > { %12210 = vmatprep.subr.bf16.mxu1 %v14789_v31  ;;  %12261 = vmatprep.subr.bf16.mxu0 %v14789_v31 }
 0x593   : > { %12212 = vmatpush3.bf16.msra.mxu1 %v13273_v48  ;;  %12263 = vmatpush3.bf16.msra.mxu0 %v13265_v17 }
 0x594   : > { %12213 = vmatprep.subr.bf16.mxu1 %v14789_v31  ;;  %12300 = vmatprep.subr.bf16.mxu0 %v14789_v31 }
 0x596   : > { %11038 = vmatmul.mubr.f32.vlgmr.msra.gmra.mrb[18].mxu0 %v3538_v24 }
 0x597   : > { %12215 = vmatpush3.bf16.msra.mxu1 %v13275_v51  ;;  %12302 = vmatpush3.bf16.msra.mxu0 %v13186_v62 }
 0x598   : > { %12216 = vmatprep.subr.bf16.mxu1 %v14789_v31  ;;  %12303 = vmatprep.subr.bf16.mxu0 %v14789_v31 }
 0x599   : > { %11122 = vmatprep.mubr.msk.f32.mxu0 %vm12986_vm1, %v14788_v29 }
 0x59a   : > { %10962 = vmatmul.mubr.f32.vlgmr.msra.gmra.mrb[16].mxu1 %v3538_v24 }
 0x59b   : > { %12218 = vmatpush3.bf16.msra.mxu1 %v13348_v47  ;;  %10980 = vmatprep.mubr.msk.f32.mxu1 %vm12986_vm1, %v14788_v29 }
 0x59c   : > { %12219 = vmatprep.subr.bf16.mxu1 %v14789_v31  ;;  %12305 = vmatpush3.bf16.msra.mxu0 %v13241_v7 }
 0x59d   : > { %12306 = vmatprep.subr.bf16.mxu0 %v14789_v31 }
 0x59f   : > { %12221 = vmatpush3.bf16.msra.mxu1 %v13277_v53 }
 0x5a0   : > { %12222 = vmatprep.subr.bf16.mxu1 %v14789_v31  ;;  %12308 = vmatpush3.bf16.msra.mxu0 %v13253_v12 }
 0x5a1   : > { %12309 = vmatprep.subr.bf16.mxu0 %v14789_v31 }
 0x5a3   : > { %12224 = vmatpush3.bf16.msra.mxu1 %v13279_v54 }
 0x5a4   : > { %12225 = vmatprep.subr.bf16.mxu1 %v14789_v31  ;;  %12311 = vmatpush3.bf16.msra.mxu0 %v13265_v17 }
 0x5a5   : > { %12312 = vmatprep.subr.bf16.mxu0 %v14789_v31 }
 0x5a7   : > { %12227 = vmatpush3.bf16.msra.mxu1 %v13281_v55 }
 0x5a8   : > { %12240 = vmatprep.subr.bf16.mxu1 %v14789_v31 }
 0x5aa   : > { %10981 = vmatmul.mubr.f32.vlgmr.msra.gmra.mrb[18].mxu1 %v3539_v6 }
 0x5ab   : > { %12242 = vmatpush3.bf16.msra.mxu1 %v13370_v49  ;;  %11018 = vmatprep.mubr.msk.f32.mxu1 %vm12986_vm1, %v14788_v29 }
 0x5ac   : > { %12243 = vmatprep.subr.bf16.mxu1 %v14789_v31 }
 0x5af   : > { %12245 = vmatpush3.bf16.msra.mxu1 %v13283_v3 }
 0x5b0   : > { %12246 = vmatprep.subr.bf16.mxu1 %v14789_v31 }
 0x5b3   : > { %12248 = vmatpush3.bf16.msra.mxu1 %v13285_v4 }
 0x5b4   : > { %12249 = vmatprep.subr.bf16.mxu1 %v14789_v31 }
 0x5b7   : > { %12251 = vmatpush3.bf16.msra.mxu1 %v13287_v5 }
 0x5b8   : > { %12264 = vmatprep.subr.bf16.mxu1 %v14789_v31 }
 0x5ba   : > { %11019 = vmatmul.mubr.f32.vlgmr.msra.gmra.mrb[20].mxu1 %v3538_v24 }
 0x5bb   : > { %12266 = vmatpush3.bf16.msra.mxu1 %v13122_v27  ;;  %11048 = vmatprep.mubr.msk.f32.mxu1 %vm12986_vm1, %v14788_v29 }
 0x5bc   : > { %12267 = vmatprep.subr.bf16.mxu1 %v14789_v31 }
 0x5bf   : > { %12269 = vmatpush3.bf16.msra.mxu1 %v13138_v35 }
 0x5c0   : > { %12270 = vmatprep.subr.bf16.mxu1 %v14789_v31 }
 0x659   : > { %v3824_v16 = vpop.f32.mrb[16].mxu0 }
 0x65a   : > { %v11001_v23 = vpop.f32.mrb[17].mxu0 }
 0x65d   : > { %v3544_v30 = vpop.f32.mrb[14].mxu1 }
 0x65e   : > { %v10944_v32 = vpop.f32.mrb[15].mxu1 }
 0x669   : > { %v3998_v25 = vpop.f32.mrb[18].mxu0 }
 0x66a   : > { %v11039_v58 = vpop.f32.mrb[19].mxu0 }
 0x66d   : > { %v3655_v50 = vpop.f32.mrb[16].mxu1 }
 0x66e   : > { %v3656_v9 = vadd.f32 %v3655_v50, %v3544_v30  ;;  %v10963_v8 = vpop.f32.mrb[17].mxu1 }
 0x66f   : > { %v14797_v8 = vld [vmem:[#allocation19_spill] sm:$0xff] }
 0x67d   : > { %v3743_v37 = vpop.f32.mrb[18].mxu1 }
 0x67e   : > { %v3744_v60 = vadd.f32 %v3743_v37, %v3656_v9  ;;  %v10982_v59 = vpop.f32.mrb[19].mxu1  ;;  %v14796_v9 = vld [vmem:[#allocation4_spill] sm:$0xff] }
 0x680   : > { %v3825_v39 = vadd.f32 %v3824_v16, %v3744_v60 }
 0x68d   : > { %v3919_v21 = vpop.f32.mrb[20].mxu1 }
 0x68e   : > { %v3920_v13 = vadd.f32 %v3919_v21, %v3825_v39  ;;  %v11020_v44 = vpop.f32.mrb[21].mxu1  ;;  %v14798_v21 = vld [vmem:[#allocation22_spill] sm:$0xff] }
 0x690   : > { %v3999_v45 = vadd.f32 %v3998_v25, %v3920_v13 }
 0x692   : > { %v4002_v46 = vadd.f32 %v3999_v45, %v13637_v19 }
 0x694   : > { %v4003_v2 = vadd.f32 %v13407_v52, %v4002_v46 }
 0x696   : > { %v13794_v43 = vadd.f32 %v4003_v2, %v13786_v34  ;;  %v13797_v28 = vsub.f32 %v4003_v2, %v13790_v20 }
 0x698   : > { %v4088_v40 = vsel %vm722_vm2, %v13797_v28, 0  ;;  %4013 = vrot.lane.b32.xlu0 %v13794_v43, %s12991_s21  ;;  %4009 = vrot.lane.b32.xlu1 %v13794_v43, %s12992_s18  ;;  %v4066_v14 = vsub.f32 0.5, %v13794_v43  ;;  %v9791_v52 = vadd.f32 -0.5, %v13794_v43  ;;  %v9793_v18 = vadd.f32 0.7, %v13794_v43 }
 0x699   : > { %v4159_v19 = vand.u32 4294901760, %v4088_v40  ;;  %v9794_v11 = vadd.f32 -0.6, %v13794_v43  ;;  %v4007_v37 = vsub.f32 %v14797_v8, %v13794_v43 }
 0x69a   : > { %v4067_v26 = vmax.f32 %v4066_v14, 0.0  ;;  %v13809_v41 = vmul.f32 %v9791_v52, %v9791_v52  ;;  %v4043_v10 = vand.u32 2147483647, %v9793_v18  ;;  %v9795_v18 = vadd.f32 -0.7, %v13794_v43 }
 0x69b   : > { %v4160_v24 = vsub.f32 %v4088_v40, %v4159_v19  ;;  %v4047_v32 = vand.u32 2147483647, %v9794_v11  ;;  %v4017_v60 = vmul.f32 0.3, %v4007_v37 }
 0x69c   : > { %4071 = vrot.lane.b32.xlu0 %v4067_v26, %s12991_s21  ;;  %14795 = vst [vmem:[#allocation25_spill] sm:$0xff] %v13809_v41  ;;  %v13814_v30 = vsub.f32 0.3, %v4043_v10  ;;  %v4061_v11 = vand.u32 2147483647, %v9795_v18 }
 0x69d   : > { %v4161_v6 = vand.u32 4294901760, %v4160_v24  ;;  %v4048_v58 = vsub.f32 0.6, %v4047_v32  ;;  %v4018_v44 = vadd.f32 %v4017_v60, %v4007_v37 }
 0x69e   : > { %v4045_v25 = vmax.f32 %v13814_v30, 0.0  ;;  %v13892_v30 = vld [vmem:[%s14741_s6 + $0x1] ss:$0 sm:$0xff] }
 0x69f   : > { %v4162_v16 = vsub.f32 %v4160_v24, %v4161_v6  ;;  %v4049_v50 = vmax.f32 %v4048_v58, 0.0  ;;  %v4021_v14 = vand.u32 2147483647, %v4018_v44 }
 0x6a0   : > { %4031 = vrot.lane.b32.xlu0 %v13809_v41, %s12992_s18 }
 0x6a1   : > { %v4163_v23 = vand.u32 4294901760, %v4162_v16 }
 0x6a3   : > { %11049 = vmatmul.mubr.f32.vlgmr.msra.gmra.mrb[22].mxu1 %v4163_v23 }
 0x6a4   : > { %12272 = vmatpush3.bf16.msra.mxu1 %v13160_v56  ;;  %4035 = vrot.lane.b32.xlu0 %v13809_v41, %s12991_s21 }
 0x6a5   : > { %12273 = vmatprep.subr.bf16.mxu1 %v14789_v31  ;;  %11059 = vmatprep.mubr.msk.f32.mxu1 %vm12986_vm1, %v14788_v29 }
 0x6a8   : > { %12275 = vmatpush3.bf16.msra.mxu1 %v13164_v57  ;;  %4051 = vrot.lane.b32.xlu0 %v4045_v25, %s12992_s18 }
 0x6a9   : > { %12276 = vmatprep.subr.bf16.mxu1 %v14789_v31 }
 0x6ab   : > { %11060 = vmatmul.mubr.f32.vlgmr.msra.gmra.mrb[22].mxu1 %v4159_v19 }
 0x6ac   : > { %12278 = vmatpush3.bf16.msra.mxu1 %v13191_v63  ;;  %4056 = vrot.lane.b32.xlu0 %v4049_v50, %s12991_s21 }
 0x6ad   : > { %12279 = vmatprep.subr.bf16.mxu1 %v14789_v31  ;;  %11070 = vmatprep.mubr.msk.f32.mxu1 %vm12986_vm1, %v14788_v29 }
 0x6b0   : > { %12281 = vmatpush3.bf16.msra.mxu1 %v13200_v0 }
 0x6b1   : > { %12282 = vmatprep.subr.bf16.mxu1 %v14789_v31 }
 0x6b3   : > { %11071 = vmatmul.mubr.f32.vlgmr.msra.gmra.mrb[22].mxu1 %v4160_v24 }
 0x6b4   : > { %12284 = vmatpush3.bf16.msra.mxu1 %v13122_v27  ;;  %11081 = vmatprep.mubr.msk.f32.mxu1 %vm12986_vm1, %v14788_v29 }
 0x6b5   : > { %12285 = vmatprep.subr.bf16.mxu1 %v14789_v31 }
 0x6b8   : > { %12287 = vmatpush3.bf16.msra.mxu1 %v13138_v35 }
 0x6b9   : > { %12288 = vmatprep.subr.bf16.mxu1 %v14789_v31 }
 0x6bb   : > { %11082 = vmatmul.mubr.f32.vlgmr.msra.gmra.mrb[22].mxu1 %v4161_v6 }
 0x6bc   : > { %12290 = vmatpush3.bf16.msra.mxu1 %v13212_v1  ;;  %11092 = vmatprep.mubr.msk.f32.mxu1 %vm12986_vm1, %v14788_v29 }
 0x6bd   : > { %12291 = vmatprep.subr.bf16.mxu1 %v14789_v31 }
 0x6c0   : > { %12293 = vmatpush3.bf16.msra.mxu1 %v14796_v9 }
 0x6c1   : > { %12294 = vmatprep.subr.bf16.mxu1 %v14789_v31 }
 0x6c3   : > { %11093 = vmatmul.mubr.f32.vlgmr.msra.gmra.mrb[22].mxu1 %v4159_v19 }
 0x6c4   : > { %12296 = vmatpush3.bf16.msra.mxu1 %v13122_v27  ;;  %11103 = vmatprep.mubr.msk.f32.mxu1 %vm12986_vm1, %v14788_v29 }
 0x6c5   : > { %12297 = vmatprep.subr.bf16.mxu1 %v14789_v31 }
 0x6c8   : > { %12299 = vmatpush3.bf16.msra.mxu1 %v13138_v35 }
 0x6c9   : > { %12336 = vmatprep.subr.bf16.mxu1 %v14789_v31 }
 0x6cb   : > { %11104 = vmatmul.mubr.f32.vlgmr.msra.gmra.mrb[22].mxu1 %v4159_v19 }
 0x6cc   : > { %12338 = vmatpush3.bf16.msra.mxu1 %v13186_v62  ;;  %11179 = vmatprep.mubr.msk.f32.mxu1 %vm12986_vm1, %v14788_v29 }
 0x6cd   : > { %12339 = vmatprep.subr.bf16.mxu1 %v14789_v31 }
 0x6d0   : > { %12341 = vmatpush3.bf16.msra.mxu1 %v13241_v7 }
 0x6d1   : > { %12342 = vmatprep.subr.bf16.mxu1 %v14789_v31 }
 0x6d4   : > { %12344 = vmatpush3.bf16.msra.mxu1 %v13253_v12 }
 0x6d5   : > { %12345 = vmatprep.subr.bf16.mxu1 %v14789_v31 }
 0x6d8   : > { %12347 = vmatpush3.bf16.msra.mxu1 %v13265_v17 }
 0x6d9   : > { %12360 = vmatprep.subr.bf16.mxu1 %v14789_v31 }
 0x70a   : > { %v4010_v59 = vpop.permute.xlu1 %4009  ;;  %v4014_v39 = vpop.permute.xlu0 %4013 }
 0x70b   : > { %v4012_v13 = vsub.f32 %v14798_v21, %v4010_v59  ;;  %v4016_v45 = vsub.f32 %v13542_v22, %v4014_v39  ;;  %v4062_v22 = vsub.f32 0.3, %v4061_v11  ;;  %v13885_v21 = vld [vmem:[%s14741_s6] ss:$0 sm:$0xff] }
 0x70d   : > { %v4019_v46 = vadd.f32 %v4017_v60, %v4012_v13  ;;  %v4020_v2 = vadd.f32 %v4017_v60, %v4016_v45  ;;  %v4063_v58 = vmax.f32 %v4062_v22, 0.0  ;;  %v14803_v45 = vld [vmem:[#allocation6_spill] sm:$0xff] }
 0x70e   : > { %v13867_v40 = vpop.permute.xlu0 %4071 }
 0x70f   : > { %v4022_v19 = vand.u32 2147483647, %v4019_v46  ;;  %v4024_v52 = vand.u32 2147483647, %v4020_v2 }
 0x711   : > { %v4023_v26 = vadd.f32 %v4022_v19, %v4021_v14  ;;  %v13906_v19 = vld [vmem:[%s14742_s7] ss:$0 sm:$0xff] }
 0x712   : > { %v13870_v24 = vpop.permute.xlu0 %4031 }
 0x713   : > { %14799 = vst [vmem:[#allocation4_spill] sm:$0xff] %v13870_v24  ;;  %v4025_v6 = vadd.f32 %v4024_v52, %v4023_v26 }
 0x715   : > { %v4026_v10 = vmul.f32 0.375, %v4025_v6 }
 0x716   : > { %v13872_v16 = vpop.permute.xlu0 %4035 }
 0x717   : > { %14800 = vst [vmem:[#allocation19_spill] sm:$0xff] %v13872_v16  ;;  %v13875_v23 = vadd.f32 %v4026_v10, %v13711_v15  ;;  %v14801_v15 = vld [vmem:[#allocation5_spill] sm:$0xff] }
 0x718   : > { %v609_v13 = vmul.f32 %v13885_v21, %v14801_v15 }
 0x71a   : > { %v4052_v32 = vpop.permute.xlu0 %4051 }
 0x71b   : > { %v4054_v50 = vmin.f32 %v4045_v25, %v4052_v32  ;;  %v4064_v37 = vmin.f32 %v4063_v58, %v4052_v32  ;;  %v14802_v25 = vld [vmem:[#allocation10_spill] sm:$0xff] }
 0x71c   : > { %v614_v44 = vmul.f32 %v13892_v30, %v14802_v25 }
 0x71e   : > { %v4057_v8 = vpop.permute.xlu0 %4056  ;;  %v615_v2 = vadd.f32 %v614_v44, %v609_v13 }
 0x71f   : > { %v4059_v60 = vmin.f32 %v4054_v50, %v4057_v8  ;;  %v4065_v43 = vmin.f32 %v4064_v37, %v4057_v8 }
 0x721   : > { %v4068_v59 = vadd.f32 %v4059_v60, %v13718_v33  ;;  %v13899_v33 = vld [vmem:[%s14741_s6 + $0x2] ss:$0 sm:$0xff] }
 0x722   : > { %v620_v46 = vmul.f32 %v13899_v33, %v14803_v45 }
 0x723   : > { %v13880_v39 = vadd.f32 %v4068_v59, %v4065_v43 }
 0x724   : > { %v621_v14 = vadd.f32 %v620_v46, %v615_v2 }
 0x726   : > { %v622_v26 = vsub.f32 %v13906_v19, %v621_v14 }
 0x79e   : > { %v4571_v52 = vpop.f32.mrb[22].mxu1 }
 0x79f   : > { %v12807_v18 = vadd.f32 %v4571_v52, %v622_v26  ;;  %v11105_v6 = vpop.f32.mrb[23].mxu1 }
 0x7a1   : > { %v4575_v10 = vmax.f32 %v12807_v18, 0.0 }
 0x7a3   : > { %v4577_v11 = vsel %vm1215_vm3, %v4575_v10, 0 }
 0x7a4   : > { %v4652_v22 = vand.u32 4294901760, %v4577_v11 }
 0x7a6   : > { %v4653_v32 = vsub.f32 %v4577_v11, %v4652_v22  ;;  %v13968_v11 = vadd.f32 %v13790_v20, %v13786_v34 }
 0x7a8   : > { %v4654_v58 = vand.u32 4294901760, %v4653_v32  ;;  %14804 = vst [vmem:[#allocation22_spill] sm:$0xff] %v13968_v11 }
 0x7aa   : > { %11180 = vmatmul.mubr.f32.vlgmr.msra.gmra.mrb[24].mxu1 %v4654_v58  ;;  %v4655_v50 = vsub.f32 %v4653_v32, %v4654_v58  ;;  %v13977_v58 = vld [vmem:[%s14744_s9] ss:$0 sm:$0xff] }
 0x7ab   : > { %12362 = vmatpush3.bf16.msra.mxu1 %v13186_v62  ;;  %11217 = vmatprep.mubr.msk.f32.mxu1 %vm12986_vm1, %v14788_v29 }
 0x7ac   : > { %12363 = vmatprep.subr.bf16.mxu1 %v14789_v31  ;;  %v4656_v8 = vand.u32 4294901760, %v4655_v50 }
 0x7ae   : > { %11123 = vmatmul.mubr.f32.vlgmr.msra.gmra.mrb[20].mxu0 %v4656_v8 }
 0x7af   : > { %12314 = vmatpush3.bf16.msra.mxu0 %v13328_v61  ;;  %12365 = vmatpush3.bf16.msra.mxu1 %v13241_v7 }
 0x7b0   : > { %12315 = vmatprep.subr.bf16.mxu0 %v14789_v31  ;;  %12366 = vmatprep.subr.bf16.mxu1 %v14789_v31 }
 0x7b1   : > { %11141 = vmatprep.mubr.msk.f32.mxu0 %vm12986_vm1, %v14788_v29 }
 0x7b3   : > { %12317 = vmatpush3.bf16.msra.mxu0 %v13271_v36  ;;  %12368 = vmatpush3.bf16.msra.mxu1 %v13253_v12 }
 0x7b4   : > { %12318 = vmatprep.subr.bf16.mxu0 %v14789_v31  ;;  %12369 = vmatprep.subr.bf16.mxu1 %v14789_v31 }
 0x7b7   : > { %12320 = vmatpush3.bf16.msra.mxu0 %v13273_v48  ;;  %12371 = vmatpush3.bf16.msra.mxu1 %v13265_v17 }
 0x7b8   : > { %12321 = vmatprep.subr.bf16.mxu0 %v14789_v31  ;;  %12408 = vmatprep.subr.bf16.mxu1 %v14789_v31 }
 0x7ba   : > { %11218 = vmatmul.mubr.f32.vlgmr.msra.gmra.mrb[26].mxu1 %v4652_v22 }
 0x7bb   : > { %12323 = vmatpush3.bf16.msra.mxu0 %v13275_v51  ;;  %12410 = vmatpush3.bf16.msra.mxu1 %v13186_v62 }
 0x7bc   : > { %12324 = vmatprep.subr.bf16.mxu0 %v14789_v31  ;;  %12411 = vmatprep.subr.bf16.mxu1 %v14789_v31 }
 0x7bd   : > { %11302 = vmatprep.mubr.msk.f32.mxu1 %vm12986_vm1, %v14788_v29 }
 0x7be   : > { %11142 = vmatmul.mubr.f32.vlgmr.msra.gmra.mrb[22].mxu0 %v4652_v22 }
 0x7bf   : > { %12326 = vmatpush3.bf16.msra.mxu0 %v13348_v47  ;;  %11160 = vmatprep.mubr.msk.f32.mxu0 %vm12986_vm1, %v14788_v29 }
 0x7c0   : > { %12327 = vmatprep.subr.bf16.mxu0 %v14789_v31  ;;  %12413 = vmatpush3.bf16.msra.mxu1 %v13241_v7 }
 0x7c1   : > { %12414 = vmatprep.subr.bf16.mxu1 %v14789_v31 }
 0x7c3   : > { %12329 = vmatpush3.bf16.msra.mxu0 %v13277_v53 }
 0x7c4   : > { %12330 = vmatprep.subr.bf16.mxu0 %v14789_v31  ;;  %12416 = vmatpush3.bf16.msra.mxu1 %v13253_v12 }
 0x7c5   : > { %12417 = vmatprep.subr.bf16.mxu1 %v14789_v31 }
 0x7c7   : > { %12332 = vmatpush3.bf16.msra.mxu0 %v13279_v54 }
 0x7c8   : > { %12333 = vmatprep.subr.bf16.mxu0 %v14789_v31  ;;  %12419 = vmatpush3.bf16.msra.mxu1 %v13265_v17 }
 0x7c9   : > { %12420 = vmatprep.subr.bf16.mxu1 %v14789_v31 }
 0x7cb   : > { %12335 = vmatpush3.bf16.msra.mxu0 %v13281_v55 }
 0x7cc   : > { %12348 = vmatprep.subr.bf16.mxu0 %v14789_v31 }
 0x7ce   : > { %11161 = vmatmul.mubr.f32.vlgmr.msra.gmra.mrb[24].mxu0 %v4653_v32  ;;  %v13972_v32 = vld [vmem:[%s13416_s22 + $0x18] sm:$0xff] }
 0x7cf   : > { %12350 = vmatpush3.bf16.msra.mxu0 %v13370_v49  ;;  %11198 = vmatprep.mubr.msk.f32.mxu0 %vm12986_vm1, %v14788_v29 }
 0x7d0   : > { %12351 = vmatprep.subr.bf16.mxu0 %v14789_v31 }
 0x7d3   : > { %12353 = vmatpush3.bf16.msra.mxu0 %v13283_v3 }
 0x7d4   : > { %12354 = vmatprep.subr.bf16.mxu0 %v14789_v31 }
 0x7d7   : > { %12356 = vmatpush3.bf16.msra.mxu0 %v13285_v4 }
 0x7d8   : > { %12357 = vmatprep.subr.bf16.mxu0 %v14789_v31 }
 0x7db   : > { %12359 = vmatpush3.bf16.msra.mxu0 %v13287_v5 }
 0x7dc   : > { %12372 = vmatprep.subr.bf16.mxu0 %v14789_v31 }
 0x7de   : > { %11199 = vmatmul.mubr.f32.vlgmr.msra.gmra.mrb[26].mxu0 %v4652_v22 }
 0x7df   : > { %12374 = vmatpush3.bf16.msra.mxu0 %v13122_v27  ;;  %11228 = vmatprep.mubr.msk.f32.mxu0 %vm12986_vm1, %v14788_v29 }
 0x7e0   : > { %12375 = vmatprep.subr.bf16.mxu0 %v14789_v31 }
 0x7e3   : > { %12377 = vmatpush3.bf16.msra.mxu0 %v13138_v35 }
 0x7e4   : > { %12378 = vmatprep.subr.bf16.mxu0 %v14789_v31 }
 0x87d   : > { %v4938_v37 = vpop.f32.mrb[24].mxu1 }
 0x87e   : > { %v11181_v60 = vpop.f32.mrb[25].mxu1 }
 0x881   : > { %v4658_v43 = vpop.f32.mrb[20].mxu0 }
 0x882   : > { %v11124_v59 = vpop.f32.mrb[21].mxu0 }
 0x88d   : > { %v5112_v15 = vpop.f32.mrb[26].mxu1 }
 0x88e   : > { %v11219_v13 = vpop.f32.mrb[27].mxu1 }
 0x891   : > { %v4769_v25 = vpop.f32.mrb[22].mxu0 }
 0x892   : > { %v4770_v44 = vadd.f32 %v4769_v25, %v4658_v43  ;;  %v11143_v45 = vpop.f32.mrb[23].mxu0 }
 0x8a1   : > { %v4857_v46 = vpop.f32.mrb[24].mxu0 }
 0x8a2   : > { %v4858_v2 = vadd.f32 %v4857_v46, %v4770_v44  ;;  %v11162_v14 = vpop.f32.mrb[25].mxu0 }
 0x8a4   : > { %v4939_v26 = vadd.f32 %v4938_v37, %v4858_v2 }
 0x8b1   : > { %v5033_v52 = vpop.f32.mrb[26].mxu0 }
 0x8b2   : > { %v5034_v18 = vadd.f32 %v5033_v52, %v4939_v26  ;;  %v11200_v6 = vpop.f32.mrb[27].mxu0 }
 0x8b4   : > { %v5113_v10 = vadd.f32 %v5112_v15, %v5034_v18 }
 0x8b6   : > { %v5116_v22 = vadd.f32 %v5113_v10, %v13797_v28 }
 0x8b8   : > { %v5117_v50 = vadd.f32 %v13977_v58, %v5116_v22  ;;  %v14053_v22 = vld [vmem:[%s14739_s4] ss:$0 sm:$0xff] }
 0x8ba   : > { %v13981_v8 = vadd.f32 %v5117_v50, %v13968_v11  ;;  %v13984_v37 = vsub.f32 %v5117_v50, %v13972_v32 }
 0x8bc   : > { %v5202_v20 = vsel %vm722_vm2, %v13984_v37, 0  ;;  %5123 = vrot.lane.b32.xlu1 %v13981_v8, %s12992_s18  ;;  %v9797_v28 = vadd.f32 -0.5, %v13981_v8  ;;  %v5180_v59 = vsub.f32 0.5, %v13981_v8  ;;  %v9799_v15 = vadd.f32 0.7, %v13981_v8 }
 0x8bd   : > { %v5273_v60 = vand.u32 4294901760, %v5202_v20  ;;  %v9800_v46 = vadd.f32 -0.6, %v13981_v8  ;;  %v5121_v50 = vsub.f32 %v14053_v22, %v13981_v8 }
 0x8be   : > { %v13991_v43 = vmul.f32 %v9797_v28, %v9797_v28  ;;  %v5181_v44 = vmax.f32 %v5180_v59, 0.0  ;;  %v5157_v45 = vand.u32 2147483647, %v9799_v15 }
 0x8bf   : > { %v5274_v13 = vsub.f32 %v5202_v20, %v5273_v60  ;;  %v5161_v52 = vand.u32 2147483647, %v9800_v46  ;;  %v5131_v20 = vmul.f32 0.3, %v5121_v50  ;;  %v14066_v46 = vld [vmem:[%s14739_s4 + $0x2] ss:$0 sm:$0xff] }
 0x8c0   : > { %14805 = vst [vmem:[#allocation5_spill] sm:$0xff] %v13991_v43  ;;  %5127 = vrot.lane.b32.xlu1 %v13981_v8, %s12991_s21  ;;  %5149 = vrot.lane.b32.xlu0 %v13991_v43, %s12991_s21  ;;  %v14001_v26 = vsub.f32 0.3, %v5157_v45 }
 0x8c1   : > { %v5275_v25 = vand.u32 4294901760, %v5274_v13  ;;  %v5162_v6 = vsub.f32 0.6, %v5161_v52  ;;  %v5132_v15 = vadd.f32 %v5131_v20, %v5121_v50 }
 0x8c2   : > { %v14756_v18 = vmax.f32 %v14001_v26, 0.0 }
 0x8c3   : > { %v5276_v2 = vsub.f32 %v5274_v13, %v5275_v25  ;;  %v5163_v10 = vmax.f32 %v5162_v6, 0.0  ;;  %v9801_v6 = vadd.f32 -0.7, %v13981_v8  ;;  %v4074_v8 = vadd.f32 %v13867_v40, %v13880_v39 }
 0x8c4   : > { %5185 = vrot.lane.b32.xlu1 %v5181_v44, %s12991_s21  ;;  %v5135_v44 = vand.u32 2147483647, %v5132_v15 }
 0x8c5   : > { %v5277_v14 = vand.u32 4294901760, %v5276_v2  ;;  %v5175_v50 = vand.u32 2147483647, %v9801_v6  ;;  %v14808_v6 = vld [vmem:[#allocation7_spill] sm:$0xff] }
 0x8c7   : > { %11229 = vmatmul.mubr.f32.vlgmr.msra.gmra.mrb[28].mxu0 %v5277_v14  ;;  %v5176_v38 = vsub.f32 0.3, %v5175_v50 }
 0x8c8   : > { %12380 = vmatpush3.bf16.msra.mxu0 %v13160_v56  ;;  %5145 = vrot.lane.b32.xlu1 %v13991_v43, %s12992_s18 }
 0x8c9   : > { %12381 = vmatprep.subr.bf16.mxu0 %v14789_v31  ;;  %11239 = vmatprep.mubr.msk.f32.mxu0 %vm12986_vm1, %v14788_v29  ;;  %v5177_v43 = vmax.f32 %v5176_v38, 0.0  ;;  %v14810_v38 = vld [vmem:[#allocation9_spill] sm:$0xff] }
 0x8cc   : > { %12383 = vmatpush3.bf16.msra.mxu0 %v13164_v57  ;;  %5165 = vrot.lane.b32.xlu1 %v14756_v18, %s12992_s18 }
 0x8cd   : > { %12384 = vmatprep.subr.bf16.mxu0 %v14789_v31 }
 0x8cf   : > { %11240 = vmatmul.mubr.f32.vlgmr.msra.gmra.mrb[28].mxu0 %v5273_v60 }
 0x8d0   : > { %12386 = vmatpush3.bf16.msra.mxu0 %v13191_v63  ;;  %5170 = vrot.lane.b32.xlu1 %v5163_v10, %s12991_s21 }
 0x8d1   : > { %12387 = vmatprep.subr.bf16.mxu0 %v14789_v31  ;;  %11250 = vmatprep.mubr.msk.f32.mxu0 %vm12986_vm1, %v14788_v29 }
 0x8d4   : > { %12389 = vmatpush3.bf16.msra.mxu0 %v13200_v0 }
 0x8d5   : > { %12390 = vmatprep.subr.bf16.mxu0 %v14789_v31 }
 0x8d7   : > { %11251 = vmatmul.mubr.f32.vlgmr.msra.gmra.mrb[28].mxu0 %v5274_v13 }
 0x8d8   : > { %12392 = vmatpush3.bf16.msra.mxu0 %v13122_v27  ;;  %11261 = vmatprep.mubr.msk.f32.mxu0 %vm12986_vm1, %v14788_v29 }
 0x8d9   : > { %12393 = vmatprep.subr.bf16.mxu0 %v14789_v31 }
 0x8dc   : > { %12395 = vmatpush3.bf16.msra.mxu0 %v13138_v35 }
 0x8dd   : > { %12396 = vmatprep.subr.bf16.mxu0 %v14789_v31 }
 0x8df   : > { %11262 = vmatmul.mubr.f32.vlgmr.msra.gmra.mrb[28].mxu0 %v5275_v25 }
 0x8e0   : > { %12398 = vmatpush3.bf16.msra.mxu0 %v13212_v1  ;;  %11272 = vmatprep.mubr.msk.f32.mxu0 %vm12986_vm1, %v14788_v29 }
 0x8e1   : > { %12399 = vmatprep.subr.bf16.mxu0 %v14789_v31 }
 0x8e4   : > { %12401 = vmatpush3.bf16.msra.mxu0 %v14796_v9 }
 0x8e5   : > { %12402 = vmatprep.subr.bf16.mxu0 %v14789_v31 }
 0x8e7   : > { %11273 = vmatmul.mubr.f32.vlgmr.msra.gmra.mrb[28].mxu0 %v5273_v60 }
 0x8e8   : > { %12404 = vmatpush3.bf16.msra.mxu0 %v13122_v27  ;;  %11283 = vmatprep.mubr.msk.f32.mxu0 %vm12986_vm1, %v14788_v29 }
 0x8e9   : > { %12405 = vmatprep.subr.bf16.mxu0 %v14789_v31 }
 0x8ec   : > { %12407 = vmatpush3.bf16.msra.mxu0 %v13138_v35 }
 0x8ed   : > { %12444 = vmatprep.subr.bf16.mxu0 %v14789_v31 }
 0x8ef   : > { %11284 = vmatmul.mubr.f32.vlgmr.msra.gmra.mrb[28].mxu0 %v5273_v60  ;;  %v14060_v60 = vld [vmem:[%s14739_s4 + $0x1] ss:$0 sm:$0xff] }
 0x8f0   : > { %12446 = vmatpush3.bf16.msra.mxu0 %v13186_v62  ;;  %11359 = vmatprep.mubr.msk.f32.mxu0 %vm12986_vm1, %v14788_v29 }
 0x8f1   : > { %12447 = vmatprep.subr.bf16.mxu0 %v14789_v31 }
 0x8f4   : > { %12449 = vmatpush3.bf16.msra.mxu0 %v13241_v7 }
 0x8f5   : > { %12450 = vmatprep.subr.bf16.mxu0 %v14789_v31 }
 0x8f8   : > { %12452 = vmatpush3.bf16.msra.mxu0 %v13253_v12 }
 0x8f9   : > { %12453 = vmatprep.subr.bf16.mxu0 %v14789_v31 }
 0x8fc   : > { %12455 = vmatpush3.bf16.msra.mxu0 %v13265_v17 }
 0x8fd   : > { %12468 = vmatprep.subr.bf16.mxu0 %v14789_v31 }
 0x92e   : > { %v5124_v28 = vpop.permute.xlu1 %5123 }
 0x92f   : > { %v5126_v59 = vsub.f32 %v14060_v60, %v5124_v28 }
 0x931   : > { %v5133_v13 = vadd.f32 %v5131_v20, %v5126_v59 }
 0x932   : > { %v5128_v25 = vpop.permute.xlu1 %5127 }
 0x933   : > { %v5136_v45 = vand.u32 2147483647, %v5133_v13  ;;  %v5130_v2 = vsub.f32 %v14066_v46, %v5128_v25  ;;  %v14807_v25 = vmax.f32 %v14001_v26, 0.0  ;;  %v641_v26 = vmul.f32 %v13899_v33, %v14810_v38 }
 0x935   : > { %v5137_v14 = vadd.f32 %v5136_v45, %v5135_v44  ;;  %v5134_v52 = vadd.f32 %v5131_v20, %v5130_v2 }
 0x936   : > { %v14070_v10 = vpop.permute.xlu1 %5185 }
 0x937   : > { %v5138_v18 = vand.u32 2147483647, %v5134_v52 }
 0x939   : > { %v5139_v28 = vadd.f32 %v5138_v18, %v5137_v14 }
 0x93a   : > { %v14072_v59 = vpop.permute.xlu1 %5145 }
 0x93b   : > { %14806 = vst [vmem:[#allocation10_spill] sm:$0xff] %v14072_v59  ;;  %v5140_v15 = vmul.f32 0.5, %v5139_v28  ;;  %v14809_v28 = vld [vmem:[#allocation12_spill] sm:$0xff] }
 0x93c   : > { %v635_v50 = vmul.f32 %v13892_v30, %v14809_v28 }
 0x93d   : > { %v14075_v13 = vadd.f32 %v5140_v15, %v13875_v23  ;;  %v630_v23 = vmul.f32 %v13885_v21, %v14808_v6 }
 0x93e   : > { %v5166_v16 = vpop.permute.xlu1 %5165 }
 0x93f   : > { %v5168_v44 = vmin.f32 %v14807_v25, %v5166_v16  ;;  %v5178_v45 = vmin.f32 %v5177_v43, %v5166_v16  ;;  %v636_v15 = vadd.f32 %v635_v50, %v630_v23 }
 0x941   : > { %v642_v25 = vadd.f32 %v641_v26, %v636_v15 }
 0x942   : > { %v5171_v20 = vpop.permute.xlu1 %5170 }
 0x943   : > { %v5173_v2 = vmin.f32 %v5168_v44, %v5171_v20  ;;  %v5179_v18 = vmin.f32 %v5178_v45, %v5171_v20  ;;  %v643_v16 = vsub.f32 %v13906_v19, %v642_v25 }
 0x945   : > { %v5182_v14 = vadd.f32 %v5173_v2, %v4074_v8 }
 0x947   : > { %v14081_v52 = vadd.f32 %v5182_v14, %v5179_v18 }
 0x9c2   : > { %v5685_v43 = vpop.f32.mrb[28].mxu0 }
 0x9c3   : > { %v12808_v40 = vadd.f32 %v5685_v43, %v643_v16  ;;  %v11285_v39 = vpop.f32.mrb[29].mxu0 }
 0x9c5   : > { %v5689_v44 = vmax.f32 %v12808_v40, 0.0 }
 0x9c7   : > { %v5691_v20 = vsel %vm1215_vm3, %v5689_v44, 0 }
 0x9c8   : > { %v5766_v45 = vand.u32 4294901760, %v5691_v20 }
 0x9ca   : > { %v5767_v8 = vsub.f32 %v5691_v20, %v5766_v45 }
 0x9cc   : > { %v5768_v2 = vand.u32 4294901760, %v5767_v8 }
 0x9ce   : > { %11360 = vmatmul.mubr.f32.vlgmr.msra.gmra.mrb[30].mxu0 %v5768_v2  ;;  %v5769_v18 = vsub.f32 %v5767_v8, %v5768_v2 }
 0x9cf   : > { %12470 = vmatpush3.bf16.msra.mxu0 %v13186_v62  ;;  %11397 = vmatprep.mubr.msk.f32.mxu0 %vm12986_vm1, %v14788_v29 }
 0x9d0   : > { %12471 = vmatprep.subr.bf16.mxu0 %v14789_v31  ;;  %v5770_v14 = vand.u32 4294901760, %v5769_v18  ;;  %v14149_v18 = vadd.f32 %v13972_v32, %v13968_v11 }
 0x9d2   : > { %11303 = vmatmul.mubr.f32.vlgmr.msra.gmra.mrb[28].mxu1 %v5770_v14 }
 0x9d3   : > { %12422 = vmatpush3.bf16.msra.mxu1 %v13328_v61  ;;  %12473 = vmatpush3.bf16.msra.mxu0 %v13241_v7 }
 0x9d4   : > { %12423 = vmatprep.subr.bf16.mxu1 %v14789_v31  ;;  %12474 = vmatprep.subr.bf16.mxu0 %v14789_v31 }
 0x9d5   : > { %11321 = vmatprep.mubr.msk.f32.mxu1 %vm12986_vm1, %v14788_v29 }
 0x9d7   : > { %12425 = vmatpush3.bf16.msra.mxu1 %v13271_v36  ;;  %12476 = vmatpush3.bf16.msra.mxu0 %v13253_v12 }
 0x9d8   : > { %12426 = vmatprep.subr.bf16.mxu1 %v14789_v31  ;;  %12477 = vmatprep.subr.bf16.mxu0 %v14789_v31 }
 0x9db   : > { %12428 = vmatpush3.bf16.msra.mxu1 %v13273_v48  ;;  %12479 = vmatpush3.bf16.msra.mxu0 %v13265_v17 }
 0x9dc   : > { %12429 = vmatprep.subr.bf16.mxu1 %v14789_v31  ;;  %12516 = vmatprep.subr.bf16.mxu0 %v14789_v31 }
 0x9de   : > { %11398 = vmatmul.mubr.f32.vlgmr.msra.gmra.mrb[32].mxu0 %v5766_v45 }
 0x9df   : > { %12431 = vmatpush3.bf16.msra.mxu1 %v13275_v51  ;;  %12518 = vmatpush3.bf16.msra.mxu0 %v13186_v62 }
 0x9e0   : > { %12432 = vmatprep.subr.bf16.mxu1 %v14789_v31  ;;  %12519 = vmatprep.subr.bf16.mxu0 %v14789_v31 }
 0x9e1   : > { %11482 = vmatprep.mubr.msk.f32.mxu0 %vm12986_vm1, %v14788_v29 }
 0x9e2   : > { %11322 = vmatmul.mubr.f32.vlgmr.msra.gmra.mrb[30].mxu1 %v5766_v45 }
 0x9e3   : > { %12434 = vmatpush3.bf16.msra.mxu1 %v13348_v47  ;;  %11340 = vmatprep.mubr.msk.f32.mxu1 %vm12986_vm1, %v14788_v29 }
 0x9e4   : > { %12435 = vmatprep.subr.bf16.mxu1 %v14789_v31  ;;  %12521 = vmatpush3.bf16.msra.mxu0 %v13241_v7 }
 0x9e5   : > { %12522 = vmatprep.subr.bf16.mxu0 %v14789_v31 }
 0x9e7   : > { %12437 = vmatpush3.bf16.msra.mxu1 %v13277_v53 }
 0x9e8   : > { %12438 = vmatprep.subr.bf16.mxu1 %v14789_v31  ;;  %12524 = vmatpush3.bf16.msra.mxu0 %v13253_v12 }
 0x9e9   : > { %12525 = vmatprep.subr.bf16.mxu0 %v14789_v31 }
 0x9eb   : > { %12440 = vmatpush3.bf16.msra.mxu1 %v13279_v54 }
 0x9ec   : > { %12441 = vmatprep.subr.bf16.mxu1 %v14789_v31  ;;  %12527 = vmatpush3.bf16.msra.mxu0 %v13265_v17 }
 0x9ed   : > { %12528 = vmatprep.subr.bf16.mxu0 %v14789_v31 }
 0x9ef   : > { %12443 = vmatpush3.bf16.msra.mxu1 %v13281_v55 }
 0x9f0   : > { %12456 = vmatprep.subr.bf16.mxu1 %v14789_v31 }
 0x9f2   : > { %11341 = vmatmul.mubr.f32.vlgmr.msra.gmra.mrb[32].mxu1 %v5767_v8 }
 0x9f3   : > { %12458 = vmatpush3.bf16.msra.mxu1 %v13370_v49  ;;  %11378 = vmatprep.mubr.msk.f32.mxu1 %vm12986_vm1, %v14788_v29 }
 0x9f4   : > { %12459 = vmatprep.subr.bf16.mxu1 %v14789_v31 }
 0x9f7   : > { %12461 = vmatpush3.bf16.msra.mxu1 %v13283_v3 }
 0x9f8   : > { %12462 = vmatprep.subr.bf16.mxu1 %v14789_v31 }
 0x9fb   : > { %12464 = vmatpush3.bf16.msra.mxu1 %v13285_v4 }
 0x9fc   : > { %12465 = vmatprep.subr.bf16.mxu1 %v14789_v31 }
 0x9ff   : > { %12467 = vmatpush3.bf16.msra.mxu1 %v13287_v5 }
 0xa00   : > { %12480 = vmatprep.subr.bf16.mxu1 %v14789_v31 }
 0xa02   : > { %11379 = vmatmul.mubr.f32.vlgmr.msra.gmra.mrb[34].mxu1 %v5766_v45 }
 0xa03   : > { %12482 = vmatpush3.bf16.msra.mxu1 %v13122_v27  ;;  %11408 = vmatprep.mubr.msk.f32.mxu1 %vm12986_vm1, %v14788_v29 }
 0xa04   : > { %12483 = vmatprep.subr.bf16.mxu1 %v14789_v31 }
 0xa07   : > { %12485 = vmatpush3.bf16.msra.mxu1 %v13138_v35 }
 0xa08   : > { %12486 = vmatprep.subr.bf16.mxu1 %v14789_v31 }
 0xaa1   : > { %v6052_v6 = vpop.f32.mrb[30].mxu0 }
 0xaa2   : > { %v11361_v23 = vpop.f32.mrb[31].mxu0 }
 0xaa3   : > { %v14153_v23 = vld [vmem:[%s13416_s22 + $0x20] sm:$0xff] }
 0xaa5   : > { %v5772_v28 = vpop.f32.mrb[28].mxu1 }
 0xaa6   : > { %v11304_v50 = vpop.f32.mrb[29].mxu1 }
 0xab1   : > { %v6226_v38 = vpop.f32.mrb[32].mxu0 }
 0xab2   : > { %v11399_v26 = vpop.f32.mrb[33].mxu0 }
 0xab5   : > { %v5883_v15 = vpop.f32.mrb[30].mxu1 }
 0xab6   : > { %v5884_v25 = vadd.f32 %v5883_v15, %v5772_v28  ;;  %v11323_v16 = vpop.f32.mrb[31].mxu1 }
 0xac5   : > { %v5971_v43 = vpop.f32.mrb[32].mxu1 }
 0xac6   : > { %v5972_v40 = vadd.f32 %v5971_v43, %v5884_v25  ;;  %v11342_v39 = vpop.f32.mrb[33].mxu1 }
 0xac8   : > { %v6053_v44 = vadd.f32 %v6052_v6, %v5972_v40 }
 0xad5   : > { %v6147_v20 = vpop.f32.mrb[34].mxu1 }
 0xad6   : > { %v6148_v45 = vadd.f32 %v6147_v20, %v6053_v44  ;;  %v11380_v8 = vpop.f32.mrb[35].mxu1 }
 0xad8   : > { %v6227_v2 = vadd.f32 %v6226_v38, %v6148_v45 }
 0xada   : > { %v6230_v14 = vadd.f32 %v6227_v2, %v13984_v37 }
 0xadc   : > { %v6231_v50 = vadd.f32 %v13977_v58, %v6230_v14 }
 0xade   : > { %v14157_v28 = vadd.f32 %v6231_v50, %v14149_v18  ;;  %v14160_v26 = vsub.f32 %v6231_v50, %v14153_v23 }
 0xae0   : > { %v6316_v6 = vsel %vm722_vm2, %v14160_v26, 0  ;;  %6241 = vrot.lane.b32.xlu1 %v14157_v28, %s12991_s21  ;;  %6237 = vrot.lane.b32.xlu0 %v14157_v28, %s12992_s18  ;;  %v6294_v32 = vsub.f32 0.5, %v14157_v28  ;;  %v9805_v37 = vadd.f32 0.7, %v14157_v28  ;;  %v9806_v15 = vadd.f32 -0.6, %v14157_v28 }
 0xae1   : > { %v6387_v38 = vand.u32 4294901760, %v6316_v6  ;;  %v9803_v43 = vadd.f32 -0.5, %v14157_v28 }
 0xae2   : > { %v6295_v25 = vmax.f32 %v6294_v32, 0.0  ;;  %v6271_v16 = vand.u32 2147483647, %v9805_v37  ;;  %v6275_v39 = vand.u32 2147483647, %v9806_v15  ;;  %v6235_v32 = vsub.f32 %v14053_v22, %v14157_v28  ;;  %v14228_v37 = vpop.permute.xlu0 %5149 }
 0xae3   : > { %v6388_v40 = vsub.f32 %v6316_v6, %v6387_v38  ;;  %v14176_v8 = vmul.f32 %v9803_v43, %v9803_v43  ;;  %14812 = vst [vmem:[#allocation7_spill] sm:$0xff] %v14228_v37  ;;  %v9807_v15 = vadd.f32 -0.7, %v14157_v28 }
 0xae4   : > { %6299 = vrot.lane.b32.xlu1 %v6295_v25, %s12991_s21  ;;  %v14173_v44 = vsub.f32 0.3, %v6271_v16  ;;  %v6276_v2 = vsub.f32 0.6, %v6275_v39 }
 0xae5   : > { %v6389_v20 = vand.u32 4294901760, %v6388_v40  ;;  %14811 = vst [vmem:[#allocation6_spill] sm:$0xff] %v14176_v8 }
 0xae6   : > { %v14758_v45 = vmax.f32 %v14173_v44, 0.0  ;;  %v6277_v6 = vmax.f32 %v6276_v2, 0.0  ;;  %v14813_v28 = vmax.f32 %v14173_v44, 0.0 }
 0xae7   : > { %v6390_v14 = vsub.f32 %v6388_v40, %v6389_v20 }
 0xae8   : > { %6279 = vrot.lane.b32.xlu0 %v14758_v45, %s12992_s18  ;;  %6259 = vrot.lane.b32.xlu1 %v14176_v8, %s12992_s18 }
 0xae9   : > { %v6391_v50 = vand.u32 4294901760, %v6390_v14  ;;  %v6289_v14 = vand.u32 2147483647, %v9807_v15 }
 0xaeb   : > { %11409 = vmatmul.mubr.f32.vlgmr.msra.gmra.mrb[36].mxu1 %v6391_v50  ;;  %v6290_v59 = vsub.f32 0.3, %v6289_v14 }
 0xaec   : > { %12488 = vmatpush3.bf16.msra.mxu1 %v13160_v56  ;;  %6284 = vrot.lane.b32.xlu0 %v6277_v6, %s12991_s21 }
 0xaed   : > { %6263 = vrot.lane.b32.xlu1 %v14176_v8, %s12991_s21  ;;  %12489 = vmatprep.subr.bf16.mxu1 %v14789_v31  ;;  %v6291_v34 = vmax.f32 %v6290_v59, 0.0  ;;  %v14815_v59 = vld [vmem:[#allocation14_spill] sm:$0xff] }
 0xaee   : > { %11419 = vmatprep.mubr.msk.f32.mxu1 %vm12986_vm1, %v14788_v29  ;;  %v651_v44 = vmul.f32 %v13885_v21, %v14815_v59 }
 0xaf0   : > { %12491 = vmatpush3.bf16.msra.mxu1 %v13164_v57 }
 0xaf1   : > { %12492 = vmatprep.subr.bf16.mxu1 %v14789_v31 }
 0xaf3   : > { %11420 = vmatmul.mubr.f32.vlgmr.msra.gmra.mrb[36].mxu1 %v6387_v38 }
 0xaf4   : > { %12494 = vmatpush3.bf16.msra.mxu1 %v13191_v63  ;;  %11430 = vmatprep.mubr.msk.f32.mxu1 %vm12986_vm1, %v14788_v29 }
 0xaf5   : > { %12495 = vmatprep.subr.bf16.mxu1 %v14789_v31 }
 0xaf8   : > { %12497 = vmatpush3.bf16.msra.mxu1 %v13200_v0 }
 0xaf9   : > { %12498 = vmatprep.subr.bf16.mxu1 %v14789_v31 }
 0xafb   : > { %11431 = vmatmul.mubr.f32.vlgmr.msra.gmra.mrb[36].mxu1 %v6388_v40 }
 0xafc   : > { %12500 = vmatpush3.bf16.msra.mxu1 %v13122_v27  ;;  %11441 = vmatprep.mubr.msk.f32.mxu1 %vm12986_vm1, %v14788_v29 }
 0xafd   : > { %12501 = vmatprep.subr.bf16.mxu1 %v14789_v31 }
 0xb00   : > { %12503 = vmatpush3.bf16.msra.mxu1 %v13138_v35 }
 0xb01   : > { %12504 = vmatprep.subr.bf16.mxu1 %v14789_v31 }
 0xb03   : > { %11442 = vmatmul.mubr.f32.vlgmr.msra.gmra.mrb[36].mxu1 %v6389_v20 }
 0xb04   : > { %12506 = vmatpush3.bf16.msra.mxu1 %v13212_v1  ;;  %11452 = vmatprep.mubr.msk.f32.mxu1 %vm12986_vm1, %v14788_v29 }
 0xb05   : > { %12507 = vmatprep.subr.bf16.mxu1 %v14789_v31 }
 0xb08   : > { %12509 = vmatpush3.bf16.msra.mxu1 %v14796_v9 }
 0xb09   : > { %12510 = vmatprep.subr.bf16.mxu1 %v14789_v31 }
 0xb0b   : > { %11453 = vmatmul.mubr.f32.vlgmr.msra.gmra.mrb[36].mxu1 %v6387_v38 }
 0xb0c   : > { %12512 = vmatpush3.bf16.msra.mxu1 %v13122_v27  ;;  %11463 = vmatprep.mubr.msk.f32.mxu1 %vm12986_vm1, %v14788_v29 }
 0xb0d   : > { %12513 = vmatprep.subr.bf16.mxu1 %v14789_v31 }
 0xb10   : > { %12515 = vmatpush3.bf16.msra.mxu1 %v13138_v35 }
 0xb11   : > { %12552 = vmatprep.subr.bf16.mxu1 %v14789_v31 }
 0xb13   : > { %11464 = vmatmul.mubr.f32.vlgmr.msra.gmra.mrb[36].mxu1 %v6387_v38  ;;  %v6245_v38 = vmul.f32 0.3, %v6235_v32 }
 0xb14   : > { %12554 = vmatpush3.bf16.msra.mxu1 %v13186_v62  ;;  %11539 = vmatprep.mubr.msk.f32.mxu1 %vm12986_vm1, %v14788_v29 }
 0xb15   : > { %12555 = vmatprep.subr.bf16.mxu1 %v14789_v31  ;;  %v6246_v40 = vadd.f32 %v6245_v38, %v6235_v32  ;;  %v5188_v32 = vadd.f32 %v14070_v10, %v14081_v52 }
 0xb17   : > { %v6249_v50 = vand.u32 2147483647, %v6246_v40 }
 0xb18   : > { %12557 = vmatpush3.bf16.msra.mxu1 %v13241_v7 }
 0xb19   : > { %12558 = vmatprep.subr.bf16.mxu1 %v14789_v31 }
 0xb1c   : > { %12560 = vmatpush3.bf16.msra.mxu1 %v13253_v12 }
 0xb1d   : > { %12561 = vmatprep.subr.bf16.mxu1 %v14789_v31 }
 0xb20   : > { %12563 = vmatpush3.bf16.msra.mxu1 %v13265_v17 }
 0xb21   : > { %12576 = vmatprep.subr.bf16.mxu1 %v14789_v31 }
 0xb52   : > { %v6242_v25 = vpop.permute.xlu1 %6241  ;;  %v6238_v16 = vpop.permute.xlu0 %6237 }
 0xb53   : > { %v6244_v43 = vsub.f32 %v14066_v46, %v6242_v25  ;;  %v6240_v39 = vsub.f32 %v14060_v60, %v6238_v16 }
 0xb55   : > { %v6248_v20 = vadd.f32 %v6245_v38, %v6244_v43  ;;  %v6247_v2 = vadd.f32 %v6245_v38, %v6240_v39  ;;  %v14814_v39 = vld [vmem:[#allocation11_spill] sm:$0xff] }
 0xb57   : > { %v6250_v6 = vand.u32 2147483647, %v6247_v2  ;;  %v6252_v45 = vand.u32 2147483647, %v6248_v20 }
 0xb59   : > { %v6251_v8 = vadd.f32 %v6250_v6, %v6249_v50 }
 0xb5a   : > { %v6280_v24 = vpop.permute.xlu0 %6279 }
 0xb5b   : > { %v6253_v37 = vadd.f32 %v6252_v45, %v6251_v8  ;;  %v6282_v11 = vmin.f32 %v14813_v28, %v6280_v24  ;;  %v6292_v25 = vmin.f32 %v6291_v34, %v6280_v24  ;;  %v656_v45 = vmul.f32 %v13892_v30, %v14814_v39  ;;  %v14816_v8 = vld [vmem:[#allocation13_spill] sm:$0xff] }
 0xb5c   : > { %v662_v34 = vmul.f32 %v13899_v33, %v14816_v8 }
 0xb5d   : > { %v6254_v41 = vmul.f32 0.625, %v6253_v37  ;;  %v657_v24 = vadd.f32 %v656_v45, %v651_v44 }
 0xb5e   : > { %v6285_v42 = vpop.permute.xlu0 %6284 }
 0xb5f   : > { %v6287_v16 = vmin.f32 %v6282_v11, %v6285_v42  ;;  %v14238_v38 = vadd.f32 %v6254_v41, %v14075_v13  ;;  %v6293_v15 = vmin.f32 %v6292_v25, %v6285_v42  ;;  %v663_v37 = vadd.f32 %v662_v34, %v657_v24 }
 0xb61   : > { %v6296_v43 = vadd.f32 %v6287_v16, %v5188_v32  ;;  %v664_v11 = vsub.f32 %v13906_v19, %v663_v37  ;;  %v14308_v37 = vadd.f32 %v14153_v23, %v14149_v18 }
 0xb63   : > { %v14240_v40 = vadd.f32 %v6296_v43, %v6293_v15 }
 0xbe6   : > { %v6799_v10 = vpop.f32.mrb[36].mxu1 }
 0xbe7   : > { %v12809_v41 = vadd.f32 %v6799_v10, %v664_v11  ;;  %v11465_v13 = vpop.f32.mrb[37].mxu1  ;;  %v14312_v10 = vld [vmem:[%s13416_s22 + $0x28] sm:$0xff] }
 0xbe9   : > { %v6803_v42 = vmax.f32 %v12809_v41, 0.0 }
 0xbeb   : > { %v6805_v52 = vsel %vm1215_vm3, %v6803_v42, 0 }
 0xbec   : > { %v6880_v20 = vand.u32 4294901760, %v6805_v52 }
 0xbee   : > { %v6881_v2 = vsub.f32 %v6805_v52, %v6880_v20 }
 0xbf0   : > { %v6882_v14 = vand.u32 4294901760, %v6881_v2 }
 0xbf2   : > { %11540 = vmatmul.mubr.f32.vlgmr.msra.gmra.mrb[38].mxu1 %v6882_v14  ;;  %v6883_v30 = vsub.f32 %v6881_v2, %v6882_v14 }
 0xbf3   : > { %12578 = vmatpush3.bf16.msra.mxu1 %v13186_v62  ;;  %11577 = vmatprep.mubr.msk.f32.mxu1 %vm12986_vm1, %v14788_v29 }
 0xbf4   : > { %12579 = vmatprep.subr.bf16.mxu1 %v14789_v31  ;;  %v6884_v21 = vand.u32 4294901760, %v6883_v30 }
 0xbf6   : > { %11483 = vmatmul.mubr.f32.vlgmr.msra.gmra.mrb[34].mxu0 %v6884_v21 }
 0xbf7   : > { %12530 = vmatpush3.bf16.msra.mxu0 %v13328_v61  ;;  %12581 = vmatpush3.bf16.msra.mxu1 %v13241_v7 }
 0xbf8   : > { %12531 = vmatprep.subr.bf16.mxu0 %v14789_v31  ;;  %12582 = vmatprep.subr.bf16.mxu1 %v14789_v31 }
 0xbf9   : > { %11501 = vmatprep.mubr.msk.f32.mxu0 %vm12986_vm1, %v14788_v29 }
 0xbfb   : > { %12533 = vmatpush3.bf16.msra.mxu0 %v13271_v36  ;;  %12584 = vmatpush3.bf16.msra.mxu1 %v13253_v12 }
 0xbfc   : > { %12534 = vmatprep.subr.bf16.mxu0 %v14789_v31  ;;  %12585 = vmatprep.subr.bf16.mxu1 %v14789_v31 }
 0xbff   : > { %12536 = vmatpush3.bf16.msra.mxu0 %v13273_v48  ;;  %12587 = vmatpush3.bf16.msra.mxu1 %v13265_v17 }
 0xc00   : > { %12537 = vmatprep.subr.bf16.mxu0 %v14789_v31  ;;  %12624 = vmatprep.subr.bf16.mxu1 %v14789_v31 }
 0xc02   : > { %11578 = vmatmul.mubr.f32.vlgmr.msra.gmra.mrb[40].mxu1 %v6880_v20 }
 0xc03   : > { %12539 = vmatpush3.bf16.msra.mxu0 %v13275_v51  ;;  %12626 = vmatpush3.bf16.msra.mxu1 %v13186_v62 }
 0xc04   : > { %12540 = vmatprep.subr.bf16.mxu0 %v14789_v31  ;;  %12627 = vmatprep.subr.bf16.mxu1 %v14789_v31 }
 0xc05   : > { %11662 = vmatprep.mubr.msk.f32.mxu1 %vm12986_vm1, %v14788_v29 }
 0xc06   : > { %11502 = vmatmul.mubr.f32.vlgmr.msra.gmra.mrb[36].mxu0 %v6880_v20 }
 0xc07   : > { %12542 = vmatpush3.bf16.msra.mxu0 %v13348_v47  ;;  %11520 = vmatprep.mubr.msk.f32.mxu0 %vm12986_vm1, %v14788_v29 }
 0xc08   : > { %12543 = vmatprep.subr.bf16.mxu0 %v14789_v31  ;;  %12629 = vmatpush3.bf16.msra.mxu1 %v13241_v7 }
 0xc09   : > { %12630 = vmatprep.subr.bf16.mxu1 %v14789_v31 }
 0xc0b   : > { %12545 = vmatpush3.bf16.msra.mxu0 %v13277_v53 }
 0xc0c   : > { %12546 = vmatprep.subr.bf16.mxu0 %v14789_v31  ;;  %12632 = vmatpush3.bf16.msra.mxu1 %v13253_v12 }
 0xc0d   : > { %12633 = vmatprep.subr.bf16.mxu1 %v14789_v31 }
 0xc0f   : > { %12548 = vmatpush3.bf16.msra.mxu0 %v13279_v54 }
 0xc10   : > { %12549 = vmatprep.subr.bf16.mxu0 %v14789_v31  ;;  %12635 = vmatpush3.bf16.msra.mxu1 %v13265_v17 }
 0xc11   : > { %12636 = vmatprep.subr.bf16.mxu1 %v14789_v31 }
 0xc13   : > { %12551 = vmatpush3.bf16.msra.mxu0 %v13281_v55 }
 0xc14   : > { %12564 = vmatprep.subr.bf16.mxu0 %v14789_v31 }
 0xc16   : > { %11521 = vmatmul.mubr.f32.vlgmr.msra.gmra.mrb[38].mxu0 %v6881_v2 }
 0xc17   : > { %12566 = vmatpush3.bf16.msra.mxu0 %v13370_v49  ;;  %11558 = vmatprep.mubr.msk.f32.mxu0 %vm12986_vm1, %v14788_v29 }
 0xc18   : > { %12567 = vmatprep.subr.bf16.mxu0 %v14789_v31 }
 0xc1b   : > { %12569 = vmatpush3.bf16.msra.mxu0 %v13283_v3 }
 0xc1c   : > { %12570 = vmatprep.subr.bf16.mxu0 %v14789_v31 }
 0xc1f   : > { %12572 = vmatpush3.bf16.msra.mxu0 %v13285_v4 }
 0xc20   : > { %12573 = vmatprep.subr.bf16.mxu0 %v14789_v31 }
 0xc23   : > { %12575 = vmatpush3.bf16.msra.mxu0 %v13287_v5 }
 0xc24   : > { %12588 = vmatprep.subr.bf16.mxu0 %v14789_v31 }
 0xc26   : > { %11559 = vmatmul.mubr.f32.vlgmr.msra.gmra.mrb[40].mxu0 %v6880_v20 }
 0xc27   : > { %12590 = vmatpush3.bf16.msra.mxu0 %v13122_v27  ;;  %11588 = vmatprep.mubr.msk.f32.mxu0 %vm12986_vm1, %v14788_v29 }
 0xc28   : > { %12591 = vmatprep.subr.bf16.mxu0 %v14789_v31 }
 0xc2b   : > { %12593 = vmatpush3.bf16.msra.mxu0 %v13138_v35 }
 0xc2c   : > { %12594 = vmatprep.subr.bf16.mxu0 %v14789_v31 }
 0xcc5   : > { %v7166_v33 = vpop.f32.mrb[38].mxu1 }
 0xcc6   : > { %v11541_v19 = vpop.f32.mrb[39].mxu1 }
 0xcc9   : > { %v6886_v50 = vpop.f32.mrb[34].mxu0 }
 0xcca   : > { %v11484_v6 = vpop.f32.mrb[35].mxu0 }
 0xcd5   : > { %v7340_v28 = vpop.f32.mrb[40].mxu1 }
 0xcd6   : > { %v11579_v25 = vpop.f32.mrb[41].mxu1 }
 0xcd9   : > { %v6997_v32 = vpop.f32.mrb[36].mxu0 }
 0xcda   : > { %v6998_v16 = vadd.f32 %v6997_v32, %v6886_v50  ;;  %v11503_v15 = vpop.f32.mrb[37].mxu0 }
 0xce9   : > { %v7085_v43 = vpop.f32.mrb[38].mxu0 }
 0xcea   : > { %v7086_v39 = vadd.f32 %v7085_v43, %v6998_v16  ;;  %v11522_v45 = vpop.f32.mrb[39].mxu0  ;;  %v6300_v43 = vpop.permute.xlu1 %6299 }
 0xcec   : > { %v7167_v59 = vadd.f32 %v7166_v33, %v7086_v39 }
 0xcee   : > { %v14385_v39 = vpop.permute.xlu1 %6259 }
 0xcf9   : > { %v7261_v44 = vpop.f32.mrb[40].mxu0 }
 0xcfa   : > { %v7262_v8 = vadd.f32 %v7261_v44, %v7167_v59  ;;  %v11560_v34 = vpop.f32.mrb[41].mxu0  ;;  %v14389_v59 = vpop.permute.xlu1 %6263 }
 0xcfc   : > { %v7341_v24 = vadd.f32 %v7340_v28, %v7262_v8 }
 0xcfe   : > { %v7344_v11 = vadd.f32 %v7341_v24, %v14160_v26 }
 0xd00   : > { %v7345_v41 = vadd.f32 %v13977_v58, %v7344_v11 }
 0xd02   : > { %v14316_v13 = vadd.f32 %v7345_v41, %v14308_v37  ;;  %v14319_v42 = vsub.f32 %v7345_v41, %v14312_v10 }
 0xd04   : > { %v7430_v52 = vsel %vm722_vm2, %v14319_v42, 0  ;;  %7355 = vrot.lane.b32.xlu1 %v14316_v13, %s12991_s21  ;;  %7351 = vrot.lane.b32.xlu0 %v14316_v13, %s12992_s18  ;;  %v7408_v23 = vsub.f32 0.5, %v14316_v13  ;;  %v9809_v26 = vadd.f32 -0.5, %v14316_v13  ;;  %v9812_v58 = vadd.f32 -0.6, %v14316_v13 }
 0xd05   : > { %v7501_v20 = vand.u32 4294901760, %v7430_v52  ;;  %v9811_v2 = vadd.f32 0.7, %v14316_v13  ;;  %v7349_v45 = vsub.f32 %v14053_v22, %v14316_v13  ;;  %v9813_v8 = vadd.f32 -0.7, %v14316_v13 }
 0xd06   : > { %v7409_v14 = vmax.f32 %v7408_v23, 0.0  ;;  %v14331_v30 = vmul.f32 %v9809_v26, %v9809_v26  ;;  %v7389_v21 = vand.u32 2147483647, %v9812_v58 }
 0xd07   : > { %v7502_v33 = vsub.f32 %v7430_v52, %v7501_v20  ;;  %v7385_v19 = vand.u32 2147483647, %v9811_v2  ;;  %v7359_v44 = vmul.f32 0.3, %v7349_v45  ;;  %v7403_v58 = vand.u32 2147483647, %v9813_v8 }
 0xd08   : > { %7413 = vrot.lane.b32.xlu1 %v7409_v14, %s12991_s21  ;;  %7373 = vrot.lane.b32.xlu0 %v14331_v30, %s12992_s18  ;;  %v7390_v50 = vsub.f32 0.6, %v7389_v21 }
 0xd09   : > { %v7503_v6 = vand.u32 4294901760, %v7502_v33  ;;  %v14336_v25 = vsub.f32 0.3, %v7385_v19  ;;  %v7360_v41 = vadd.f32 %v7359_v44, %v7349_v45 }
 0xd0a   : > { %v7391_v28 = vmax.f32 %v7390_v50, 0.0 }
 0xd0b   : > { %v7504_v32 = vsub.f32 %v7502_v33, %v7503_v6  ;;  %v7387_v15 = vmax.f32 %v14336_v25, 0.0  ;;  %v7363_v2 = vand.u32 2147483647, %v7360_v41  ;;  %v14411_v41 = vld [vmem:[%s14741_s6 + $0x1] ss:$0 sm:$0xff] }
 0xd0c   : > { %7377 = vrot.lane.b32.xlu1 %v14331_v30, %s12991_s21  ;;  %7398 = vrot.lane.b32.xlu0 %v7391_v28, %s12991_s21 }
 0xd0d   : > { %v7505_v16 = vand.u32 4294901760, %v7504_v32 }
 0xd0f   : > { %11589 = vmatmul.mubr.f32.vlgmr.msra.gmra.mrb[42].mxu0 %v7505_v16 }
 0xd10   : > { %12596 = vmatpush3.bf16.msra.mxu0 %v13160_v56  ;;  %7393 = vrot.lane.b32.xlu1 %v7387_v15, %s12992_s18 }
 0xd11   : > { %12597 = vmatprep.subr.bf16.mxu0 %v14789_v31  ;;  %11599 = vmatprep.mubr.msk.f32.mxu0 %vm12986_vm1, %v14788_v29 }
 0xd14   : > { %12599 = vmatpush3.bf16.msra.mxu0 %v13164_v57 }
 0xd15   : > { %12600 = vmatprep.subr.bf16.mxu0 %v14789_v31 }
 0xd17   : > { %11600 = vmatmul.mubr.f32.vlgmr.msra.gmra.mrb[42].mxu0 %v7501_v20 }
 0xd18   : > { %12602 = vmatpush3.bf16.msra.mxu0 %v13191_v63  ;;  %11610 = vmatprep.mubr.msk.f32.mxu0 %vm12986_vm1, %v14788_v29 }
 0xd19   : > { %12603 = vmatprep.subr.bf16.mxu0 %v14789_v31 }
 0xd1c   : > { %12605 = vmatpush3.bf16.msra.mxu0 %v13200_v0 }
 0xd1d   : > { %12606 = vmatprep.subr.bf16.mxu0 %v14789_v31 }
 0xd1f   : > { %11611 = vmatmul.mubr.f32.vlgmr.msra.gmra.mrb[42].mxu0 %v7502_v33  ;;  %v7404_v33 = vsub.f32 0.3, %v7403_v58 }
 0xd20   : > { %12608 = vmatpush3.bf16.msra.mxu0 %v13122_v27  ;;  %11621 = vmatprep.mubr.msk.f32.mxu0 %vm12986_vm1, %v14788_v29 }
 0xd21   : > { %12609 = vmatprep.subr.bf16.mxu0 %v14789_v31 }
 0xd24   : > { %12611 = vmatpush3.bf16.msra.mxu0 %v13138_v35 }
 0xd25   : > { %12612 = vmatprep.subr.bf16.mxu0 %v14789_v31 }
 0xd27   : > { %11622 = vmatmul.mubr.f32.vlgmr.msra.gmra.mrb[42].mxu0 %v7503_v6 }
 0xd28   : > { %12614 = vmatpush3.bf16.msra.mxu0 %v13212_v1  ;;  %11632 = vmatprep.mubr.msk.f32.mxu0 %vm12986_vm1, %v14788_v29 }
 0xd29   : > { %12615 = vmatprep.subr.bf16.mxu0 %v14789_v31 }
 0xd2c   : > { %12617 = vmatpush3.bf16.msra.mxu0 %v14796_v9 }
 0xd2d   : > { %12618 = vmatprep.subr.bf16.mxu0 %v14789_v31 }
 0xd2f   : > { %11633 = vmatmul.mubr.f32.vlgmr.msra.gmra.mrb[42].mxu0 %v7501_v20 }
 0xd30   : > { %12620 = vmatpush3.bf16.msra.mxu0 %v13122_v27  ;;  %11643 = vmatprep.mubr.msk.f32.mxu0 %vm12986_vm1, %v14788_v29 }
 0xd31   : > { %12621 = vmatprep.subr.bf16.mxu0 %v14789_v31 }
 0xd34   : > { %12623 = vmatpush3.bf16.msra.mxu0 %v13138_v35 }
 0xd35   : > { %12660 = vmatprep.subr.bf16.mxu0 %v14789_v31 }
 0xd37   : > { %11644 = vmatmul.mubr.f32.vlgmr.msra.gmra.mrb[42].mxu0 %v7501_v20 }
 0xd38   : > { %12662 = vmatpush3.bf16.msra.mxu0 %v13186_v62  ;;  %11719 = vmatprep.mubr.msk.f32.mxu0 %vm12986_vm1, %v14788_v29 }
 0xd39   : > { %12663 = vmatprep.subr.bf16.mxu0 %v14789_v31 }
 0xd3c   : > { %12665 = vmatpush3.bf16.msra.mxu0 %v13241_v7 }
 0xd3d   : > { %12666 = vmatprep.subr.bf16.mxu0 %v14789_v31 }
 0xd40   : > { %12668 = vmatpush3.bf16.msra.mxu0 %v13253_v12 }
 0xd41   : > { %12669 = vmatprep.subr.bf16.mxu0 %v14789_v31 }
 0xd44   : > { %12671 = vmatpush3.bf16.msra.mxu0 %v13265_v17 }
 0xd45   : > { %12684 = vmatprep.subr.bf16.mxu0 %v14789_v31 }
 0xd76   : > { %v7356_v34 = vpop.permute.xlu1 %7355  ;;  %v7352_v24 = vpop.permute.xlu0 %7351 }
 0xd77   : > { %v7358_v11 = vsub.f32 %v14066_v46, %v7356_v34  ;;  %v7354_v52 = vsub.f32 %v14060_v60, %v7352_v24  ;;  %v7405_v46 = vmax.f32 %v7404_v33, 0.0 }
 0xd79   : > { %v7362_v23 = vadd.f32 %v7359_v44, %v7358_v11  ;;  %v7361_v26 = vadd.f32 %v7359_v44, %v7354_v52  ;;  %v6302_v44 = vadd.f32 %v6300_v43, %v14240_v40  ;;  %v14817_v52 = vld [vmem:[#allocation15_spill] sm:$0xff] }
 0xd7a   : > { %v14394_v20 = vpop.permute.xlu1 %7413  ;;  %v14396_v19 = vpop.permute.xlu0 %7373  ;;  %v677_v25 = vmul.f32 %v14411_v41, %v14817_v52 }
 0xd7b   : > { %v7364_v14 = vand.u32 2147483647, %v7361_v26  ;;  %v7366_v22 = vand.u32 2147483647, %v7362_v23  ;;  %v14425_v23 = vld [vmem:[%s14741_s6 + $0x2] ss:$0 sm:$0xff] }
 0xd7c   : > { %v14819_v26 = vld [vmem:[#allocation18_spill] sm:$0xff] }
 0xd7d   : > { %v7365_v21 = vadd.f32 %v7364_v14, %v7363_v2  ;;  %v683_v58 = vmul.f32 %v14425_v23, %v14819_v26  ;;  %v14432_v14 = vld [vmem:[%s14742_s7] ss:$0 sm:$0xff] }
 0xd7e   : > { %v14398_v13 = vpop.permute.xlu1 %7377  ;;  %v7399_v45 = vpop.permute.xlu0 %7398 }
 0xd7f   : > { %v7367_v50 = vadd.f32 %v7366_v22, %v7365_v21 }
 0xd81   : > { %v7368_v6 = vmul.f32 0.75, %v7367_v50 }
 0xd82   : > { %v7394_v28 = vpop.permute.xlu1 %7393 }
 0xd83   : > { %v7396_v60 = vmin.f32 %v7387_v15, %v7394_v28  ;;  %v7406_v32 = vmin.f32 %v7405_v46, %v7394_v28  ;;  %v14403_v16 = vadd.f32 %v7368_v6, %v14238_v38  ;;  %v14418_v38 = vld [vmem:[%s14741_s6] ss:$0 sm:$0xff] }
 0xd84   : > { %v14818_v15 = vld [vmem:[#allocation16_spill] sm:$0xff] }
 0xd85   : > { %v7401_v8 = vmin.f32 %v7396_v60, %v7399_v45  ;;  %v7407_v34 = vmin.f32 %v7406_v32, %v7399_v45  ;;  %v672_v40 = vmul.f32 %v14418_v38, %v14818_v15 }
 0xd87   : > { %v7410_v24 = vadd.f32 %v7401_v8, %v6302_v44  ;;  %v678_v43 = vadd.f32 %v677_v25, %v672_v40 }
 0xd89   : > { %v14406_v11 = vadd.f32 %v7410_v24, %v7407_v34  ;;  %v684_v2 = vadd.f32 %v683_v58, %v678_v43 }
 0xd8b   : > { %v685_v22 = vsub.f32 %v14432_v14, %v684_v2 }
 0xe0a   : > { %v7913_v21 = vpop.f32.mrb[42].mxu0 }
 0xe0b   : > { %v12810_v33 = vadd.f32 %v7913_v21, %v685_v22  ;;  %v11645_v50 = vpop.f32.mrb[43].mxu0 }
 0xe0d   : > { %v7917_v6 = vmax.f32 %v12810_v33, 0.0 }
 0xe0f   : > { %v7919_v46 = vsel %vm1215_vm3, %v7917_v6, 0 }
 0xe10   : > { %v7994_v28 = vand.u32 4294901760, %v7919_v46 }
 0xe12   : > { %v7995_v60 = vsub.f32 %v7919_v46, %v7994_v28 }
 0xe14   : > { %v7996_v32 = vand.u32 4294901760, %v7995_v60 }
 0xe16   : > { %11720 = vmatmul.mubr.f32.vlgmr.msra.gmra.mrb[44].mxu0 %v7996_v32  ;;  %v7997_v45 = vsub.f32 %v7995_v60, %v7996_v32  ;;  %v14498_v32 = vld [vmem:[%s13416_s22 + $0x30] sm:$0xff] }
 0xe17   : > { %12686 = vmatpush3.bf16.msra.mxu0 %v13186_v62  ;;  %11757 = vmatprep.mubr.msk.f32.mxu0 %vm12986_vm1, %v14788_v29 }
 0xe18   : > { %12687 = vmatprep.subr.bf16.mxu0 %v14789_v31  ;;  %v7998_v44 = vand.u32 4294901760, %v7997_v45  ;;  %v14503_v45 = vld [vmem:[%s14744_s9] ss:$0 sm:$0xff] }
 0xe1a   : > { %11663 = vmatmul.mubr.f32.vlgmr.msra.gmra.mrb[42].mxu1 %v7998_v44 }
 0xe1b   : > { %12638 = vmatpush3.bf16.msra.mxu1 %v13328_v61  ;;  %12689 = vmatpush3.bf16.msra.mxu0 %v13241_v7 }
 0xe1c   : > { %12639 = vmatprep.subr.bf16.mxu1 %v14789_v31  ;;  %12690 = vmatprep.subr.bf16.mxu0 %v14789_v31 }
 0xe1d   : > { %11681 = vmatprep.mubr.msk.f32.mxu1 %vm12986_vm1, %v14788_v29 }
 0xe1f   : > { %12641 = vmatpush3.bf16.msra.mxu1 %v13271_v36  ;;  %12692 = vmatpush3.bf16.msra.mxu0 %v13253_v12 }
 0xe20   : > { %12642 = vmatprep.subr.bf16.mxu1 %v14789_v31  ;;  %12693 = vmatprep.subr.bf16.mxu0 %v14789_v31 }
 0xe23   : > { %12644 = vmatpush3.bf16.msra.mxu1 %v13273_v48  ;;  %12695 = vmatpush3.bf16.msra.mxu0 %v13265_v17 }
 0xe24   : > { %12645 = vmatprep.subr.bf16.mxu1 %v14789_v31  ;;  %12732 = vmatprep.subr.bf16.mxu0 %v14789_v31 }
 0xe26   : > { %11758 = vmatmul.mubr.f32.vlgmr.msra.gmra.mrb[46].mxu0 %v7994_v28 }
 0xe27   : > { %12647 = vmatpush3.bf16.msra.mxu1 %v13275_v51  ;;  %12734 = vmatpush3.bf16.msra.mxu0 %v13186_v62 }
 0xe28   : > { %12648 = vmatprep.subr.bf16.mxu1 %v14789_v31  ;;  %12735 = vmatprep.subr.bf16.mxu0 %v14789_v31 }
 0xe29   : > { %11842 = vmatprep.mubr.msk.f32.mxu0 %vm12986_vm1, %v14788_v29 }
 0xe2a   : > { %11682 = vmatmul.mubr.f32.vlgmr.msra.gmra.mrb[44].mxu1 %v7994_v28 }
 0xe2b   : > { %12650 = vmatpush3.bf16.msra.mxu1 %v13348_v47  ;;  %11700 = vmatprep.mubr.msk.f32.mxu1 %vm12986_vm1, %v14788_v29 }
 0xe2c   : > { %12651 = vmatprep.subr.bf16.mxu1 %v14789_v31  ;;  %12737 = vmatpush3.bf16.msra.mxu0 %v13241_v7 }
 0xe2d   : > { %12738 = vmatprep.subr.bf16.mxu0 %v14789_v31 }
 0xe2f   : > { %12653 = vmatpush3.bf16.msra.mxu1 %v13277_v53 }
 0xe30   : > { %12654 = vmatprep.subr.bf16.mxu1 %v14789_v31  ;;  %12740 = vmatpush3.bf16.msra.mxu0 %v13253_v12 }
 0xe31   : > { %12741 = vmatprep.subr.bf16.mxu0 %v14789_v31 }
 0xe33   : > { %12656 = vmatpush3.bf16.msra.mxu1 %v13279_v54 }
 0xe34   : > { %12657 = vmatprep.subr.bf16.mxu1 %v14789_v31  ;;  %12743 = vmatpush3.bf16.msra.mxu0 %v13265_v17 }
 0xe35   : > { %12744 = vmatprep.subr.bf16.mxu0 %v14789_v31 }
 0xe37   : > { %12659 = vmatpush3.bf16.msra.mxu1 %v13281_v55 }
 0xe38   : > { %12672 = vmatprep.subr.bf16.mxu1 %v14789_v31 }
 0xe3a   : > { %11701 = vmatmul.mubr.f32.vlgmr.msra.gmra.mrb[46].mxu1 %v7995_v60 }
 0xe3b   : > { %12674 = vmatpush3.bf16.msra.mxu1 %v13370_v49  ;;  %11738 = vmatprep.mubr.msk.f32.mxu1 %vm12986_vm1, %v14788_v29 }
 0xe3c   : > { %12675 = vmatprep.subr.bf16.mxu1 %v14789_v31 }
 0xe3f   : > { %12677 = vmatpush3.bf16.msra.mxu1 %v13283_v3 }
 0xe40   : > { %12678 = vmatprep.subr.bf16.mxu1 %v14789_v31 }
 0xe43   : > { %12680 = vmatpush3.bf16.msra.mxu1 %v13285_v4 }
 0xe44   : > { %12681 = vmatprep.subr.bf16.mxu1 %v14789_v31 }
 0xe47   : > { %12683 = vmatpush3.bf16.msra.mxu1 %v13287_v5 }
 0xe48   : > { %12696 = vmatprep.subr.bf16.mxu1 %v14789_v31 }
 0xe4a   : > { %11739 = vmatmul.mubr.f32.vlgmr.msra.gmra.mrb[48].mxu1 %v7994_v28  ;;  %v14494_v28 = vadd.f32 %v14312_v10, %v14308_v37 }
 0xe4b   : > { %12698 = vmatpush3.bf16.msra.mxu1 %v13122_v27  ;;  %11768 = vmatprep.mubr.msk.f32.mxu1 %vm12986_vm1, %v14788_v29 }
 0xe4c   : > { %12699 = vmatprep.subr.bf16.mxu1 %v14789_v31 }
 0xe4f   : > { %12701 = vmatpush3.bf16.msra.mxu1 %v13138_v35 }
 0xe50   : > { %12702 = vmatprep.subr.bf16.mxu1 %v14789_v31 }
 0xee9   : > { %v8280_v8 = vpop.f32.mrb[44].mxu0 }
 0xeea   : > { %v11721_v34 = vpop.f32.mrb[45].mxu0 }
 0xeed   : > { %v8000_v24 = vpop.f32.mrb[42].mxu1 }
 0xeee   : > { %v11664_v52 = vpop.f32.mrb[43].mxu1 }
 0xef9   : > { %v8454_v25 = vpop.f32.mrb[46].mxu0 }
 0xefa   : > { %v11759_v15 = vpop.f32.mrb[47].mxu0 }
 0xefd   : > { %v8111_v40 = vpop.f32.mrb[44].mxu1 }
 0xefe   : > { %v8112_v43 = vadd.f32 %v8111_v40, %v8000_v24  ;;  %v11683_v26 = vpop.f32.mrb[45].mxu1 }
 0xf0d   : > { %v8199_v58 = vpop.f32.mrb[46].mxu1 }
 0xf0e   : > { %v8200_v2 = vadd.f32 %v8199_v58, %v8112_v43  ;;  %v11702_v22 = vpop.f32.mrb[47].mxu1 }
 0xf10   : > { %v8281_v21 = vadd.f32 %v8280_v8, %v8200_v2 }
 0xf1d   : > { %v8375_v33 = vpop.f32.mrb[48].mxu1 }
 0xf1e   : > { %v8376_v50 = vadd.f32 %v8375_v33, %v8281_v21  ;;  %v11740_v6 = vpop.f32.mrb[49].mxu1 }
 0xf20   : > { %v8455_v46 = vadd.f32 %v8454_v25, %v8376_v50 }
 0xf22   : > { %v8458_v60 = vadd.f32 %v8455_v46, %v14319_v42 }
 0xf24   : > { %v8459_v44 = vadd.f32 %v14503_v45, %v8458_v60 }
 0xf26   : > { %v14507_v8 = vadd.f32 %v8459_v44, %v14494_v28  ;;  %v14510_v34 = vsub.f32 %v8459_v44, %v14498_v32 }
 0xf28   : > { %v8544_v10 = vsel %vm722_vm2, %v14510_v34, 0  ;;  %8465 = vrot.lane.b32.xlu0 %v14507_v8, %s12992_s18  ;;  %v9815_v42 = vadd.f32 -0.5, %v14507_v8  ;;  %v9817_v24 = vadd.f32 0.7, %v14507_v8  ;;  %v8522_v15 = vsub.f32 0.5, %v14507_v8 }
 0xf29   : > { %v8615_v52 = vand.u32 4294901760, %v8544_v10  ;;  %v9818_v43 = vadd.f32 -0.6, %v14507_v8  ;;  %v9819_v44 = vadd.f32 -0.7, %v14507_v8 }
 0xf2a   : > { %v14518_v25 = vmul.f32 %v9815_v42, %v9815_v42  ;;  %v8499_v40 = vand.u32 2147483647, %v9817_v24  ;;  %v8523_v2 = vmax.f32 %v8522_v15, 0.0 }
 0xf2b   : > { %v8616_v26 = vsub.f32 %v8544_v10, %v8615_v52  ;;  %v8503_v21 = vand.u32 2147483647, %v9818_v43 }
 0xf2c   : > { %8469 = vrot.lane.b32.xlu0 %v14507_v8, %s12991_s21  ;;  %8491 = vrot.lane.b32.xlu1 %v14518_v25, %s12991_s21  ;;  %v14526_v22 = vsub.f32 0.3, %v8499_v40 }
 0xf2d   : > { %v8617_v58 = vand.u32 4294901760, %v8616_v26  ;;  %v8504_v46 = vsub.f32 0.6, %v8503_v21 }
 0xf2e   : > { %v8501_v6 = vmax.f32 %v14526_v22, 0.0 }
 0xf2f   : > { %v8618_v33 = vsub.f32 %v8616_v26, %v8617_v58  ;;  %v8505_v60 = vmax.f32 %v8504_v46, 0.0 }
 0xf30   : > { %8527 = vrot.lane.b32.xlu1 %v8523_v2, %s12991_s21  ;;  %8487 = vrot.lane.b32.xlu0 %v14518_v25, %s12992_s18 }
 0xf31   : > { %v8619_v50 = vand.u32 4294901760, %v8618_v33 }
 0xf33   : > { %11769 = vmatmul.mubr.f32.vlgmr.msra.gmra.mrb[50].mxu1 %v8619_v50 }
 0xf34   : > { %12704 = vmatpush3.bf16.msra.mxu1 %v13160_v56  ;;  %8507 = vrot.lane.b32.xlu0 %v8501_v6, %s12992_s18 }
 0xf35   : > { %12705 = vmatprep.subr.bf16.mxu1 %v14789_v31  ;;  %11779 = vmatprep.mubr.msk.f32.mxu1 %vm12986_vm1, %v14788_v29 }
 0xf38   : > { %12707 = vmatpush3.bf16.msra.mxu1 %v13164_v57  ;;  %8512 = vrot.lane.b32.xlu0 %v8505_v60, %s12991_s21 }
 0xf39   : > { %12708 = vmatprep.subr.bf16.mxu1 %v14789_v31 }
 0xf3b   : > { %11780 = vmatmul.mubr.f32.vlgmr.msra.gmra.mrb[50].mxu1 %v8615_v52 }
 0xf3c   : > { %12710 = vmatpush3.bf16.msra.mxu1 %v13191_v63  ;;  %11790 = vmatprep.mubr.msk.f32.mxu1 %vm12986_vm1, %v14788_v29 }
 0xf3d   : > { %12711 = vmatprep.subr.bf16.mxu1 %v14789_v31 }
 0xf40   : > { %12713 = vmatpush3.bf16.msra.mxu1 %v13200_v0  ;;  %v14586_v0 = vld [vmem:[%s14739_s4 + $0x1] ss:$0 sm:$0xff] }
 0xf41   : > { %12714 = vmatprep.subr.bf16.mxu1 %v14789_v31 }
 0xf43   : > { %11791 = vmatmul.mubr.f32.vlgmr.msra.gmra.mrb[50].mxu1 %v8616_v26  ;;  %v8517_v26 = vand.u32 2147483647, %v9819_v44 }
 0xf44   : > { %12716 = vmatpush3.bf16.msra.mxu1 %v13122_v27  ;;  %11801 = vmatprep.mubr.msk.f32.mxu1 %vm12986_vm1, %v14788_v29 }
 0xf45   : > { %12717 = vmatprep.subr.bf16.mxu1 %v14789_v31  ;;  %v8518_v33 = vsub.f32 0.3, %v8517_v26 }
 0xf47   : > { %v8519_v46 = vmax.f32 %v8518_v33, 0.0 }
 0xf48   : > { %12719 = vmatpush3.bf16.msra.mxu1 %v13138_v35 }
 0xf49   : > { %12720 = vmatprep.subr.bf16.mxu1 %v14789_v31 }
 0xf4b   : > { %11802 = vmatmul.mubr.f32.vlgmr.msra.gmra.mrb[50].mxu1 %v8617_v58 }
 0xf4c   : > { %12722 = vmatpush3.bf16.msra.mxu1 %v13212_v1  ;;  %11812 = vmatprep.mubr.msk.f32.mxu1 %vm12986_vm1, %v14788_v29 }
 0xf4d   : > { %12723 = vmatprep.subr.bf16.mxu1 %v14789_v31 }
 0xf50   : > { %12725 = vmatpush3.bf16.msra.mxu1 %v14796_v9 }
 0xf51   : > { %12726 = vmatprep.subr.bf16.mxu1 %v14789_v31 }
 0xf53   : > { %11813 = vmatmul.mubr.f32.vlgmr.msra.gmra.mrb[50].mxu1 %v8615_v52 }
 0xf54   : > { %12728 = vmatpush3.bf16.msra.mxu1 %v13122_v27  ;;  %11823 = vmatprep.mubr.msk.f32.mxu1 %vm12986_vm1, %v14788_v29  ;;  %v14579_v27 = vld [vmem:[%s14739_s4] ss:$0 sm:$0xff] }
 0xf55   : > { %12729 = vmatprep.subr.bf16.mxu1 %v14789_v31 }
 0xf58   : > { %12731 = vmatpush3.bf16.msra.mxu1 %v13138_v35  ;;  %v8463_v35 = vsub.f32 %v14579_v27, %v14507_v8 }
 0xf59   : > { %12768 = vmatprep.subr.bf16.mxu1 %v14789_v31 }
 0xf5a   : > { %v8473_v56 = vmul.f32 0.3, %v8463_v35 }
 0xf5b   : > { %11824 = vmatmul.mubr.f32.vlgmr.msra.gmra.mrb[50].mxu1 %v8615_v52  ;;  %v14593_v52 = vld [vmem:[%s14739_s4 + $0x2] ss:$0 sm:$0xff] }
 0xf5c   : > { %12770 = vmatpush3.bf16.msra.mxu1 %v13186_v62  ;;  %11899 = vmatprep.mubr.msk.f32.mxu1 %vm12986_vm1, %v14788_v29  ;;  %v8474_v63 = vadd.f32 %v8473_v56, %v8463_v35 }
 0xf5d   : > { %12771 = vmatprep.subr.bf16.mxu1 %v14789_v31 }
 0xf5e   : > { %v8477_v42 = vand.u32 2147483647, %v8474_v63 }
 0xf60   : > { %12773 = vmatpush3.bf16.msra.mxu1 %v13241_v7 }
 0xf61   : > { %12774 = vmatprep.subr.bf16.mxu1 %v14789_v31 }
 0xf64   : > { %12776 = vmatpush3.bf16.msra.mxu1 %v13253_v12 }
 0xf65   : > { %12777 = vmatprep.subr.bf16.mxu1 %v14789_v31 }
 0xf68   : > { %12779 = vmatpush3.bf16.msra.mxu1 %v13265_v17 }
 0xf69   : > { %12792 = vmatprep.subr.bf16.mxu1 %v14789_v31 }
 0xf9a   : > { %v8466_v57 = vpop.permute.xlu0 %8465 }
 0xf9b   : > { %v8468_v1 = vsub.f32 %v14586_v0, %v8466_v57 }
 0xf9d   : > { %v8475_v9 = vadd.f32 %v8473_v56, %v8468_v1 }
 0xf9e   : > { %v8470_v10 = vpop.permute.xlu0 %8469 }
 0xf9f   : > { %v8478_v24 = vand.u32 2147483647, %v8475_v9  ;;  %v8472_v15 = vsub.f32 %v14593_v52, %v8470_v10 }
 0xfa1   : > { %v8479_v40 = vadd.f32 %v8478_v24, %v8477_v42  ;;  %v8476_v43 = vadd.f32 %v8473_v56, %v8472_v15  ;;  %v7416_v56 = vadd.f32 %v14394_v20, %v14406_v11  ;;  %v14820_v42 = vld [vmem:[#allocation17_spill] sm:$0xff]  ;;  %v14821_v15 = vld [vmem:[#allocation20_spill] sm:$0xff] }
 0xfa2   : > { %v14596_v58 = vpop.permute.xlu0 %8487  ;;  %v693_v24 = vmul.f32 %v14418_v38, %v14820_v42  ;;  %v698_v22 = vmul.f32 %v14411_v41, %v14821_v15 }
 0xfa3   : > { %v8480_v2 = vand.u32 2147483647, %v8476_v43 }
 0xfa5   : > { %v8481_v21 = vadd.f32 %v8480_v2, %v8479_v40  ;;  %v14822_v40 = vld [vmem:[#allocation21_spill] sm:$0xff] }
 0xfa6   : > { %v8508_v50 = vpop.permute.xlu0 %8507 }
 0xfa7   : > { %v8482_v8 = vmul.f32 0.875, %v8481_v21  ;;  %v8510_v60 = vmin.f32 %v8501_v6, %v8508_v50  ;;  %v8520_v63 = vmin.f32 %v8519_v46, %v8508_v50  ;;  %v699_v6 = vadd.f32 %v698_v22, %v693_v24  ;;  %v14824_v22 = vld [vmem:[#allocation22_spill] sm:$0xff] }
 0xfa9   : > { %v14601_v35 = vadd.f32 %v8482_v8, %v14403_v16  ;;  %v704_v16 = vmul.f32 %v14425_v23, %v14822_v40 }
 0xfaa   : > { %v8513_v57 = vpop.permute.xlu0 %8512 }
 0xfab   : > { %v8515_v1 = vmin.f32 %v8510_v60, %v8513_v57  ;;  %v8521_v9 = vmin.f32 %v8520_v63, %v8513_v57  ;;  %v705_v43 = vadd.f32 %v704_v16, %v699_v6  ;;  %v14823_v60 = vld [vmem:[#allocation23_spill] sm:$0xff]  ;;  %v4078_v6 = vsub.f32 -2.45, %v14824_v22 }
 0xfac   : > { %v1850_v57 = vsub.f32 -2.45, %v14823_v60 }
 0xfad   : > { %v8524_v44 = vadd.f32 %v8515_v1, %v7416_v56  ;;  %v706_v26 = vsub.f32 %v14432_v14, %v705_v43  ;;  %v14825_v43 = vld [vmem:[#allocation8_spill] sm:$0xff] }
 0xfae   : > { %v1851_v56 = vmax.f32 %v1850_v57, 0.0 }
 0xfaf   : > { %v14605_v10 = vadd.f32 %v8524_v44, %v8521_v9 }
0x102e   : > { %v9027_v2 = vpop.f32.mrb[50].mxu1 }
0x102f   : > { %v12811_v20 = vadd.f32 %v9027_v2, %v706_v26  ;;  %v11825_v11 = vpop.f32.mrb[51].mxu1  ;;  %v2964_v26 = vsub.f32 -2.45, %v14825_v43  ;;  %v4079_v2 = vmax.f32 %v4078_v6, 0.0 }
0x1031   : > { %v9031_v21 = vmax.f32 %v12811_v20, 0.0  ;;  %v2965_v11 = vmax.f32 %v2964_v26, 0.0 }
0x1033   : > { %v9033_v33 = vsel %vm1215_vm3, %v9031_v21, 0  ;;  %v5192_v21 = vsub.f32 -2.45, %v14149_v18 }
0x1034   : > { %v9108_v50 = vand.u32 4294901760, %v9033_v33 }
0x1036   : > { %v9109_v8 = vsub.f32 %v9033_v33, %v9108_v50  ;;  %v5193_v33 = vmax.f32 %v5192_v21, 0.0 }
0x1038   : > { %v9110_v46 = vand.u32 4294901760, %v9109_v8 }
0x103a   : > { %11900 = vmatmul.mubr.f32.vlgmr.msra.gmra.mrb[52].mxu1 %v9110_v46  ;;  %v9111_v38 = vsub.f32 %v9109_v8, %v9110_v46  ;;  %v14826_v46 = vld [vmem:[#allocation25_spill] sm:$0xff] }
0x103b   : > { %12794 = vmatpush3.bf16.msra.mxu1 %v13186_v62  ;;  %11937 = vmatprep.mubr.msk.f32.mxu1 %vm12986_vm1, %v14788_v29 }
0x103c   : > { %12795 = vmatprep.subr.bf16.mxu1 %v14789_v31  ;;  %v9112_v41 = vand.u32 4294901760, %v9111_v38  ;;  %v14827_v38 = vld [vmem:[#allocation4_spill] sm:$0xff] }
0x103e   : > { %11843 = vmatmul.mubr.f32.vlgmr.msra.gmra.mrb[48].mxu0 %v9112_v41  ;;  %v4034_v41 = vadd.f32 %v14827_v38, %v14826_v46 }
0x103f   : > { %12746 = vmatpush3.bf16.msra.mxu0 %v13328_v61  ;;  %12797 = vmatpush3.bf16.msra.mxu1 %v13241_v7 }
0x1040   : > { %12747 = vmatprep.subr.bf16.mxu0 %v14789_v31  ;;  %12798 = vmatprep.subr.bf16.mxu1 %v14789_v31 }
0x1041   : > { %11861 = vmatprep.mubr.msk.f32.mxu0 %vm12986_vm1, %v14788_v29 }
0x1043   : > { %12749 = vmatpush3.bf16.msra.mxu0 %v13271_v36  ;;  %12800 = vmatpush3.bf16.msra.mxu1 %v13253_v12 }
0x1044   : > { %12750 = vmatprep.subr.bf16.mxu0 %v14789_v31  ;;  %12801 = vmatprep.subr.bf16.mxu1 %v14789_v31 }
0x1047   : > { %12752 = vmatpush3.bf16.msra.mxu0 %v13273_v48  ;;  %12803 = vmatpush3.bf16.msra.mxu1 %v13265_v17 }
0x1048   : > { %12753 = vmatprep.subr.bf16.mxu0 %v14789_v31 }
0x104a   : > { %11938 = vmatmul.mubr.f32.vlgmr.msra.gmra.mrb[54].mxu1 %v9108_v50 }
0x104b   : > { %12755 = vmatpush3.bf16.msra.mxu0 %v13275_v51 }
0x104c   : > { %12756 = vmatprep.subr.bf16.mxu0 %v14789_v31 }
0x104e   : > { %11862 = vmatmul.mubr.f32.vlgmr.msra.gmra.mrb[50].mxu0 %v9108_v50 }
0x104f   : > { %12758 = vmatpush3.bf16.msra.mxu0 %v13348_v47  ;;  %11880 = vmatprep.mubr.msk.f32.mxu0 %vm12986_vm1, %v14788_v29 }
0x1050   : > { %12759 = vmatprep.subr.bf16.mxu0 %v14789_v31 }
0x1053   : > { %12761 = vmatpush3.bf16.msra.mxu0 %v13277_v53 }
0x1054   : > { %12762 = vmatprep.subr.bf16.mxu0 %v14789_v31 }
0x1057   : > { %12764 = vmatpush3.bf16.msra.mxu0 %v13279_v54 }
0x1058   : > { %12765 = vmatprep.subr.bf16.mxu0 %v14789_v31 }
0x105b   : > { %12767 = vmatpush3.bf16.msra.mxu0 %v13281_v55 }
0x105c   : > { %12780 = vmatprep.subr.bf16.mxu0 %v14789_v31 }
0x105e   : > { %11881 = vmatmul.mubr.f32.vlgmr.msra.gmra.mrb[52].mxu0 %v9109_v8 }
0x105f   : > { %12782 = vmatpush3.bf16.msra.mxu0 %v13370_v49  ;;  %11918 = vmatprep.mubr.msk.f32.mxu0 %vm12986_vm1, %v14788_v29 }
0x1060   : > { %12783 = vmatprep.subr.bf16.mxu0 %v14789_v31 }
0x1063   : > { %12785 = vmatpush3.bf16.msra.mxu0 %v13283_v3 }
0x1064   : > { %12786 = vmatprep.subr.bf16.mxu0 %v14789_v31 }
0x1067   : > { %12788 = vmatpush3.bf16.msra.mxu0 %v13285_v4 }
0x1068   : > { %12789 = vmatprep.subr.bf16.mxu0 %v14789_v31 }
0x106b   : > { %12791 = vmatpush3.bf16.msra.mxu0 %v13287_v5  ;;  %v14655_v5 = vadd.f32 %v14498_v32, %v14494_v28 }
0x106e   : > { %11919 = vmatmul.mubr.f32.vlgmr.msra.gmra.mrb[54].mxu0 %v9108_v50  ;;  %v6306_v50 = vsub.f32 -2.45, %v14308_v37 }
0x1070   : > { %v6307_v8 = vmax.f32 %v6306_v50, 0.0 }
0x110d   : > { %v9394_v62 = vpop.f32.mrb[52].mxu1 }
0x110e   : > { %v11901_v7 = vpop.f32.mrb[53].mxu1 }
0x110f   : > { %v14829_v7 = vld [vmem:[#allocation10_spill] sm:$0xff] }
0x1111   : > { %v9114_v12 = vpop.f32.mrb[48].mxu0 }
0x1112   : > { %v11844_v17 = vpop.f32.mrb[49].mxu0 }
0x1113   : > { %v8492_v17 = vpop.permute.xlu1 %8491 }
0x111d   : > { %v9568_v36 = vpop.f32.mrb[54].mxu1 }
0x111e   : > { %v11939_v48 = vpop.f32.mrb[55].mxu1 }
0x1121   : > { %v9225_v51 = vpop.f32.mrb[50].mxu0 }
0x1122   : > { %v9226_v53 = vadd.f32 %v9225_v51, %v9114_v12  ;;  %v11863_v54 = vpop.f32.mrb[51].mxu0  ;;  %v14831_v51 = vld [vmem:[#allocation7_spill] sm:$0xff] }
0x1123   : > { %v14832_v54 = vld [vmem:[#allocation6_spill] sm:$0xff] }
0x1131   : > { %v9313_v55 = vpop.f32.mrb[52].mxu0 }
0x1132   : > { %v9314_v3 = vadd.f32 %v9313_v55, %v9226_v53  ;;  %v11882_v61 = vpop.f32.mrb[53].mxu0  ;;  %v6262_v55 = vadd.f32 %v14385_v39, %v14832_v54 }
0x1134   : > { %v9395_v47 = vadd.f32 %v9394_v62, %v9314_v3  ;;  %v14828_v62 = vld [vmem:[#allocation5_spill] sm:$0xff]  ;;  %v6266_v61 = vadd.f32 %v14389_v59, %v6262_v55 }
0x1135   : > { %v5148_v12 = vadd.f32 %v14829_v7, %v14828_v62 }
0x1136   : > { %v9804_v57 = vadd.f32 -0.64, %v6266_v61 }
0x1137   : > { %v5152_v53 = vadd.f32 %v14831_v51, %v5148_v12 }
0x1141   : > { %v9489_v49 = vpop.f32.mrb[54].mxu0 }
0x1142   : > { %v9490_v4 = vadd.f32 %v9489_v49, %v9395_v47  ;;  %v11920_v29 = vpop.f32.mrb[55].mxu0  ;;  %v7376_v47 = vadd.f32 %v14396_v19, %v14331_v30  ;;  %v8528_v49 = vpop.permute.xlu1 %8527 }
0x1143   : > { %v9798_v29 = vadd.f32 -0.64, %v5152_v53 }
0x1144   : > { %v9569_v31 = vadd.f32 %v9568_v36, %v9490_v4  ;;  %v14830_v36 = vld [vmem:[#allocation19_spill] sm:$0xff]  ;;  %v8490_v4 = vadd.f32 %v14596_v58, %v14518_v25 }
0x1145   : > { %v4038_v48 = vadd.f32 %v14830_v36, %v4034_v41 }
0x1146   : > { %v9572_v23 = vadd.f32 %v9569_v31, %v14510_v34  ;;  %v7380_v31 = vadd.f32 %v14398_v13, %v7376_v47 }
0x1147   : > { %v9792_v3 = vadd.f32 -0.64, %v4038_v48 }
0x1148   : > { %v9573_v14 = vadd.f32 %v14503_v45, %v9572_v23  ;;  %v9810_v39 = vadd.f32 -0.64, %v7380_v31  ;;  %v9820_v31 = vld [vmem:[%s13416_s22 + $0x38] sm:$0xff]  ;;  %s9761_s22 = sshll.u32 %s14838_s16, 3 }
0x1149   : > { %s501_s27 = scalar_lea.vmem %s14745_s10, %s9761_s22 }
0x114a   : > { %v9574_v63 = vadd.f32 %v9573_v14, %v14655_v5  ;;  %v4040_v14 = vmax.f32 %v9792_v3, 0.0  ;;  %v7382_v58 = vmax.f32 %v9810_v39, 0.0 }
0x114c   : > { %9582 = vrot.lane.b32.xlu1 %v9574_v63, %s12991_s21  ;;  %v9821_v1 = vadd.f32 -0.5, %v9574_v63  ;;  %v9823_v9 = vadd.f32 0.7, %v9574_v63  ;;  %v9824_v44 = vadd.f32 -0.6, %v9574_v63  ;;  %v9634_v16 = vsub.f32 0.5, %v9574_v63 }
0x114d   : > { %v9825_v23 = vadd.f32 -0.7, %v9574_v63  ;;  %v9576_v30 = vsub.f32 %v14579_v27, %v9574_v63  ;;  %v8530_v27 = vadd.f32 %v8528_v49, %v14605_v10 }
0x114e   : > { %v9597_v42 = vmul.f32 %v9821_v1, %v9821_v1  ;;  %v9611_v24 = vand.u32 2147483647, %v9823_v9  ;;  %v9615_v15 = vand.u32 2147483647, %v9824_v44  ;;  %v9635_v20 = vmax.f32 %v9634_v16, 0.0 }
0x114f   : > { %v5154_v9 = vmax.f32 %v9798_v29, 0.0  ;;  %v9629_v44 = vand.u32 2147483647, %v9825_v23  ;;  %v9586_v26 = vmul.f32 0.3, %v9576_v30 }
0x1150   : > { %1853 = vrot.lane.b32.xlu1 %v1851_v56, %s12993_s25  ;;  %9599 = vrot.lane.b32.xlu0 %v9597_v42, %s12992_s18  ;;  %v14664_v32 = vsub.f32 0.3, %v9611_v24  ;;  %v9616_v34 = vsub.f32 0.6, %v9615_v15  ;;  %v8494_v56 = vadd.f32 %v8492_v17, %v8490_v4  ;;  %v14833_v24 = vld [vmem:[#allocation24_spill] sm:$0xff]  ;;  %v6268_v15 = vmax.f32 %v9804_v57, 0.0 }
0x1151   : > { %v4041_v59 = vadd.f32 %v4040_v14, %v14833_v24  ;;  %v9630_v13 = vsub.f32 0.3, %v9629_v44  ;;  %v7420_v23 = vsub.f32 -2.45, %v14494_v28  ;;  %v8534_v14 = vsub.f32 -2.45, %v14655_v5 }
0x1152   : > { %v9613_v45 = vmax.f32 %v14664_v32, 0.0  ;;  %v9617_v40 = vmax.f32 %v9616_v34, 0.0  ;;  %v9816_v32 = vadd.f32 -0.64, %v8494_v56  ;;  %v9575_v57 = vadd.f32 %v9820_v31, %v14655_v5 }
0x1153   : > { %v5155_v25 = vadd.f32 %v5154_v9, %v4041_v59  ;;  %v9631_v50 = vmax.f32 %v9630_v13, 0.0  ;;  %v7421_v56 = vmax.f32 %v7420_v23, 0.0  ;;  %v2961_v59 = vsub.f32 1.1, %v14825_v43 }
0x1154   : > { %9619 = vrot.lane.b32.xlu1 %v9613_v45, %s12992_s18  ;;  %9603 = vrot.lane.b32.xlu0 %v9597_v42, %s12991_s21  ;;  %v8496_v16 = vmax.f32 %v9816_v32, 0.0  ;;  %v9646_v9 = vsub.f32 -2.45, %v9575_v57 }
0x1155   : > { %v2962_v32 = vmax.f32 %v2961_v59, 0.0 }
0x1156   : > { %v9647_v39 = vmax.f32 %v9646_v9, 0.0 }
0x1158   : > { %9624 = vrot.lane.b32.xlu1 %v9617_v40, %s12991_s21  ;;  %9578 = vrot.lane.b32.xlu0 %v9574_v63, %s12992_s18  ;;  %v6269_v40 = vadd.f32 %v6268_v15, %v5155_v25  ;;  %v9587_v63 = vadd.f32 %v9586_v26, %v9576_v30  ;;  %v4075_v30 = vsub.f32 1.1, %v14824_v22 }
0x115a   : > { %v7383_v21 = vadd.f32 %v7382_v58, %v6269_v40  ;;  %v5189_v40 = vsub.f32 1.1, %v14149_v18 }
0x115c   : > { %9639 = vrot.lane.b32.xlu0 %v9635_v20, %s12991_s21  ;;  %4081 = vrot.lane.b32.xlu1 %v4079_v2, %s12993_s25  ;;  %v8497_v62 = vadd.f32 %v8496_v16, %v7383_v21 }
0x1160   : > { %2967 = vrot.lane.b32.xlu0 %v2965_v11, %s12993_s25 }
0x1164   : > { %5195 = vrot.lane.b32.xlu0 %v5193_v33, %s12993_s25 }
0x1168   : > { %6309 = vrot.lane.b32.xlu0 %v6307_v8, %s12993_s25 }
0x11be   : > { %v9583_v1 = vpop.permute.xlu1 %9582 }
0x11bf   : > { %v9585_v33 = vsub.f32 %v14593_v52, %v9583_v1  ;;  %v8535_v1 = vmax.f32 %v8534_v14, 0.0 }
0x11c1   : > { %v9589_v36 = vadd.f32 %v9586_v26, %v9585_v33  ;;  %v7417_v33 = vsub.f32 1.1, %v14494_v28 }
0x11c2   : > { %v1854_v19 = vpop.permute.xlu1 %1853  ;;  %v9600_v34 = vpop.permute.xlu0 %9599 }
0x11c3   : > { %v9602_v6 = vadd.f32 %v9600_v34, %v9597_v42  ;;  %v9593_v61 = vand.u32 2147483647, %v9589_v36 }
0x11c6   : > { %v9620_v2 = vpop.permute.xlu1 %9619  ;;  %v9604_v20 = vpop.permute.xlu0 %9603 }
0x11c7   : > { %v9606_v11 = vadd.f32 %v9604_v20, %v9602_v6  ;;  %v9622_v8 = vmin.f32 %v9613_v45, %v9620_v2  ;;  %v9632_v42 = vmin.f32 %v9631_v50, %v9620_v2  ;;  %v9590_v45 = vand.u32 2147483647, %v9587_v63 }
0x11c8   : > { %v4076_v6 = vmax.f32 %v4075_v30, 0.0  ;;  %v5190_v2 = vmax.f32 %v5189_v40, 0.0 }
0x11c9   : > { %v9822_v46 = vadd.f32 -0.64, %v9606_v11 }
0x11ca   : > { %v9625_v38 = vpop.permute.xlu1 %9624  ;;  %v9579_v41 = vpop.permute.xlu0 %9578 }
0x11cb   : > { %v9608_v7 = vmax.f32 %v9822_v46, 0.0  ;;  %v9627_v12 = vmin.f32 %v9622_v8, %v9625_v38  ;;  %v9581_v17 = vsub.f32 %v14586_v0, %v9579_v41  ;;  %v9633_v48 = vmin.f32 %v9632_v42, %v9625_v38 }
0x11cc   : > { %v7418_v46 = vmax.f32 %v7417_v33, 0.0  ;;  %v8531_v38 = vsub.f32 1.1, %v14655_v5  ;;  %v9643_v42 = vsub.f32 1.1, %v9575_v57 }
0x11cd   : > { %v9636_v51 = vadd.f32 %v9627_v12, %v8530_v27  ;;  %v9588_v52 = vadd.f32 %v9586_v26, %v9581_v17  ;;  %v9609_v53 = vadd.f32 %v9608_v7, %v8497_v62 }
0x11ce   : > { %v9640_v3 = vpop.permute.xlu0 %9639  ;;  %v4082_v16 = vpop.permute.xlu1 %4081  ;;  %v8532_v41 = vmax.f32 %v8531_v38, 0.0  ;;  %v9644_v17 = vmax.f32 %v9643_v42, 0.0 }
0x11cf   : > { %v9591_v54 = vand.u32 2147483647, %v9588_v52  ;;  %v9637_v55 = vadd.f32 %v9636_v51, %v9633_v48  ;;  %v9660_v10 = vsel %vm9653_vm4, %v9609_v53, 0.0 }
0x11d0   : > { %9661 = vadd.xlane.f32.xlu0 %v9660_v10 }
0x11d1   : > { %v9592_v47 = vadd.f32 %v9591_v54, %v9590_v45  ;;  %v9642_v49 = vadd.f32 %v9640_v3, %v9637_v55 }
0x11d2   : > { %v2968_v34 = vpop.permute.xlu0 %2967 }
0x11d3   : > { %v9657_v4 = vsel %vm9653_vm4, %v9642_v49, 0.0  ;;  %v9594_v0 = vadd.f32 %v9593_v61, %v9592_v47 }
0x11d4   : > { %9658 = vadd.xlane.f32.xlu1 %v9657_v4 }
0x11d5   : > { %v9595_v29 = vadd.f32 %v9594_v0, %v14601_v35  ;;  %v1847_v35 = vsub.f32 1.1, %v14823_v60  ;;  %v6303_v60 = vsub.f32 1.1, %v14308_v37 }
0x11d6   : > { %v5196_v11 = vpop.permute.xlu0 %5195 }
0x11d7   : > { %v9654_v44 = vsel %vm9653_vm4, %v9595_v29, 0.0  ;;  %v1848_v24 = vmax.f32 %v1847_v35, 0.0  ;;  %v6304_v43 = vmax.f32 %v6303_v60, 0.0 }
0x11d9   : > { %v1856_v15 = vadd.f32 %v1854_v19, %v1848_v24 }
0x11da   : > { %v6310_v22 = vpop.permute.xlu0 %6309 }
0x11db   : > { %v2963_v25 = vadd.f32 %v2962_v32, %v1856_v15 }
0x11dd   : > { %v2970_v58 = vadd.f32 %v2968_v34, %v2963_v25 }
0x11df   : > { %v4077_v13 = vadd.f32 %v4076_v6, %v2970_v58 }
0x11e1   : > { %v4084_v26 = vadd.f32 %v4082_v16, %v4077_v13 }
0x11e3   : > { %v5191_v20 = vadd.f32 %v5190_v2, %v4084_v26 }
0x11e5   : > { %7423 = vrot.lane.b32.xlu1 %v7421_v56, %s12993_s25  ;;  %v5198_v21 = vadd.f32 %v5196_v11, %v5191_v20 }
0x11e6   : > { %8537 = vrot.lane.b32.xlu0 %v8535_v1, %s12993_s25 }
0x11e7   : > { %v6305_v19 = vadd.f32 %v6304_v43, %v5198_v21 }
0x11e9   : > { %v6312_v8 = vadd.f32 %v6310_v22, %v6305_v19 }
0x11ea   : > { %9649 = vrot.lane.b32.xlu0 %v9647_v39, %s12993_s25 }
0x11eb   : > { %v7419_v18 = vadd.f32 %v7418_v46, %v6312_v8 }
0x1209   : > { %9655 = vadd.xlane.f32.xlu1 %v9654_v44 }
0x125d   : > { %v9662_v62 = vpop.xlane.xlu0 %9661 }
0x1261   : > { %v9659_v50 = vpop.xlane.xlu1 %9658  ;;  %v8538_v7 = vpop.permute.xlu0 %8537 }
0x1262   : > { %v9663_v51 = vadd.f32 %v9662_v62, %v9659_v50 }
0x1265   : > { %v7424_v27 = vpop.permute.xlu1 %7423  ;;  %v9650_v28 = vpop.permute.xlu0 %9649 }
0x1266   : > { %v7426_v63 = vadd.f32 %v7424_v27, %v7419_v18 }
0x1268   : > { %v8533_v37 = vadd.f32 %v8532_v41, %v7426_v63 }
0x126a   : > { %v8540_v12 = vadd.f32 %v8538_v7, %v8533_v37 }
0x126c   : > { %v9645_v36 = vadd.f32 %v9644_v17, %v8540_v12 }
0x126e   : > { %v9652_v48 = vadd.f32 %v9650_v28, %v9645_v36 }
0x1270   : > { %v9664_v52 = vadd.f32 %v9663_v51, %v9652_v48 }
0x1272   : > { %v9665_v53 = vmul.f32 100000.0, %v9664_v52 }
0x1296   : > { %v9656_v45 = vpop.xlane.xlu1 %9655 }
0x1297   : > { %v9666_v5 = vadd.f32 %v9665_v53, %v9656_v45 }
0x1299   : > { %9668 = vrot.lane.b32.xlu0 %v9666_v5, %s12991_s21 }
0x130b   : > { %v9669_v54 = vpop.permute.xlu0 %9668 }
0x130c   : > { %9672 = vst.msk [vmem:[%s501_s27] sm:$0xff] %vm9671_vm5, %v9669_v54 }
0x130d PF: > { %p17_p9 = scmp.ge.s32.totalorder %s13066_s17, 4   ;;  %s14834_s13 = smov %s12979_s14 }
0x130e   : > { %s14835_s14 = smov %s13075_s20  ;;  %s14836_s15 = smov %s13066_s17 }
0x130f   :  { %19 = sbr.rel (!%p17_p9) target bundleno = 2 (0x2), region = 193 }

</bundles_post_ra>
